<compile_context>
chip_gen: v7x
topology: tpu7x:2x2x1
jax: 0.10.0
libtpu: 0.0.40
codegen_flags: <defaults>
</compile_context>

<pallas_src>
import functools

import jax
import jax.numpy as jnp
import numpy as np
from jax import lax
from jax.experimental import pallas as pl
from jax.experimental.pallas import tpu as pltpu


def _round_up(x, m):
    return (x + m - 1) // m * m


def _nbytes(shape, dtype):
    return int(np.prod(shape)) * jnp.dtype(dtype).itemsize


def _pick_batch_tile(b_pad, target):
    """Largest multiple-of-8 divisor of b_pad <= target; prefer >= 2 tiles (v7x)."""
    divs = [d for d in range(8, b_pad + 1, 8) if b_pad % d == 0]
    cand = [d for d in divs if d <= target]
    best = max(cand) if cand else divs[0]
    if b_pad // best < 2:
        # v7x has 2 TensorCores: prefer >= 2 tiles on the "parallel" axis as long as
        # each half still feeds the MXU with a reasonable M, or the batch is small
        # enough that halving is the only way to keep core 1 busy.
        halves = [d for d in divs if b_pad // d >= 2 and (d >= 64 or d * 2 == b_pad)]
        if halves:
            best = max(halves)
    return best


def _decoder_step_kernel(
    # inputs
    enc_ref, go_ref, emb_ref,
    whfc_ref, bhfc_ref,
    wgh_ref, wgw_ref, wge_ref, bg_ref,
    wwh_ref, www_ref, wwe_ref, bw_ref,
    h0_ref, c0_ref,
    # outputs
    words_ref, attn_ref, hout_ref, cout_ref,
    # scratch (persists across the sequential time axis of the grid)
    h_scr, c_scr, e_scr,
    *, t_valid, v_valid,
):
    f32, bf16 = jnp.float32, jnp.bfloat16
    t = pl.program_id(1)
    n_steps = pl.num_programs(1)
    tb, t_pad, H = enc_ref.shape          # padded batch tile, padded T, dhid
    v_pad, D = emb_ref.shape              # padded vocab, demb
    neg_big = jnp.float32(-1e30)

    # (Re)initialize the recurrent carry at the first decode step of every batch tile.
    @pl.when(t == 0)
    def _():
        h_scr[...] = h0_ref[...]
        c_scr[...] = c0_ref[...]
        e_scr[...] = jnp.broadcast_to(go_ref[...], (tb, D))      # <go> embedding

    h_tm1 = h_scr[...]
    c_tm1 = c_scr[...]
    e_t = e_scr[...]
    enc = enc_ref[...]                    # (tb, T_pad, H) bf16, re-read every step

    t_iota = lax.broadcasted_iota(jnp.int32, (1, 1, t_pad), 2)
    t_mask = t_iota < t_valid             # mask padded encoder time steps
    v_iota = lax.broadcasted_iota(jnp.int32, (tb, v_pad), 1)
    v_mask = v_iota < v_valid             # mask padded vocab ids

    h_b = h_tm1.astype(bf16)
    e_b = e_t.astype(bf16)

    # ---- h_tm1_fc: Linear(dhid, dhid) ----
    h_fc = jnp.dot(h_b, whfc_ref[...], preferred_element_type=f32) + bhfc_ref[...]

    # ---- DotAttn (batched MXU matmuls with q = 1); softmax over the real T only ----
    raw = jnp.einsum("bqh,bth->bqt", h_fc[:, None, :].astype(bf16), enc,
                     preferred_element_type=f32)                       # (tb, 1, T)
    raw = jnp.where(t_mask, raw, neg_big)
    raw = raw - jnp.max(raw, axis=2, keepdims=True)
    ex = jnp.exp(raw)
    score = ex * pl.reciprocal(jnp.sum(ex, axis=2, keepdims=True), approx=True)
    weighted = jnp.einsum("bqt,bth->bqh", score.astype(bf16), enc,
                          preferred_element_type=f32)[:, 0, :]         # (tb, H)
    w_b = weighted.astype(bf16)

    # ---- LSTMCell gates: 3 MXU matmuls accumulated in f32 vregs (no VMEM slab) ----
    gates = (jnp.dot(h_b, wgh_ref[...], preferred_element_type=f32)
             + jnp.dot(w_b, wgw_ref[...], preferred_element_type=f32)
             + jnp.dot(e_b, wge_ref[...], preferred_element_type=f32)
             + bg_ref[...])                                            # (tb, 4H)
    i_g = jax.nn.sigmoid(gates[:, 0 * H:1 * H])
    f_g = jax.nn.sigmoid(gates[:, 1 * H:2 * H])
    g_g = jnp.tanh(gates[:, 2 * H:3 * H])
    o_g = jax.nn.sigmoid(gates[:, 3 * H:4 * H])
    c_t = f_g * c_tm1 + i_g * g_g
    h_t = o_g * jnp.tanh(c_t)

    # ---- word head Linear(2*dhid + demb, demb): again 3 accumulated matmuls ----
    word_emb = (jnp.dot(h_t.astype(bf16), wwh_ref[...], preferred_element_type=f32)
                + jnp.dot(w_b, www_ref[...], preferred_element_type=f32)
                + jnp.dot(e_b, wwe_ref[...], preferred_element_type=f32)
                + bw_ref[...])                                         # (tb, D)

    # ---- logits over the vocab: word_emb @ emb.T (single emb copy in VMEM) ----
    logits = lax.dot_general(word_emb.astype(bf16), emb_ref[...],
                             (((1,), (1,)), ((), ())),
                             preferred_element_type=f32)               # (tb, V)

    # Per-step streamed outputs (bf16): these (1, tb, V_pad)/(1, tb, T_pad) blocks are
    # double-buffered by the pipeline, so their HBM writeback overlaps step t+1.
    words_ref[0] = logits.astype(words_ref.dtype)
    attn_ref[0] = score[:, 0, :].astype(attn_ref.dtype)

    # ---- carry update ----
    h_scr[...] = h_t
    c_scr[...] = c_t

    # ---- greedy argmax + embedding feedback (not needed after the last step) ----
    @pl.when(t < n_steps - 1)
    def _():
        masked = jnp.where(v_mask, logits, neg_big)
        mx = jnp.max(masked, axis=1, keepdims=True)
        cand = jnp.where(masked == mx, v_iota, v_pad)
        w_t = jnp.min(cand, axis=1, keepdims=True)     # first-occurrence tie-break
        onehot = (v_iota == w_t).astype(jnp.bfloat16)  # (tb, V)
        # TODO(synk): replace the one-hot @ emb MXU matmul with a row gather
        # (DMA gather / dynamic sublane gather) once available in this toolchain;
        # it sits on the serial e_{t+1} dependency chain.
        e_scr[...] = jnp.dot(onehot, emb_ref[...], preferred_element_type=f32)

    @pl.when(t == n_steps - 1)
    def _():
        hout_ref[...] = h_t
        cout_ref[...] = c_t


def language_decoder_forward(enc, params, state_0, max_decode, batch_tile=128):
    """Greedy (argmax student-forcing) decode for `max_decode` steps (eval path)."""
    assert max_decode >= 1
    B, T, H = enc.shape
    V, D = params["emb"].shape
    h0, c0 = state_0
    f32, bf16 = jnp.float32, jnp.bfloat16

    # Pad batch to sublanes (>=8), T/V to lanes (128): dense vregs / MXU tiles.
    B_pad = _round_up(max(B, 8), 8)
    T_pad = _round_up(T, 128)
    V_pad = _round_up(V, 128)
    bt = _pick_batch_tile(B_pad, batch_tile)
    nb = B_pad // bt

    enc_p = jnp.zeros((B_pad, T_pad, H), bf16).at[:B, :T, :].set(enc.astype(bf16))
    emb_p = jnp.zeros((V_pad, D), bf16).at[:V, :].set(params["emb"].astype(bf16))
    h0_p = jnp.zeros((B_pad, H), f32).at[:B, :].set(h0.astype(f32))
    c0_p = jnp.zeros((B_pad, H), f32).at[:B, :].set(c0.astype(f32))

    # Pre-transposed weight blocks (bf16 MXU operands, f32 biases).  The fused
    # [h | weighted | e] activation slab is gone: each fused matmul is split into
    # three MXU matmuls accumulated in f32 inside the kernel.
    w_ih, w_hh = params["w_ih"], params["w_hh"]          # (4H, H+D), (4H, H)
    wg_h = w_hh.T.astype(bf16)                           # (H, 4H)
    wg_w = w_ih[:, :H].T.astype(bf16)                    # (H, 4H)
    wg_e = w_ih[:, H:].T.astype(bf16)                    # (D, 4H)
    b_g = (params["b_ih"] + params["b_hh"]).reshape(1, 4 * H).astype(f32)
    w_word = params["w_word"]                            # (D, 2H+D) over [h|weighted|e]
    ww_h = w_word[:, :H].T.astype(bf16)                  # (H, D)
    ww_w = w_word[:, H:2 * H].T.astype(bf16)             # (H, D)
    ww_e = w_word[:, 2 * H:].T.astype(bf16)              # (D, D)
    b_w = params["b_word"].reshape(1, D).astype(f32)
    w_hfc = params["w_hfc"].T.astype(bf16)               # (H, H)
    b_hfc = params["b_hfc"].reshape(1, H).astype(f32)
    go = params["go"].reshape(1, D).astype(f32)

    kernel_inputs = (enc_p, go, emb_p, w_hfc, b_hfc,
                     wg_h, wg_w, wg_e, b_g, ww_h, ww_w, ww_e, b_w, h0_p, c0_p)

    # Shapes of grid-invariant operands, same order as kernel_inputs[1:13].
    const_shapes = [(1, D), (V_pad, D), (H, H), (1, H),
                    (H, 4 * H), (H, 4 * H), (D, 4 * H), (1, 4 * H),
                    (H, D), (H, D), (D, D), (1, D)]

    # VMEM budget: size the limit from the actual per-tile footprint (with headroom),
    # clamped to the device's physical VMEM.
    const_bytes = (_nbytes((1, D), f32) + _nbytes((V_pad, D), bf16)
                   + _nbytes((H, H), bf16) + _nbytes((1, H), f32)
                   + 2 * _nbytes((H, 4 * H), bf16) + _nbytes((D, 4 * H), bf16)
                   + _nbytes((1, 4 * H), f32)
                   + 2 * _nbytes((H, D), bf16) + _nbytes((D, D), bf16)
                   + _nbytes((1, D), f32))
    est = (2 * _nbytes((bt, T_pad, H), bf16)             # enc (double-buffered)
           + 2 * 2 * _nbytes((bt, H), f32)               # h0, c0
           + 2 * const_bytes                             # worst case (no Buffered(1))
           + 2 * _nbytes((1, bt, V_pad), bf16)           # per-step logits block
           + 2 * _nbytes((1, bt, T_pad), bf16)           # per-step attn block
           + 2 * 2 * _nbytes((bt, H), f32)               # final h / c blocks
           + 2 * _nbytes((bt, H), f32) + _nbytes((bt, D), f32))   # carry scratch
    try:
        vmem_cap = int(pltpu.get_tpu_info().vmem_capacity_bytes)
    except Exception:
        vmem_cap = 64 << 20                              # v7x physical VMEM per core
    vmem_limit = int(min(max(1.4 * est + (8 << 20), 32 << 20), vmem_cap - (4 << 20)))

    out_shape = (
        jax.ShapeDtypeStruct((max_decode, B_pad, V_pad), bf16),   # streamed logits
        jax.ShapeDtypeStruct((max_decode, B_pad, T_pad), bf16),   # streamed attention
        jax.ShapeDtypeStruct((B_pad, H), f32),                    # final h
        jax.ShapeDtypeStruct((B_pad, H), f32),                    # final c
    )
    kernel = functools.partial(_decoder_step_kernel, t_valid=T, v_valid=V)

    def run(single_buffer_consts):
        def const_spec(shape):
            zeros = lambda b, t: (0,) * len(shape)
            if single_buffer_consts:
                # Grid-invariant operands: one VMEM buffer is enough (constant
                # index map => never a second in-flight copy). Halves their VMEM.
                return pl.BlockSpec(shape, zeros, pipeline_mode=pl.Buffered(1))
            return pl.BlockSpec(shape, zeros)

        in_specs = [pl.BlockSpec((bt, T_pad, H), lambda b, t: (b, 0, 0))]   # enc
        in_specs += [const_spec(s) for s in const_shapes]                   # weights etc.
        in_specs += [pl.BlockSpec((bt, H), lambda b, t: (b, 0)),            # h0
                     pl.BlockSpec((bt, H), lambda b, t: (b, 0))]            # c0
        out_specs = [
            pl.BlockSpec((1, bt, V_pad), lambda b, t: (t, b, 0)),           # logits @ t
            pl.BlockSpec((1, bt, T_pad), lambda b, t: (t, b, 0)),           # attn  @ t
            pl.BlockSpec((bt, H), lambda b, t: (b, 0)),                     # final h
            pl.BlockSpec((bt, H), lambda b, t: (b, 0)),                     # final c
        ]
        return pl.pallas_call(
            kernel,
            out_shape=out_shape,
            grid_spec=pltpu.PrefetchScalarGridSpec(
                num_scalar_prefetch=0,
                grid=(nb, max_decode),
                in_specs=in_specs,
                out_specs=out_specs,
                scratch_shapes=[pltpu.VMEM((bt, H), f32),   # h carry
                                pltpu.VMEM((bt, H), f32),   # c carry
                                pltpu.VMEM((bt, D), f32)],  # e_t carry
            ),
            compiler_params=pltpu.CompilerParams(
                dimension_semantics=("parallel", "arbitrary"),
                vmem_limit_bytes=vmem_limit,
            ),
        )(*kernel_inputs)

    try:
        words, attn, h_t, c_t = run(True)
    except Exception:
        # pipeline_mode=pl.Buffered(1) not supported by this jax build: fall back to
        # default double buffering (same results, just more VMEM for constants).
        words, attn, h_t, c_t = run(False)

    # NOTE: downstream consumers that can take the (max_decode, B, V) bf16 layout
    # directly should skip these transposes (they re-stream the largest tensor).
    out_words = jnp.transpose(words, (1, 0, 2))[:B, :, :V]               # (B, max_t, V)
    out_attn = jnp.transpose(attn, (1, 0, 2))[:B, :, :T][..., None]      # (B, max_t, T, 1)
    h_t = h_t[:B]
    c_t = c_t[:B]

    results = {
        "out_lang_instr": out_words,
        "out_attn_scores": out_attn,
        "state_t": (h_t, c_t),
        "out_obj_vis_score": None,
        "out_state_change_score": None,
        "valid_object_indices": None,
    }
    return results, (h_t, c_t)


# ----------------------- pure-JAX reference (one step) -----------------------
def _ref_step(enc, e_t, h, c, p):
    H = h.shape[1]
    h_fc = h @ p["w_hfc"].T + p["b_hfc"]
    raw = jnp.einsum("btd,bd->bt", enc, h_fc)
    score = jax.nn.softmax(raw, axis=1)
    weighted = jnp.einsum("bt,btd->bd", score, enc)
    inp = jnp.concatenate([weighted, e_t], axis=1)
    gates = inp @ p["w_ih"].T + p["b_ih"] + h @ p["w_hh"].T + p["b_hh"]
    i_g = jax.nn.sigmoid(gates[:, 0 * H:1 * H])
    f_g = jax.nn.sigmoid(gates[:, 1 * H:2 * H])
    g_g = jnp.tanh(gates[:, 2 * H:3 * H])
    o_g = jax.nn.sigmoid(gates[:, 3 * H:4 * H])
    c_t = f_g * c + i_g * g_g
    h_t = o_g * jnp.tanh(c_t)
    cont = jnp.concatenate([h_t, inp], axis=1)
    word_emb = cont @ p["w_word"].T + p["b_word"]
    logits = word_emb @ p["emb"].T
    return logits, score


if __name__ == "__main__":
    B, T, H, D, V = 2, 8, 32, 32, 64   # batch, enc time, dhid, demb, vocab
    MAX_DECODE = 6

    key = jax.random.PRNGKey(0)
    ks = jax.random.split(key, 12)
    u = lambda k, shape, s=0.1: jax.random.uniform(k, shape, jnp.float32, -s, s)

    params = {
        "emb": jax.random.normal(ks[0], (V, D), jnp.float32) * 0.1,
        "go": u(ks[1], (D,)),
        "w_hfc": u(ks[2], (H, H)),
        "b_hfc": u(ks[3], (H,)),
        "w_ih": u(ks[4], (4 * H, H + D)),
        "w_hh": u(ks[5], (4 * H, H)),
        "b_ih": u(ks[6], (4 * H,)),
        "b_hh": u(ks[7], (4 * H,)),
        "w_word": u(ks[8], (D, 2 * H + D)),
        "b_word": u(ks[9], (D,)),
    }

    enc = jax.random.normal(ks[10], (B, T, H), jnp.float32) * 0.5
    h0 = jax.random.normal(ks[11], (B, H), jnp.float32) * 0.1
    c0 = jnp.zeros((B, H), jnp.float32)

    results, state_t = language_decoder_forward(enc, params, (h0, c0), MAX_DECODE)
    jax.block_until_ready(results["out_lang_instr"])

    # shape / sanity checks
    assert results["out_lang_instr"].shape == (B, MAX_DECODE, V)
    assert results["out_attn_scores"].shape == (B, MAX_DECODE, T, 1)
    assert state_t[0].shape == (B, H) and state_t[1].shape == (B, H)
    assert bool(jnp.all(jnp.isfinite(results["out_lang_instr"].astype(jnp.float32))))
    assert bool(jnp.all(jnp.isfinite(results["out_attn_scores"].astype(jnp.float32))))

    # numerical check against a pure-JAX f32 reference for the first decode step
    # (step 0 is independent of the argmax feedback chain). Tolerances account for
    # bf16 MXU operands, bf16 output storage and the approx softmax reciprocal.
    e0 = jnp.broadcast_to(params["go"][None, :], (B, D))
    ref_logits0, ref_score0 = _ref_step(enc, e0, h0, c0, params)
    np.testing.assert_allclose(
        np.asarray(results["out_lang_instr"][:, 0, :].astype(jnp.float32)),
        np.asarray(ref_logits0), rtol=5e-2, atol=2e-2)
    np.testing.assert_allclose(
        np.asarray(results["out_attn_scores"][:, 0, :, 0].astype(jnp.float32)),
        np.asarray(ref_score0), rtol=5e-2, atol=2e-2)

    print("KERNEL_OK")
</pallas_src>

<mosaic_0001>
module attributes {stable_mosaic.version = 11 : i64} {
  func.func @_decoder_step_kernel(%arg0: i32, %arg1: i32, %arg2: memref<8x128x32xbf16, #tpu.memory_space<vmem>>, %arg3: memref<1x32xf32, #tpu.memory_space<vmem>>, %arg4: memref<128x32xbf16, #tpu.memory_space<vmem>>, %arg5: memref<32x32xbf16, #tpu.memory_space<vmem>>, %arg6: memref<1x32xf32, #tpu.memory_space<vmem>>, %arg7: memref<32x128xbf16, #tpu.memory_space<vmem>>, %arg8: memref<32x128xbf16, #tpu.memory_space<vmem>>, %arg9: memref<32x128xbf16, #tpu.memory_space<vmem>>, %arg10: memref<1x128xf32, #tpu.memory_space<vmem>>, %arg11: memref<32x32xbf16, #tpu.memory_space<vmem>>, %arg12: memref<32x32xbf16, #tpu.memory_space<vmem>>, %arg13: memref<32x32xbf16, #tpu.memory_space<vmem>>, %arg14: memref<1x32xf32, #tpu.memory_space<vmem>>, %arg15: memref<8x32xf32, #tpu.memory_space<vmem>>, %arg16: memref<8x32xf32, #tpu.memory_space<vmem>>, %arg17: memref<1x8x128xbf16, #tpu.memory_space<vmem>>, %arg18: memref<1x8x128xbf16, #tpu.memory_space<vmem>>, %arg19: memref<8x32xf32, #tpu.memory_space<vmem>>, %arg20: memref<8x32xf32, #tpu.memory_space<vmem>>, %arg21: memref<8x32xf32, #tpu.memory_space<vmem>>, %arg22: memref<8x32xf32, #tpu.memory_space<vmem>>, %arg23: memref<8x32xf32, #tpu.memory_space<vmem>>) attributes {dimension_semantics = [#tpu.dimension_semantics<parallel>, #tpu.dimension_semantics<arbitrary>], iteration_bounds = array<i64: 1, 6>, scalar_prefetch = 0 : i64, scratch_operands = 3 : i64, tpu.core_type = #tpu.core_type<tc>, window_params = [{transform_indices = @transform_0, window_bounds = array<i64: 8, 128, 32>}, {pipeline_mode = #tpu.pipeline_mode<synchronous>, transform_indices = @transform_1, window_bounds = array<i64: 1, 32>}, {pipeline_mode = #tpu.pipeline_mode<synchronous>, transform_indices = @transform_2, window_bounds = array<i64: 128, 32>}, {pipeline_mode = #tpu.pipeline_mode<synchronous>, transform_indices = @transform_3, window_bounds = array<i64: 32, 32>}, {pipeline_mode = #tpu.pipeline_mode<synchronous>, transform_indices = @transform_4, window_bounds = array<i64: 1, 32>}, {pipeline_mode = #tpu.pipeline_mode<synchronous>, transform_indices = @transform_5, window_bounds = array<i64: 32, 128>}, {pipeline_mode = #tpu.pipeline_mode<synchronous>, transform_indices = @transform_6, window_bounds = array<i64: 32, 128>}, {pipeline_mode = #tpu.pipeline_mode<synchronous>, transform_indices = @transform_7, window_bounds = array<i64: 32, 128>}, {pipeline_mode = #tpu.pipeline_mode<synchronous>, transform_indices = @transform_8, window_bounds = array<i64: 1, 128>}, {pipeline_mode = #tpu.pipeline_mode<synchronous>, transform_indices = @transform_9, window_bounds = array<i64: 32, 32>}, {pipeline_mode = #tpu.pipeline_mode<synchronous>, transform_indices = @transform_10, window_bounds = array<i64: 32, 32>}, {pipeline_mode = #tpu.pipeline_mode<synchronous>, transform_indices = @transform_11, window_bounds = array<i64: 32, 32>}, {pipeline_mode = #tpu.pipeline_mode<synchronous>, transform_indices = @transform_12, window_bounds = array<i64: 1, 32>}, {transform_indices = @transform_13, window_bounds = array<i64: 8, 32>}, {transform_indices = @transform_14, window_bounds = array<i64: 8, 32>}, {transform_indices = @transform_15, window_bounds = array<i64: 1, 8, 128>}, {transform_indices = @transform_16, window_bounds = array<i64: 1, 8, 128>}, {transform_indices = @transform_17, window_bounds = array<i64: 8, 32>}, {transform_indices = @transform_18, window_bounds = array<i64: 8, 32>}]} {
    %c0_i32 = arith.constant 0 : i32
    %0 = arith.cmpi eq, %arg1, %c0_i32 : i32
    %1 = arith.extui %0 : i1 to i32
    %c0_i32_0 = arith.constant 0 : i32
    %2 = arith.cmpi ne, %1, %c0_i32_0 : i32
    scf.if %2 {
      %c0_60 = arith.constant 0 : index
      %c0_61 = arith.constant 0 : index
      %109 = vector.load %arg15[%c0_60, %c0_61] : memref<8x32xf32, #tpu.memory_space<vmem>>, vector<8x32xf32>
      %c0_62 = arith.constant 0 : index
      %c0_63 = arith.constant 0 : index
      %110 = vector.load %arg21[%c0_62, %c0_63] : memref<8x32xf32, #tpu.memory_space<vmem>>, vector<8x32xf32>
      tpu.vector_store %arg21[%c0_62, %c0_63], %109 {strides = array<i32>} : memref<8x32xf32, #tpu.memory_space<vmem>>, vector<8x32xf32>,
      %c0_64 = arith.constant 0 : index
      %c0_65 = arith.constant 0 : index
      %111 = vector.load %arg16[%c0_64, %c0_65] : memref<8x32xf32, #tpu.memory_space<vmem>>, vector<8x32xf32>
      %c0_66 = arith.constant 0 : index
      %c0_67 = arith.constant 0 : index
      %112 = vector.load %arg22[%c0_66, %c0_67] : memref<8x32xf32, #tpu.memory_space<vmem>>, vector<8x32xf32>
      tpu.vector_store %arg22[%c0_66, %c0_67], %111 {strides = array<i32>} : memref<8x32xf32, #tpu.memory_space<vmem>>, vector<8x32xf32>,
      %c0_68 = arith.constant 0 : index
      %c0_69 = arith.constant 0 : index
      %113 = vector.load %arg3[%c0_68, %c0_69] : memref<1x32xf32, #tpu.memory_space<vmem>>, vector<1x32xf32>
      %114 = vector.shape_cast %113 : vector<1x32xf32> to vector<1x32xf32>
      %115 = vector.broadcast %114 : vector<1x32xf32> to vector<8x32xf32>
      %c0_70 = arith.constant 0 : index
      %c0_71 = arith.constant 0 : index
      %116 = vector.load %arg23[%c0_70, %c0_71] : memref<8x32xf32, #tpu.memory_space<vmem>>, vector<8x32xf32>
      tpu.vector_store %arg23[%c0_70, %c0_71], %115 {strides = array<i32>} : memref<8x32xf32, #tpu.memory_space<vmem>>, vector<8x32xf32>,
    } else {
    }
    %c0 = arith.constant 0 : index
    %c0_1 = arith.constant 0 : index
    %3 = vector.load %arg21[%c0, %c0_1] : memref<8x32xf32, #tpu.memory_space<vmem>>, vector<8x32xf32>
    %c0_2 = arith.constant 0 : index
    %c0_3 = arith.constant 0 : index
    %4 = vector.load %arg22[%c0_2, %c0_3] : memref<8x32xf32, #tpu.memory_space<vmem>>, vector<8x32xf32>
    %c0_4 = arith.constant 0 : index
    %c0_5 = arith.constant 0 : index
    %5 = vector.load %arg23[%c0_4, %c0_5] : memref<8x32xf32, #tpu.memory_space<vmem>>, vector<8x32xf32>
    %c0_6 = arith.constant 0 : index
    %c0_7 = arith.constant 0 : index
    %c0_8 = arith.constant 0 : index
    %6 = vector.load %arg2[%c0_6, %c0_7, %c0_8] : memref<8x128x32xbf16, #tpu.memory_space<vmem>>, vector<8x128x32xbf16>
    %7 = tpu.iota {dimensions = array<i32: 2>} : vector<1x1x128xi32>
    %c8_i32 = arith.constant 8 : i32
    %8 = vector.broadcast %c8_i32 : i32 to vector<1x1x128xi32>
    %9 = arith.cmpi slt, %7, %8 : vector<1x1x128xi32>
    %10 = tpu.iota {dimensions = array<i32: 1>} : vector<8x128xi32>
    %c64_i32 = arith.constant 64 : i32
    %11 = vector.broadcast %c64_i32 : i32 to vector<8x128xi32>
    %12 = arith.cmpi slt, %10, %11 : vector<8x128xi32>
    %13 = arith.truncf %3 : vector<8x32xf32> to vector<8x32xbf16>
    %14 = arith.truncf %5 : vector<8x32xf32> to vector<8x32xbf16>
    %c0_9 = arith.constant 0 : index
    %c0_10 = arith.constant 0 : index
    %15 = vector.load %arg5[%c0_9, %c0_10] : memref<32x32xbf16, #tpu.memory_space<vmem>>, vector<32x32xbf16>
    %cst = arith.constant dense<0.000000e+00> : vector<8x32xf32>
    %16 = tpu.matmul %13, %15, %cst {dimension_numbers = #tpu.dot_dimension_numbers<[1], [0], [0], [1], [0, 0, 1, 1], [], []>} : vector<8x32xbf16>, vector<32x32xbf16>, vector<8x32xf32> -> vector<8x32xf32>
    %c0_11 = arith.constant 0 : index
    %c0_12 = arith.constant 0 : index
    %17 = vector.load %arg6[%c0_11, %c0_12] : memref<1x32xf32, #tpu.memory_space<vmem>>, vector<1x32xf32>
    %18 = vector.broadcast %17 : vector<1x32xf32> to vector<8x32xf32>
    %19 = arith.addf %16, %18 : vector<8x32xf32>
    %20 = vector.shape_cast %19 : vector<8x32xf32> to vector<8x1x32xf32>
    %21 = arith.truncf %20 : vector<8x1x32xf32> to vector<8x1x32xbf16>
    "tpu.trace_start"() <{level = 10 : i32, message = "bqh,bth->bqt"}> : () -> ()
    %cst_13 = arith.constant dense<0.000000e+00> : vector<8x1x128xf32>
    %22 = tpu.matmul %21, %6, %cst_13 {dimension_numbers = #tpu.dot_dimension_numbers<[2], [2], [1], [1], [0, 0, 0, 1, 1, 1], [0], [0]>} : vector<8x1x32xbf16>, vector<8x128x32xbf16>, vector<8x1x128xf32> -> vector<8x1x128xf32>
    %cst_14 = arith.constant -1.000000e+30 : f32
    "tpu.trace_stop"() : () -> ()
    %23 = vector.shape_cast %9 : vector<1x1x128xi1> to vector<1x1x128xi1>
    %24 = vector.broadcast %23 : vector<1x1x128xi1> to vector<8x1x128xi1>
    %25 = vector.broadcast %cst_14 : f32 to vector<8x1x128xf32>
    %26 = arith.select %24, %22, %25 : vector<8x1x128xi1>, vector<8x1x128xf32>
    %cst_15 = arith.constant dense<0xFF800000> : vector<8x1xf32>
    %27 = vector.multi_reduction <maximumf>, %26, %cst_15 [2] : vector<8x1x128xf32> to vector<8x1xf32>
    %28 = vector.shape_cast %27 : vector<8x1xf32> to vector<8x1x1xf32>
    %29 = vector.broadcast %28 : vector<8x1x1xf32> to vector<8x1x128xf32>
    %30 = arith.subf %26, %29 : vector<8x1x128xf32>
    %31 = math.exp %30 : vector<8x1x128xf32>
    %cst_16 = arith.constant dense<0.000000e+00> : vector<8x1xf32>
    %32 = vector.multi_reduction <add>, %31, %cst_16 [2] : vector<8x1x128xf32> to vector<8x1xf32>
    %33 = vector.shape_cast %32 : vector<8x1xf32> to vector<8x1x1xf32>
    %34 = tpu.reciprocal %33 {approx = true} : vector<8x1x1xf32> -> vector<8x1x1xf32>
    %35 = vector.broadcast %34 : vector<8x1x1xf32> to vector<8x1x128xf32>
    %36 = arith.mulf %31, %35 : vector<8x1x128xf32>
    %37 = arith.truncf %36 : vector<8x1x128xf32> to vector<8x1x128xbf16>
    "tpu.trace_start"() <{level = 10 : i32, message = "bqt,bth->bqh"}> : () -> ()
    %cst_17 = arith.constant dense<0.000000e+00> : vector<8x1x32xf32>
    %38 = tpu.matmul %37, %6, %cst_17 {dimension_numbers = #tpu.dot_dimension_numbers<[2], [1], [1], [2], [0, 0, 0, 1, 1, 2], [0], [0]>} : vector<8x1x128xbf16>, vector<8x128x32xbf16>, vector<8x1x32xf32> -> vector<8x1x32xf32>
    "tpu.trace_stop"() : () -> ()
    %39 = vector.shape_cast %38 : vector<8x1x32xf32> to vector<8x32xf32>
    %40 = arith.truncf %39 : vector<8x32xf32> to vector<8x32xbf16>
    %c0_18 = arith.constant 0 : index
    %c0_19 = arith.constant 0 : index
    %41 = vector.load %arg7[%c0_18, %c0_19] : memref<32x128xbf16, #tpu.memory_space<vmem>>, vector<32x128xbf16>
    %cst_20 = arith.constant dense<0.000000e+00> : vector<8x128xf32>
    %42 = tpu.matmul %13, %41, %cst_20 {dimension_numbers = #tpu.dot_dimension_numbers<[1], [0], [0], [1], [0, 0, 1, 1], [], []>} : vector<8x32xbf16>, vector<32x128xbf16>, vector<8x128xf32> -> vector<8x128xf32>
    %c0_21 = arith.constant 0 : index
    %c0_22 = arith.constant 0 : index
    %43 = vector.load %arg8[%c0_21, %c0_22] : memref<32x128xbf16, #tpu.memory_space<vmem>>, vector<32x128xbf16>
    %cst_23 = arith.constant dense<0.000000e+00> : vector<8x128xf32>
    %44 = tpu.matmul %40, %43, %cst_23 {dimension_numbers = #tpu.dot_dimension_numbers<[1], [0], [0], [1], [0, 0, 1, 1], [], []>} : vector<8x32xbf16>, vector<32x128xbf16>, vector<8x128xf32> -> vector<8x128xf32>
    %45 = arith.addf %42, %44 : vector<8x128xf32>
    %c0_24 = arith.constant 0 : index
    %c0_25 = arith.constant 0 : index
    %46 = vector.load %arg9[%c0_24, %c0_25] : memref<32x128xbf16, #tpu.memory_space<vmem>>, vector<32x128xbf16>
    %cst_26 = arith.constant dense<0.000000e+00> : vector<8x128xf32>
    %47 = tpu.matmul %14, %46, %cst_26 {dimension_numbers = #tpu.dot_dimension_numbers<[1], [0], [0], [1], [0, 0, 1, 1], [], []>} : vector<8x32xbf16>, vector<32x128xbf16>, vector<8x128xf32> -> vector<8x128xf32>
    %48 = arith.addf %45, %47 : vector<8x128xf32>
    %c0_27 = arith.constant 0 : index
    %c0_28 = arith.constant 0 : index
    %49 = vector.load %arg10[%c0_27, %c0_28] : memref<1x128xf32, #tpu.memory_space<vmem>>, vector<1x128xf32>
    %50 = vector.broadcast %49 : vector<1x128xf32> to vector<8x128xf32>
    %51 = arith.addf %48, %50 : vector<8x128xf32>
    %52 = vector.extract_strided_slice %51 {offsets = [0, 0], sizes = [8, 32], strides = [1, 1]} : vector<8x128xf32> to vector<8x32xf32>
    %53 = arith.negf %52 : vector<8x32xf32>
    %54 = math.exp %53 : vector<8x32xf32>
    %cst_29 = arith.constant 1.000000e+00 : f32
    %55 = vector.broadcast %cst_29 : f32 to vector<8x32xf32>
    %56 = arith.addf %55, %54 : vector<8x32xf32>
    %57 = arith.divf %55, %56 : vector<8x32xf32>
    %58 = vector.extract_strided_slice %51 {offsets = [0, 32], sizes = [8, 32], strides = [1, 1]} : vector<8x128xf32> to vector<8x32xf32>
    %59 = arith.negf %58 : vector<8x32xf32>
    %60 = math.exp %59 : vector<8x32xf32>
    %cst_30 = arith.constant 1.000000e+00 : f32
    %61 = vector.broadcast %cst_30 : f32 to vector<8x32xf32>
    %62 = arith.addf %61, %60 : vector<8x32xf32>
    %63 = arith.divf %61, %62 : vector<8x32xf32>
    %64 = vector.extract_strided_slice %51 {offsets = [0, 64], sizes = [8, 32], strides = [1, 1]} : vector<8x128xf32> to vector<8x32xf32>
    %65 = math.tanh %64 : vector<8x32xf32>
    %66 = vector.extract_strided_slice %51 {offsets = [0, 96], sizes = [8, 32], strides = [1, 1]} : vector<8x128xf32> to vector<8x32xf32>
    %67 = arith.negf %66 : vector<8x32xf32>
    %68 = math.exp %67 : vector<8x32xf32>
    %cst_31 = arith.constant 1.000000e+00 : f32
    %69 = vector.broadcast %cst_31 : f32 to vector<8x32xf32>
    %70 = arith.addf %69, %68 : vector<8x32xf32>
    %71 = arith.divf %69, %70 : vector<8x32xf32>
    %72 = arith.mulf %63, %4 : vector<8x32xf32>
    %73 = arith.mulf %57, %65 : vector<8x32xf32>
    %74 = arith.addf %72, %73 : vector<8x32xf32>
    %75 = math.tanh %74 : vector<8x32xf32>
    %76 = arith.mulf %71, %75 : vector<8x32xf32>
    %77 = arith.truncf %76 : vector<8x32xf32> to vector<8x32xbf16>
    %c0_32 = arith.constant 0 : index
    %c0_33 = arith.constant 0 : index
    %78 = vector.load %arg11[%c0_32, %c0_33] : memref<32x32xbf16, #tpu.memory_space<vmem>>, vector<32x32xbf16>
    %cst_34 = arith.constant dense<0.000000e+00> : vector<8x32xf32>
    %79 = tpu.matmul %77, %78, %cst_34 {dimension_numbers = #tpu.dot_dimension_numbers<[1], [0], [0], [1], [0, 0, 1, 1], [], []>} : vector<8x32xbf16>, vector<32x32xbf16>, vector<8x32xf32> -> vector<8x32xf32>
    %c0_35 = arith.constant 0 : index
    %c0_36 = arith.constant 0 : index
    %80 = vector.load %arg12[%c0_35, %c0_36] : memref<32x32xbf16, #tpu.memory_space<vmem>>, vector<32x32xbf16>
    %cst_37 = arith.constant dense<0.000000e+00> : vector<8x32xf32>
    %81 = tpu.matmul %40, %80, %cst_37 {dimension_numbers = #tpu.dot_dimension_numbers<[1], [0], [0], [1], [0, 0, 1, 1], [], []>} : vector<8x32xbf16>, vector<32x32xbf16>, vector<8x32xf32> -> vector<8x32xf32>
    %82 = arith.addf %79, %81 : vector<8x32xf32>
    %c0_38 = arith.constant 0 : index
    %c0_39 = arith.constant 0 : index
    %83 = vector.load %arg13[%c0_38, %c0_39] : memref<32x32xbf16, #tpu.memory_space<vmem>>, vector<32x32xbf16>
    %cst_40 = arith.constant dense<0.000000e+00> : vector<8x32xf32>
    %84 = tpu.matmul %14, %83, %cst_40 {dimension_numbers = #tpu.dot_dimension_numbers<[1], [0], [0], [1], [0, 0, 1, 1], [], []>} : vector<8x32xbf16>, vector<32x32xbf16>, vector<8x32xf32> -> vector<8x32xf32>
    %85 = arith.addf %82, %84 : vector<8x32xf32>
    %c0_41 = arith.constant 0 : index
    %c0_42 = arith.constant 0 : index
    %86 = vector.load %arg14[%c0_41, %c0_42] : memref<1x32xf32, #tpu.memory_space<vmem>>, vector<1x32xf32>
    %87 = vector.broadcast %86 : vector<1x32xf32> to vector<8x32xf32>
    %88 = arith.addf %85, %87 : vector<8x32xf32>
    %89 = arith.truncf %88 : vector<8x32xf32> to vector<8x32xbf16>
    %c0_43 = arith.constant 0 : index
    %c0_44 = arith.constant 0 : index
    %90 = vector.load %arg4[%c0_43, %c0_44] : memref<128x32xbf16, #tpu.memory_space<vmem>>, vector<128x32xbf16>
    %cst_45 = arith.constant dense<0.000000e+00> : vector<8x128xf32>
    %91 = tpu.matmul %89, %90, %cst_45 {dimension_numbers = #tpu.dot_dimension_numbers<[1], [1], [0], [0], [0, 0, 1, 0], [], []>} : vector<8x32xbf16>, vector<128x32xbf16>, vector<8x128xf32> -> vector<8x128xf32>
    %92 = arith.truncf %91 : vector<8x128xf32> to vector<8x128xbf16>
    %c0_46 = arith.constant 0 : index
    %c0_47 = arith.constant 0 : index
    %c0_48 = arith.constant 0 : index
    %93 = vector.load %arg17[%c0_46, %c0_47, %c0_48] : memref<1x8x128xbf16, #tpu.memory_space<vmem>>, vector<1x8x128xbf16>
    %94 = vector.shape_cast %93 : vector<1x8x128xbf16> to vector<8x128xbf16>
    %95 = vector.shape_cast %92 : vector<8x128xbf16> to vector<1x8x128xbf16>
    tpu.vector_store %arg17[%c0_46, %c0_47, %c0_48], %95 {strides = array<i32>} : memref<1x8x128xbf16, #tpu.memory_space<vmem>>, vector<1x8x128xbf16>,
    %96 = vector.shape_cast %36 : vector<8x1x128xf32> to vector<8x128xf32>
    %97 = arith.truncf %96 : vector<8x128xf32> to vector<8x128xbf16>
    %c0_49 = arith.constant 0 : index
    %c0_50 = arith.constant 0 : index
    %c0_51 = arith.constant 0 : index
    %98 = vector.load %arg18[%c0_49, %c0_50, %c0_51] : memref<1x8x128xbf16, #tpu.memory_space<vmem>>, vector<1x8x128xbf16>
    %99 = vector.shape_cast %98 : vector<1x8x128xbf16> to vector<8x128xbf16>
    %100 = vector.shape_cast %97 : vector<8x128xbf16> to vector<1x8x128xbf16>
    tpu.vector_store %arg18[%c0_49, %c0_50, %c0_51], %100 {strides = array<i32>} : memref<1x8x128xbf16, #tpu.memory_space<vmem>>, vector<1x8x128xbf16>,
    %c0_52 = arith.constant 0 : index
    %c0_53 = arith.constant 0 : index
    %101 = vector.load %arg21[%c0_52, %c0_53] : memref<8x32xf32, #tpu.memory_space<vmem>>, vector<8x32xf32>
    tpu.vector_store %arg21[%c0_52, %c0_53], %76 {strides = array<i32>} : memref<8x32xf32, #tpu.memory_space<vmem>>, vector<8x32xf32>,
    %c0_54 = arith.constant 0 : index
    %c0_55 = arith.constant 0 : index
    %102 = vector.load %arg22[%c0_54, %c0_55] : memref<8x32xf32, #tpu.memory_space<vmem>>, vector<8x32xf32>
    tpu.vector_store %arg22[%c0_54, %c0_55], %74 {strides = array<i32>} : memref<8x32xf32, #tpu.memory_space<vmem>>, vector<8x32xf32>,
    %c5_i32 = arith.constant 5 : i32
    %103 = arith.cmpi slt, %arg1, %c5_i32 : i32
    %104 = arith.extui %103 : i1 to i32
    %cst_56 = arith.constant -1.000000e+30 : f32
    %c0_i32_57 = arith.constant 0 : i32
    %105 = arith.cmpi ne, %104, %c0_i32_57 : i32
    scf.if %105 {
      %109 = vector.broadcast %cst_56 : f32 to vector<8x128xf32>
      %110 = arith.select %12, %91, %109 : vector<8x128xi1>, vector<8x128xf32>
      %cst_60 = arith.constant dense<0xFF800000> : vector<8xf32>
      %111 = vector.multi_reduction <maximumf>, %110, %cst_60 [1] : vector<8x128xf32> to vector<8xf32>
      %112 = vector.shape_cast %111 : vector<8xf32> to vector<8x1xf32>
      %113 = vector.broadcast %112 : vector<8x1xf32> to vector<8x128xf32>
      %114 = arith.cmpf oeq, %110, %113 : vector<8x128xf32>
      %c128_i32 = arith.constant 128 : i32
      %115 = vector.broadcast %c128_i32 : i32 to vector<8x128xi32>
      %116 = arith.select %114, %10, %115 : vector<8x128xi1>, vector<8x128xi32>
      %cst_61 = arith.constant dense<2147483647> : vector<8xi32>
      %117 = vector.multi_reduction <minsi>, %116, %cst_61 [1] : vector<8x128xi32> to vector<8xi32>
      %118 = vector.shape_cast %117 : vector<8xi32> to vector<8x1xi32>
      %119 = vector.broadcast %118 : vector<8x1xi32> to vector<8x128xi32>
      %120 = arith.cmpi eq, %10, %119 : vector<8x128xi32>
      %121 = arith.extui %120 : vector<8x128xi1> to vector<8x128xi32>
      %122 = arith.sitofp %121 : vector<8x128xi32> to vector<8x128xf32>
      %123 = arith.truncf %122 : vector<8x128xf32> to vector<8x128xbf16>
      %c0_62 = arith.constant 0 : index
      %c0_63 = arith.constant 0 : index
      %124 = vector.load %arg4[%c0_62, %c0_63] : memref<128x32xbf16, #tpu.memory_space<vmem>>, vector<128x32xbf16>
      %cst_64 = arith.constant dense<0.000000e+00> : vector<8x32xf32>
      %125 = tpu.matmul %123, %124, %cst_64 {dimension_numbers = #tpu.dot_dimension_numbers<[1], [0], [0], [1], [0, 0, 1, 1], [], []>} : vector<8x128xbf16>, vector<128x32xbf16>, vector<8x32xf32> -> vector<8x32xf32>
      %c0_65 = arith.constant 0 : index
      %c0_66 = arith.constant 0 : index
      %126 = vector.load %arg23[%c0_65, %c0_66] : memref<8x32xf32, #tpu.memory_space<vmem>>, vector<8x32xf32>
      tpu.vector_store %arg23[%c0_65, %c0_66], %125 {strides = array<i32>} : memref<8x32xf32, #tpu.memory_space<vmem>>, vector<8x32xf32>,
    } else {
    }
    %c5_i32_58 = arith.constant 5 : i32
    %106 = arith.cmpi eq, %arg1, %c5_i32_58 : i32
    %107 = arith.extui %106 : i1 to i32
    %c0_i32_59 = arith.constant 0 : i32
    %108 = arith.cmpi ne, %107, %c0_i32_59 : i32
    scf.if %108 {
      %c0_60 = arith.constant 0 : index
      %c0_61 = arith.constant 0 : index
      %109 = vector.load %arg19[%c0_60, %c0_61] : memref<8x32xf32, #tpu.memory_space<vmem>>, vector<8x32xf32>
      tpu.vector_store %arg19[%c0_60, %c0_61], %76 {strides = array<i32>} : memref<8x32xf32, #tpu.memory_space<vmem>>, vector<8x32xf32>,
      %c0_62 = arith.constant 0 : index
      %c0_63 = arith.constant 0 : index
      %110 = vector.load %arg20[%c0_62, %c0_63] : memref<8x32xf32, #tpu.memory_space<vmem>>, vector<8x32xf32>
      tpu.vector_store %arg20[%c0_62, %c0_63], %74 {strides = array<i32>} : memref<8x32xf32, #tpu.memory_space<vmem>>, vector<8x32xf32>,
    } else {
    }
    return
  }
  func.func @transform_0(%arg0: i32, %arg1: i32) -> (i32, i32, i32) {
    %c0_i32 = arith.constant 0 : i32
    %c0_i32_0 = arith.constant 0 : i32
    %c0_i32_1 = arith.constant 0 : i32
    return %arg0, %c0_i32, %c0_i32_0 : i32, i32, i32
  }
  func.func @transform_1(%arg0: i32, %arg1: i32) -> (i32, i32) {
    %c0_i32 = arith.constant 0 : i32
    %c0_i32_0 = arith.constant 0 : i32
    %c0_i32_1 = arith.constant 0 : i32
    return %c0_i32, %c0_i32_0 : i32, i32
  }
  func.func @transform_2(%arg0: i32, %arg1: i32) -> (i32, i32) {
    %c0_i32 = arith.constant 0 : i32
    %c0_i32_0 = arith.constant 0 : i32
    %c0_i32_1 = arith.constant 0 : i32
    return %c0_i32, %c0_i32_0 : i32, i32
  }
  func.func @transform_3(%arg0: i32, %arg1: i32) -> (i32, i32) {
    %c0_i32 = arith.constant 0 : i32
    %c0_i32_0 = arith.constant 0 : i32
    %c0_i32_1 = arith.constant 0 : i32
    return %c0_i32, %c0_i32_0 : i32, i32
  }
  func.func @transform_4(%arg0: i32, %arg1: i32) -> (i32, i32) {
    %c0_i32 = arith.constant 0 : i32
    %c0_i32_0 = arith.constant 0 : i32
    %c0_i32_1 = arith.constant 0 : i32
    return %c0_i32, %c0_i32_0 : i32, i32
  }
  func.func @transform_5(%arg0: i32, %arg1: i32) -> (i32, i32) {
    %c0_i32 = arith.constant 0 : i32
    %c0_i32_0 = arith.constant 0 : i32
    %c0_i32_1 = arith.constant 0 : i32
    return %c0_i32, %c0_i32_0 : i32, i32
  }
  func.func @transform_6(%arg0: i32, %arg1: i32) -> (i32, i32) {
    %c0_i32 = arith.constant 0 : i32
    %c0_i32_0 = arith.constant 0 : i32
    %c0_i32_1 = arith.constant 0 : i32
    return %c0_i32, %c0_i32_0 : i32, i32
  }
  func.func @transform_7(%arg0: i32, %arg1: i32) -> (i32, i32) {
    %c0_i32 = arith.constant 0 : i32
    %c0_i32_0 = arith.constant 0 : i32
    %c0_i32_1 = arith.constant 0 : i32
    return %c0_i32, %c0_i32_0 : i32, i32
  }
  func.func @transform_8(%arg0: i32, %arg1: i32) -> (i32, i32) {
    %c0_i32 = arith.constant 0 : i32
    %c0_i32_0 = arith.constant 0 : i32
    %c0_i32_1 = arith.constant 0 : i32
    return %c0_i32, %c0_i32_0 : i32, i32
  }
  func.func @transform_9(%arg0: i32, %arg1: i32) -> (i32, i32) {
    %c0_i32 = arith.constant 0 : i32
    %c0_i32_0 = arith.constant 0 : i32
    %c0_i32_1 = arith.constant 0 : i32
    return %c0_i32, %c0_i32_0 : i32, i32
  }
  func.func @transform_10(%arg0: i32, %arg1: i32) -> (i32, i32) {
    %c0_i32 = arith.constant 0 : i32
    %c0_i32_0 = arith.constant 0 : i32
    %c0_i32_1 = arith.constant 0 : i32
    return %c0_i32, %c0_i32_0 : i32, i32
  }
  func.func @transform_11(%arg0: i32, %arg1: i32) -> (i32, i32) {
    %c0_i32 = arith.constant 0 : i32
    %c0_i32_0 = arith.constant 0 : i32
    %c0_i32_1 = arith.constant 0 : i32
    return %c0_i32, %c0_i32_0 : i32, i32
  }
  func.func @transform_12(%arg0: i32, %arg1: i32) -> (i32, i32) {
    %c0_i32 = arith.constant 0 : i32
    %c0_i32_0 = arith.constant 0 : i32
    %c0_i32_1 = arith.constant 0 : i32
    return %c0_i32, %c0_i32_0 : i32, i32
  }
  func.func @transform_13(%arg0: i32, %arg1: i32) -> (i32, i32) {
    %c0_i32 = arith.constant 0 : i32
    %c0_i32_0 = arith.constant 0 : i32
    return %arg0, %c0_i32 : i32, i32
  }
  func.func @transform_14(%arg0: i32, %arg1: i32) -> (i32, i32) {
    %c0_i32 = arith.constant 0 : i32
    %c0_i32_0 = arith.constant 0 : i32
    return %arg0, %c0_i32 : i32, i32
  }
  func.func @transform_15(%arg0: i32, %arg1: i32) -> (i32, i32, i32) {
    %c0_i32 = arith.constant 0 : i32
    %c0_i32_0 = arith.constant 0 : i32
    return %arg1, %arg0, %c0_i32 : i32, i32, i32
  }
  func.func @transform_16(%arg0: i32, %arg1: i32) -> (i32, i32, i32) {
    %c0_i32 = arith.constant 0 : i32
    %c0_i32_0 = arith.constant 0 : i32
    return %arg1, %arg0, %c0_i32 : i32, i32, i32
  }
  func.func @transform_17(%arg0: i32, %arg1: i32) -> (i32, i32) {
    %c0_i32 = arith.constant 0 : i32
    %c0_i32_0 = arith.constant 0 : i32
    return %arg0, %c0_i32 : i32, i32
  }
  func.func @transform_18(%arg0: i32, %arg1: i32) -> (i32, i32) {
    %c0_i32 = arith.constant 0 : i32
    %c0_i32_0 = arith.constant 0 : i32
    return %arg0, %c0_i32 : i32, i32
  }
}

module attributes {stable_mosaic.version = 11 : i64} {
  func.func @_decoder_step_kernel(%arg0: i32, %arg1: i32, %arg2: memref<8x128x32xbf16, #tpu.memory_space<vmem>>, %arg3: memref<1x32xf32, #tpu.memory_space<vmem>>, %arg4: memref<128x32xbf16, #tpu.memory_space<vmem>>, %arg5: memref<32x32xbf16, #tpu.memory_space<vmem>>, %arg6: memref<1x32xf32, #tpu.memory_space<vmem>>, %arg7: memref<32x128xbf16, #tpu.memory_space<vmem>>, %arg8: memref<32x128xbf16, #tpu.memory_space<vmem>>, %arg9: memref<32x128xbf16, #tpu.memory_space<vmem>>, %arg10: memref<1x128xf32, #tpu.memory_space<vmem>>, %arg11: memref<32x32xbf16, #tpu.memory_space<vmem>>, %arg12: memref<32x32xbf16, #tpu.memory_space<vmem>>, %arg13: memref<32x32xbf16, #tpu.memory_space<vmem>>, %arg14: memref<1x32xf32, #tpu.memory_space<vmem>>, %arg15: memref<8x32xf32, #tpu.memory_space<vmem>>, %arg16: memref<8x32xf32, #tpu.memory_space<vmem>>, %arg17: memref<1x8x128xbf16, #tpu.memory_space<vmem>>, %arg18: memref<1x8x128xbf16, #tpu.memory_space<vmem>>, %arg19: memref<8x32xf32, #tpu.memory_space<vmem>>, %arg20: memref<8x32xf32, #tpu.memory_space<vmem>>, %arg21: memref<8x32xf32, #tpu.memory_space<vmem>>, %arg22: memref<8x32xf32, #tpu.memory_space<vmem>>, %arg23: memref<8x32xf32, #tpu.memory_space<vmem>>) attributes {dimension_semantics = [#tpu.dimension_semantics<parallel>, #tpu.dimension_semantics<arbitrary>], iteration_bounds = array<i64: 1, 6>, scalar_prefetch = 0 : i64, scratch_operands = 3 : i64, tpu.core_type = #tpu.core_type<tc>, window_params = [{transform_indices = @transform_0, window_bounds = array<i64: 8, 128, 32>}, {pipeline_mode = #tpu.pipeline_mode<synchronous>, transform_indices = @transform_1, window_bounds = array<i64: 1, 32>}, {pipeline_mode = #tpu.pipeline_mode<synchronous>, transform_indices = @transform_2, window_bounds = array<i64: 128, 32>}, {pipeline_mode = #tpu.pipeline_mode<synchronous>, transform_indices = @transform_3, window_bounds = array<i64: 32, 32>}, {pipeline_mode = #tpu.pipeline_mode<synchronous>, transform_indices = @transform_4, window_bounds = array<i64: 1, 32>}, {pipeline_mode = #tpu.pipeline_mode<synchronous>, transform_indices = @transform_5, window_bounds = array<i64: 32, 128>}, {pipeline_mode = #tpu.pipeline_mode<synchronous>, transform_indices = @transform_6, window_bounds = array<i64: 32, 128>}, {pipeline_mode = #tpu.pipeline_mode<synchronous>, transform_indices = @transform_7, window_bounds = array<i64: 32, 128>}, {pipeline_mode = #tpu.pipeline_mode<synchronous>, transform_indices = @transform_8, window_bounds = array<i64: 1, 128>}, {pipeline_mode = #tpu.pipeline_mode<synchronous>, transform_indices = @transform_9, window_bounds = array<i64: 32, 32>}, {pipeline_mode = #tpu.pipeline_mode<synchronous>, transform_indices = @transform_10, window_bounds = array<i64: 32, 32>}, {pipeline_mode = #tpu.pipeline_mode<synchronous>, transform_indices = @transform_11, window_bounds = array<i64: 32, 32>}, {pipeline_mode = #tpu.pipeline_mode<synchronous>, transform_indices = @transform_12, window_bounds = array<i64: 1, 32>}, {transform_indices = @transform_13, window_bounds = array<i64: 8, 32>}, {transform_indices = @transform_14, window_bounds = array<i64: 8, 32>}, {transform_indices = @transform_15, window_bounds = array<i64: 1, 8, 128>}, {transform_indices = @transform_16, window_bounds = array<i64: 1, 8, 128>}, {transform_indices = @transform_17, window_bounds = array<i64: 8, 32>}, {transform_indices = @transform_18, window_bounds = array<i64: 8, 32>}]} {
    %c0_i32 = arith.constant 0 : i32
    %0 = arith.cmpi eq, %arg1, %c0_i32 : i32
    %1 = arith.extui %0 : i1 to i32
    %c0_i32_0 = arith.constant 0 : i32
    %2 = arith.cmpi ne, %1, %c0_i32_0 : i32
    scf.if %2 {
      %c0_60 = arith.constant 0 : index
      %c0_61 = arith.constant 0 : index
      %109 = vector.load %arg15[%c0_60, %c0_61] : memref<8x32xf32, #tpu.memory_space<vmem>>, vector<8x32xf32>
      %c0_62 = arith.constant 0 : index
      %c0_63 = arith.constant 0 : index
      %110 = vector.load %arg21[%c0_62, %c0_63] : memref<8x32xf32, #tpu.memory_space<vmem>>, vector<8x32xf32>
      tpu.vector_store %arg21[%c0_62, %c0_63], %109 {strides = array<i32>} : memref<8x32xf32, #tpu.memory_space<vmem>>, vector<8x32xf32>,
      %c0_64 = arith.constant 0 : index
      %c0_65 = arith.constant 0 : index
      %111 = vector.load %arg16[%c0_64, %c0_65] : memref<8x32xf32, #tpu.memory_space<vmem>>, vector<8x32xf32>
      %c0_66 = arith.constant 0 : index
      %c0_67 = arith.constant 0 : index
      %112 = vector.load %arg22[%c0_66, %c0_67] : memref<8x32xf32, #tpu.memory_space<vmem>>, vector<8x32xf32>
      tpu.vector_store %arg22[%c0_66, %c0_67], %111 {strides = array<i32>} : memref<8x32xf32, #tpu.memory_space<vmem>>, vector<8x32xf32>,
      %c0_68 = arith.constant 0 : index
      %c0_69 = arith.constant 0 : index
      %113 = vector.load %arg3[%c0_68, %c0_69] : memref<1x32xf32, #tpu.memory_space<vmem>>, vector<1x32xf32>
      %114 = vector.shape_cast %113 : vector<1x32xf32> to vector<1x32xf32>
      %115 = vector.broadcast %114 : vector<1x32xf32> to vector<8x32xf32>
      %c0_70 = arith.constant 0 : index
      %c0_71 = arith.constant 0 : index
      %116 = vector.load %arg23[%c0_70, %c0_71] : memref<8x32xf32, #tpu.memory_space<vmem>>, vector<8x32xf32>
      tpu.vector_store %arg23[%c0_70, %c0_71], %115 {strides = array<i32>} : memref<8x32xf32, #tpu.memory_space<vmem>>, vector<8x32xf32>,
    } else {
    }
    %c0 = arith.constant 0 : index
    %c0_1 = arith.constant 0 : index
    %3 = vector.load %arg21[%c0, %c0_1] : memref<8x32xf32, #tpu.memory_space<vmem>>, vector<8x32xf32>
    %c0_2 = arith.constant 0 : index
    %c0_3 = arith.constant 0 : index
    %4 = vector.load %arg22[%c0_2, %c0_3] : memref<8x32xf32, #tpu.memory_space<vmem>>, vector<8x32xf32>
    %c0_4 = arith.constant 0 : index
    %c0_5 = arith.constant 0 : index
    %5 = vector.load %arg23[%c0_4, %c0_5] : memref<8x32xf32, #tpu.memory_space<vmem>>, vector<8x32xf32>
    %c0_6 = arith.constant 0 : index
    %c0_7 = arith.constant 0 : index
    %c0_8 = arith.constant 0 : index
    %6 = vector.load %arg2[%c0_6, %c0_7, %c0_8] : memref<8x128x32xbf16, #tpu.memory_space<vmem>>, vector<8x128x32xbf16>
    %7 = tpu.iota {dimensions = array<i32: 2>} : vector<1x1x128xi32>
    %c8_i32 = arith.constant 8 : i32
    %8 = vector.broadcast %c8_i32 : i32 to vector<1x1x128xi32>
    %9 = arith.cmpi slt, %7, %8 : vector<1x1x128xi32>
    %10 = tpu.iota {dimensions = array<i32: 1>} : vector<8x128xi32>
    %c64_i32 = arith.constant 64 : i32
    %11 = vector.broadcast %c64_i32 : i32 to vector<8x128xi32>
    %12 = arith.cmpi slt, %10, %11 : vector<8x128xi32>
    %13 = arith.truncf %3 : vector<8x32xf32> to vector<8x32xbf16>
    %14 = arith.truncf %5 : vector<8x32xf32> to vector<8x32xbf16>
    %c0_9 = arith.constant 0 : index
    %c0_10 = arith.constant 0 : index
    %15 = vector.load %arg5[%c0_9, %c0_10] : memref<32x32xbf16, #tpu.memory_space<vmem>>, vector<32x32xbf16>
    %cst = arith.constant dense<0.000000e+00> : vector<8x32xf32>
    %16 = tpu.matmul %13, %15, %cst {dimension_numbers = #tpu.dot_dimension_numbers<[1], [0], [0], [1], [0, 0, 1, 1], [], []>} : vector<8x32xbf16>, vector<32x32xbf16>, vector<8x32xf32> -> vector<8x32xf32>
    %c0_11 = arith.constant 0 : index
    %c0_12 = arith.constant 0 : index
    %17 = vector.load %arg6[%c0_11, %c0_12] : memref<1x32xf32, #tpu.memory_space<vmem>>, vector<1x32xf32>
    %18 = vector.broadcast %17 : vector<1x32xf32> to vector<8x32xf32>
    %19 = arith.addf %16, %18 : vector<8x32xf32>
    %20 = vector.shape_cast %19 : vector<8x32xf32> to vector<8x1x32xf32>
    %21 = arith.truncf %20 : vector<8x1x32xf32> to vector<8x1x32xbf16>
    "tpu.trace_start"() <{level = 10 : i32, message = "bqh,bth->bqt"}> : () -> ()
    %cst_13 = arith.constant dense<0.000000e+00> : vector<8x1x128xf32>
    %22 = tpu.matmul %21, %6, %cst_13 {dimension_numbers = #tpu.dot_dimension_numbers<[2], [2], [1], [1], [0, 0, 0, 1, 1, 1], [0], [0]>} : vector<8x1x32xbf16>, vector<8x128x32xbf16>, vector<8x1x128xf32> -> vector<8x1x128xf32>
    %cst_14 = arith.constant -1.000000e+30 : f32
    "tpu.trace_stop"() : () -> ()
    %23 = vector.shape_cast %9 : vector<1x1x128xi1> to vector<1x1x128xi1>
    %24 = vector.broadcast %23 : vector<1x1x128xi1> to vector<8x1x128xi1>
    %25 = vector.broadcast %cst_14 : f32 to vector<8x1x128xf32>
    %26 = arith.select %24, %22, %25 : vector<8x1x128xi1>, vector<8x1x128xf32>
    %cst_15 = arith.constant dense<0xFF800000> : vector<8x1xf32>
    %27 = vector.multi_reduction <maximumf>, %26, %cst_15 [2] : vector<8x1x128xf32> to vector<8x1xf32>
    %28 = vector.shape_cast %27 : vector<8x1xf32> to vector<8x1x1xf32>
    %29 = vector.broadcast %28 : vector<8x1x1xf32> to vector<8x1x128xf32>
    %30 = arith.subf %26, %29 : vector<8x1x128xf32>
    %31 = math.exp %30 : vector<8x1x128xf32>
    %cst_16 = arith.constant dense<0.000000e+00> : vector<8x1xf32>
    %32 = vector.multi_reduction <add>, %31, %cst_16 [2] : vector<8x1x128xf32> to vector<8x1xf32>
    %33 = vector.shape_cast %32 : vector<8x1xf32> to vector<8x1x1xf32>
    %34 = tpu.reciprocal %33 {approx = true} : vector<8x1x1xf32> -> vector<8x1x1xf32>
    %35 = vector.broadcast %34 : vector<8x1x1xf32> to vector<8x1x128xf32>
    %36 = arith.mulf %31, %35 : vector<8x1x128xf32>
    %37 = arith.truncf %36 : vector<8x1x128xf32> to vector<8x1x128xbf16>
    "tpu.trace_start"() <{level = 10 : i32, message = "bqt,bth->bqh"}> : () -> ()
    %cst_17 = arith.constant dense<0.000000e+00> : vector<8x1x32xf32>
    %38 = tpu.matmul %37, %6, %cst_17 {dimension_numbers = #tpu.dot_dimension_numbers<[2], [1], [1], [2], [0, 0, 0, 1, 1, 2], [0], [0]>} : vector<8x1x128xbf16>, vector<8x128x32xbf16>, vector<8x1x32xf32> -> vector<8x1x32xf32>
    "tpu.trace_stop"() : () -> ()
    %39 = vector.shape_cast %38 : vector<8x1x32xf32> to vector<8x32xf32>
    %40 = arith.truncf %39 : vector<8x32xf32> to vector<8x32xbf16>
    %c0_18 = arith.constant 0 : index
    %c0_19 = arith.constant 0 : index
    %41 = vector.load %arg7[%c0_18, %c0_19] : memref<32x128xbf16, #tpu.memory_space<vmem>>, vector<32x128xbf16>
    %cst_20 = arith.constant dense<0.000000e+00> : vector<8x128xf32>
    %42 = tpu.matmul %13, %41, %cst_20 {dimension_numbers = #tpu.dot_dimension_numbers<[1], [0], [0], [1], [0, 0, 1, 1], [], []>} : vector<8x32xbf16>, vector<32x128xbf16>, vector<8x128xf32> -> vector<8x128xf32>
    %c0_21 = arith.constant 0 : index
    %c0_22 = arith.constant 0 : index
    %43 = vector.load %arg8[%c0_21, %c0_22] : memref<32x128xbf16, #tpu.memory_space<vmem>>, vector<32x128xbf16>
    %cst_23 = arith.constant dense<0.000000e+00> : vector<8x128xf32>
    %44 = tpu.matmul %40, %43, %cst_23 {dimension_numbers = #tpu.dot_dimension_numbers<[1], [0], [0], [1], [0, 0, 1, 1], [], []>} : vector<8x32xbf16>, vector<32x128xbf16>, vector<8x128xf32> -> vector<8x128xf32>
    %45 = arith.addf %42, %44 : vector<8x128xf32>
    %c0_24 = arith.constant 0 : index
    %c0_25 = arith.constant 0 : index
    %46 = vector.load %arg9[%c0_24, %c0_25] : memref<32x128xbf16, #tpu.memory_space<vmem>>, vector<32x128xbf16>
    %cst_26 = arith.constant dense<0.000000e+00> : vector<8x128xf32>
    %47 = tpu.matmul %14, %46, %cst_26 {dimension_numbers = #tpu.dot_dimension_numbers<[1], [0], [0], [1], [0, 0, 1, 1], [], []>} : vector<8x32xbf16>, vector<32x128xbf16>, vector<8x128xf32> -> vector<8x128xf32>
    %48 = arith.addf %45, %47 : vector<8x128xf32>
    %c0_27 = arith.constant 0 : index
    %c0_28 = arith.constant 0 : index
    %49 = vector.load %arg10[%c0_27, %c0_28] : memref<1x128xf32, #tpu.memory_space<vmem>>, vector<1x128xf32>
    %50 = vector.broadcast %49 : vector<1x128xf32> to vector<8x128xf32>
    %51 = arith.addf %48, %50 : vector<8x128xf32>
    %52 = vector.extract_strided_slice %51 {offsets = [0, 0], sizes = [8, 32], strides = [1, 1]} : vector<8x128xf32> to vector<8x32xf32>
    %53 = arith.negf %52 : vector<8x32xf32>
    %54 = math.exp %53 : vector<8x32xf32>
    %cst_29 = arith.constant 1.000000e+00 : f32
    %55 = vector.broadcast %cst_29 : f32 to vector<8x32xf32>
    %56 = arith.addf %55, %54 : vector<8x32xf32>
    %57 = arith.divf %55, %56 : vector<8x32xf32>
    %58 = vector.extract_strided_slice %51 {offsets = [0, 32], sizes = [8, 32], strides = [1, 1]} : vector<8x128xf32> to vector<8x32xf32>
    %59 = arith.negf %58 : vector<8x32xf32>
    %60 = math.exp %59 : vector<8x32xf32>
    %cst_30 = arith.constant 1.000000e+00 : f32
    %61 = vector.broadcast %cst_30 : f32 to vector<8x32xf32>
    %62 = arith.addf %61, %60 : vector<8x32xf32>
    %63 = arith.divf %61, %62 : vector<8x32xf32>
    %64 = vector.extract_strided_slice %51 {offsets = [0, 64], sizes = [8, 32], strides = [1, 1]} : vector<8x128xf32> to vector<8x32xf32>
    %65 = math.tanh %64 : vector<8x32xf32>
    %66 = vector.extract_strided_slice %51 {offsets = [0, 96], sizes = [8, 32], strides = [1, 1]} : vector<8x128xf32> to vector<8x32xf32>
    %67 = arith.negf %66 : vector<8x32xf32>
    %68 = math.exp %67 : vector<8x32xf32>
    %cst_31 = arith.constant 1.000000e+00 : f32
    %69 = vector.broadcast %cst_31 : f32 to vector<8x32xf32>
    %70 = arith.addf %69, %68 : vector<8x32xf32>
    %71 = arith.divf %69, %70 : vector<8x32xf32>
    %72 = arith.mulf %63, %4 : vector<8x32xf32>
    %73 = arith.mulf %57, %65 : vector<8x32xf32>
    %74 = arith.addf %72, %73 : vector<8x32xf32>
    %75 = math.tanh %74 : vector<8x32xf32>
    %76 = arith.mulf %71, %75 : vector<8x32xf32>
    %77 = arith.truncf %76 : vector<8x32xf32> to vector<8x32xbf16>
    %c0_32 = arith.constant 0 : index
    %c0_33 = arith.constant 0 : index
    %78 = vector.load %arg11[%c0_32, %c0_33] : memref<32x32xbf16, #tpu.memory_space<vmem>>, vector<32x32xbf16>
    %cst_34 = arith.constant dense<0.000000e+00> : vector<8x32xf32>
    %79 = tpu.matmul %77, %78, %cst_34 {dimension_numbers = #tpu.dot_dimension_numbers<[1], [0], [0], [1], [0, 0, 1, 1], [], []>} : vector<8x32xbf16>, vector<32x32xbf16>, vector<8x32xf32> -> vector<8x32xf32>
    %c0_35 = arith.constant 0 : index
    %c0_36 = arith.constant 0 : index
    %80 = vector.load %arg12[%c0_35, %c0_36] : memref<32x32xbf16, #tpu.memory_space<vmem>>, vector<32x32xbf16>
    %cst_37 = arith.constant dense<0.000000e+00> : vector<8x32xf32>
    %81 = tpu.matmul %40, %80, %cst_37 {dimension_numbers = #tpu.dot_dimension_numbers<[1], [0], [0], [1], [0, 0, 1, 1], [], []>} : vector<8x32xbf16>, vector<32x32xbf16>, vector<8x32xf32> -> vector<8x32xf32>
    %82 = arith.addf %79, %81 : vector<8x32xf32>
    %c0_38 = arith.constant 0 : index
    %c0_39 = arith.constant 0 : index
    %83 = vector.load %arg13[%c0_38, %c0_39] : memref<32x32xbf16, #tpu.memory_space<vmem>>, vector<32x32xbf16>
    %cst_40 = arith.constant dense<0.000000e+00> : vector<8x32xf32>
    %84 = tpu.matmul %14, %83, %cst_40 {dimension_numbers = #tpu.dot_dimension_numbers<[1], [0], [0], [1], [0, 0, 1, 1], [], []>} : vector<8x32xbf16>, vector<32x32xbf16>, vector<8x32xf32> -> vector<8x32xf32>
    %85 = arith.addf %82, %84 : vector<8x32xf32>
    %c0_41 = arith.constant 0 : index
    %c0_42 = arith.constant 0 : index
    %86 = vector.load %arg14[%c0_41, %c0_42] : memref<1x32xf32, #tpu.memory_space<vmem>>, vector<1x32xf32>
    %87 = vector.broadcast %86 : vector<1x32xf32> to vector<8x32xf32>
    %88 = arith.addf %85, %87 : vector<8x32xf32>
    %89 = arith.truncf %88 : vector<8x32xf32> to vector<8x32xbf16>
    %c0_43 = arith.constant 0 : index
    %c0_44 = arith.constant 0 : index
    %90 = vector.load %arg4[%c0_43, %c0_44] : memref<128x32xbf16, #tpu.memory_space<vmem>>, vector<128x32xbf16>
    %cst_45 = arith.constant dense<0.000000e+00> : vector<8x128xf32>
    %91 = tpu.matmul %89, %90, %cst_45 {dimension_numbers = #tpu.dot_dimension_numbers<[1], [1], [0], [0], [0, 0, 1, 0], [], []>} : vector<8x32xbf16>, vector<128x32xbf16>, vector<8x128xf32> -> vector<8x128xf32>
    %92 = arith.truncf %91 : vector<8x128xf32> to vector<8x128xbf16>
    %c0_46 = arith.constant 0 : index
    %c0_47 = arith.constant 0 : index
    %c0_48 = arith.constant 0 : index
    %93 = vector.load %arg17[%c0_46, %c0_47, %c0_48] : memref<1x8x128xbf16, #tpu.memory_space<vmem>>, vector<1x8x128xbf16>
    %94 = vector.shape_cast %93 : vector<1x8x128xbf16> to vector<8x128xbf16>
    %95 = vector.shape_cast %92 : vector<8x128xbf16> to vector<1x8x128xbf16>
    tpu.vector_store %arg17[%c0_46, %c0_47, %c0_48], %95 {strides = array<i32>} : memref<1x8x128xbf16, #tpu.memory_space<vmem>>, vector<1x8x128xbf16>,
    %96 = vector.shape_cast %36 : vector<8x1x128xf32> to vector<8x128xf32>
    %97 = arith.truncf %96 : vector<8x128xf32> to vector<8x128xbf16>
    %c0_49 = arith.constant 0 : index
    %c0_50 = arith.constant 0 : index
    %c0_51 = arith.constant 0 : index
    %98 = vector.load %arg18[%c0_49, %c0_50, %c0_51] : memref<1x8x128xbf16, #tpu.memory_space<vmem>>, vector<1x8x128xbf16>
    %99 = vector.shape_cast %98 : vector<1x8x128xbf16> to vector<8x128xbf16>
    %100 = vector.shape_cast %97 : vector<8x128xbf16> to vector<1x8x128xbf16>
    tpu.vector_store %arg18[%c0_49, %c0_50, %c0_51], %100 {strides = array<i32>} : memref<1x8x128xbf16, #tpu.memory_space<vmem>>, vector<1x8x128xbf16>,
    %c0_52 = arith.constant 0 : index
    %c0_53 = arith.constant 0 : index
    %101 = vector.load %arg21[%c0_52, %c0_53] : memref<8x32xf32, #tpu.memory_space<vmem>>, vector<8x32xf32>
    tpu.vector_store %arg21[%c0_52, %c0_53], %76 {strides = array<i32>} : memref<8x32xf32, #tpu.memory_space<vmem>>, vector<8x32xf32>,
    %c0_54 = arith.constant 0 : index
    %c0_55 = arith.constant 0 : index
    %102 = vector.load %arg22[%c0_54, %c0_55] : memref<8x32xf32, #tpu.memory_space<vmem>>, vector<8x32xf32>
    tpu.vector_store %arg22[%c0_54, %c0_55], %74 {strides = array<i32>} : memref<8x32xf32, #tpu.memory_space<vmem>>, vector<8x32xf32>,
    %c5_i32 = arith.constant 5 : i32
    %103 = arith.cmpi slt, %arg1, %c5_i32 : i32
    %104 = arith.extui %103 : i1 to i32
    %cst_56 = arith.constant -1.000000e+30 : f32
    %c0_i32_57 = arith.constant 0 : i32
    %105 = arith.cmpi ne, %104, %c0_i32_57 : i32
    scf.if %105 {
      %109 = vector.broadcast %cst_56 : f32 to vector<8x128xf32>
      %110 = arith.select %12, %91, %109 : vector<8x128xi1>, vector<8x128xf32>
      %cst_60 = arith.constant dense<0xFF800000> : vector<8xf32>
      %111 = vector.multi_reduction <maximumf>, %110, %cst_60 [1] : vector<8x128xf32> to vector<8xf32>
      %112 = vector.shape_cast %111 : vector<8xf32> to vector<8x1xf32>
      %113 = vector.broadcast %112 : vector<8x1xf32> to vector<8x128xf32>
      %114 = arith.cmpf oeq, %110, %113 : vector<8x128xf32>
      %c128_i32 = arith.constant 128 : i32
      %115 = vector.broadcast %c128_i32 : i32 to vector<8x128xi32>
      %116 = arith.select %114, %10, %115 : vector<8x128xi1>, vector<8x128xi32>
      %cst_61 = arith.constant dense<2147483647> : vector<8xi32>
      %117 = vector.multi_reduction <minsi>, %116, %cst_61 [1] : vector<8x128xi32> to vector<8xi32>
      %118 = vector.shape_cast %117 : vector<8xi32> to vector<8x1xi32>
      %119 = vector.broadcast %118 : vector<8x1xi32> to vector<8x128xi32>
      %120 = arith.cmpi eq, %10, %119 : vector<8x128xi32>
      %121 = arith.extui %120 : vector<8x128xi1> to vector<8x128xi32>
      %122 = arith.sitofp %121 : vector<8x128xi32> to vector<8x128xf32>
      %123 = arith.truncf %122 : vector<8x128xf32> to vector<8x128xbf16>
      %c0_62 = arith.constant 0 : index
      %c0_63 = arith.constant 0 : index
      %124 = vector.load %arg4[%c0_62, %c0_63] : memref<128x32xbf16, #tpu.memory_space<vmem>>, vector<128x32xbf16>
      %cst_64 = arith.constant dense<0.000000e+00> : vector<8x32xf32>
      %125 = tpu.matmul %123, %124, %cst_64 {dimension_numbers = #tpu.dot_dimension_numbers<[1], [0], [0], [1], [0, 0, 1, 1], [], []>} : vector<8x128xbf16>, vector<128x32xbf16>, vector<8x32xf32> -> vector<8x32xf32>
      %c0_65 = arith.constant 0 : index
      %c0_66 = arith.constant 0 : index
      %126 = vector.load %arg23[%c0_65, %c0_66] : memref<8x32xf32, #tpu.memory_space<vmem>>, vector<8x32xf32>
      tpu.vector_store %arg23[%c0_65, %c0_66], %125 {strides = array<i32>} : memref<8x32xf32, #tpu.memory_space<vmem>>, vector<8x32xf32>,
    } else {
    }
    %c5_i32_58 = arith.constant 5 : i32
    %106 = arith.cmpi eq, %arg1, %c5_i32_58 : i32
    %107 = arith.extui %106 : i1 to i32
    %c0_i32_59 = arith.constant 0 : i32
    %108 = arith.cmpi ne, %107, %c0_i32_59 : i32
    scf.if %108 {
      %c0_60 = arith.constant 0 : index
      %c0_61 = arith.constant 0 : index
      %109 = vector.load %arg19[%c0_60, %c0_61] : memref<8x32xf32, #tpu.memory_space<vmem>>, vector<8x32xf32>
      tpu.vector_store %arg19[%c0_60, %c0_61], %76 {strides = array<i32>} : memref<8x32xf32, #tpu.memory_space<vmem>>, vector<8x32xf32>,
      %c0_62 = arith.constant 0 : index
      %c0_63 = arith.constant 0 : index
      %110 = vector.load %arg20[%c0_62, %c0_63] : memref<8x32xf32, #tpu.memory_space<vmem>>, vector<8x32xf32>
      tpu.vector_store %arg20[%c0_62, %c0_63], %74 {strides = array<i32>} : memref<8x32xf32, #tpu.memory_space<vmem>>, vector<8x32xf32>,
    } else {
    }
    return
  }
  func.func @transform_0(%arg0: i32, %arg1: i32) -> (i32, i32, i32) {
    %c0_i32 = arith.constant 0 : i32
    %c0_i32_0 = arith.constant 0 : i32
    %c0_i32_1 = arith.constant 0 : i32
    return %arg0, %c0_i32, %c0_i32_0 : i32, i32, i32
  }
  func.func @transform_1(%arg0: i32, %arg1: i32) -> (i32, i32) {
    %c0_i32 = arith.constant 0 : i32
    %c0_i32_0 = arith.constant 0 : i32
    %c0_i32_1 = arith.constant 0 : i32
    return %c0_i32, %c0_i32_0 : i32, i32
  }
  func.func @transform_2(%arg0: i32, %arg1: i32) -> (i32, i32) {
    %c0_i32 = arith.constant 0 : i32
    %c0_i32_0 = arith.constant 0 : i32
    %c0_i32_1 = arith.constant 0 : i32
    return %c0_i32, %c0_i32_0 : i32, i32
  }
  func.func @transform_3(%arg0: i32, %arg1: i32) -> (i32, i32) {
    %c0_i32 = arith.constant 0 : i32
    %c0_i32_0 = arith.constant 0 : i32
    %c0_i32_1 = arith.constant 0 : i32
    return %c0_i32, %c0_i32_0 : i32, i32
  }
  func.func @transform_4(%arg0: i32, %arg1: i32) -> (i32, i32) {
    %c0_i32 = arith.constant 0 : i32
    %c0_i32_0 = arith.constant 0 : i32
    %c0_i32_1 = arith.constant 0 : i32
    return %c0_i32, %c0_i32_0 : i32, i32
  }
  func.func @transform_5(%arg0: i32, %arg1: i32) -> (i32, i32) {
    %c0_i32 = arith.constant 0 : i32
    %c0_i32_0 = arith.constant 0 : i32
    %c0_i32_1 = arith.constant 0 : i32
    return %c0_i32, %c0_i32_0 : i32, i32
  }
  func.func @transform_6(%arg0: i32, %arg1: i32) -> (i32, i32) {
    %c0_i32 = arith.constant 0 : i32
    %c0_i32_0 = arith.constant 0 : i32
    %c0_i32_1 = arith.constant 0 : i32
    return %c0_i32, %c0_i32_0 : i32, i32
  }
  func.func @transform_7(%arg0: i32, %arg1: i32) -> (i32, i32) {
    %c0_i32 = arith.constant 0 : i32
    %c0_i32_0 = arith.constant 0 : i32
    %c0_i32_1 = arith.constant 0 : i32
    return %c0_i32, %c0_i32_0 : i32, i32
  }
  func.func @transform_8(%arg0: i32, %arg1: i32) -> (i32, i32) {
    %c0_i32 = arith.constant 0 : i32
    %c0_i32_0 = arith.constant 0 : i32
    %c0_i32_1 = arith.constant 0 : i32
    return %c0_i32, %c0_i32_0 : i32, i32
  }
  func.func @transform_9(%arg0: i32, %arg1: i32) -> (i32, i32) {
    %c0_i32 = arith.constant 0 : i32
    %c0_i32_0 = arith.constant 0 : i32
    %c0_i32_1 = arith.constant 0 : i32
    return %c0_i32, %c0_i32_0 : i32, i32
  }
  func.func @transform_10(%arg0: i32, %arg1: i32) -> (i32, i32) {
    %c0_i32 = arith.constant 0 : i32
    %c0_i32_0 = arith.constant 0 : i32
    %c0_i32_1 = arith.constant 0 : i32
    return %c0_i32, %c0_i32_0 : i32, i32
  }
  func.func @transform_11(%arg0: i32, %arg1: i32) -> (i32, i32) {
    %c0_i32 = arith.constant 0 : i32
    %c0_i32_0 = arith.constant 0 : i32
    %c0_i32_1 = arith.constant 0 : i32
    return %c0_i32, %c0_i32_0 : i32, i32
  }
  func.func @transform_12(%arg0: i32, %arg1: i32) -> (i32, i32) {
    %c0_i32 = arith.constant 0 : i32
    %c0_i32_0 = arith.constant 0 : i32
    %c0_i32_1 = arith.constant 0 : i32
    return %c0_i32, %c0_i32_0 : i32, i32
  }
  func.func @transform_13(%arg0: i32, %arg1: i32) -> (i32, i32) {
    %c0_i32 = arith.constant 0 : i32
    %c0_i32_0 = arith.constant 0 : i32
    return %arg0, %c0_i32 : i32, i32
  }
  func.func @transform_14(%arg0: i32, %arg1: i32) -> (i32, i32) {
    %c0_i32 = arith.constant 0 : i32
    %c0_i32_0 = arith.constant 0 : i32
    return %arg0, %c0_i32 : i32, i32
  }
  func.func @transform_15(%arg0: i32, %arg1: i32) -> (i32, i32, i32) {
    %c0_i32 = arith.constant 0 : i32
    %c0_i32_0 = arith.constant 0 : i32
    return %arg1, %arg0, %c0_i32 : i32, i32, i32
  }
  func.func @transform_16(%arg0: i32, %arg1: i32) -> (i32, i32, i32) {
    %c0_i32 = arith.constant 0 : i32
    %c0_i32_0 = arith.constant 0 : i32
    return %arg1, %arg0, %c0_i32 : i32, i32, i32
  }
  func.func @transform_17(%arg0: i32, %arg1: i32) -> (i32, i32) {
    %c0_i32 = arith.constant 0 : i32
    %c0_i32_0 = arith.constant 0 : i32
    return %arg0, %c0_i32 : i32, i32
  }
  func.func @transform_18(%arg0: i32, %arg1: i32) -> (i32, i32) {
    %c0_i32 = arith.constant 0 : i32
    %c0_i32_0 = arith.constant 0 : i32
    return %arg0, %c0_i32 : i32, i32
  }
}

</mosaic_0001>

<bundles_post_ra>
// kernel: tpu_custom_call.1
= control target key start
LH: loop header
LB: loop body
LE: loop exit
PB: predicated region body
PF: predicated region fallthrough
CT: control target
= control target key end

     0   :  { %s5705_s0 = inlined_call_operand.vmem [shape: bf16[8,128,32], index: 0, kind: input, shape index: {}]   ;;  %s5706_s1 = inlined_call_operand.vmem [shape: f32[1,32], index: 1, kind: input, shape index: {}]   ;;  %s5707_s2 = inlined_call_operand.vmem [shape: bf16[128,32], index: 2, kind: input, shape index: {}]   ;;  %s5708_s3 = inlined_call_operand.vmem [shape: bf16[32,32], index: 3, kind: input, shape index: {}]   ;;  %s5709_s4 = inlined_call_operand.vmem [shape: f32[1,32], index: 4, kind: input, shape index: {}]   ;;  %s5710_s5 = inlined_call_operand.vmem [shape: bf16[32,128], index: 5, kind: input, shape index: {}]   ;;  %s5711_s6 = inlined_call_operand.vmem [shape: bf16[32,128], index: 6, kind: input, shape index: {}]   ;;  %s5712_s7 = inlined_call_operand.vmem [shape: bf16[32,128], index: 7, kind: input, shape index: {}]   ;;  %s5713_s8 = inlined_call_operand.vmem [shape: f32[1,128], index: 8, kind: input, shape index: {}]   ;;  %s5714_s9 = inlined_call_operand.vmem [shape: bf16[32,32], index: 9, kind: input, shape index: {}]   ;;  %s5715_s10 = inlined_call_operand.vmem [shape: bf16[32,32], index: 10, kind: input, shape index: {}]   ;;  %s5716_s11 = inlined_call_operand.vmem [shape: bf16[32,32], index: 11, kind: input, shape index: {}]   ;;  %s5717_s12 = inlined_call_operand.vmem [shape: f32[1,32], index: 12, kind: input, shape index: {}]   ;;  %s5718_s13 = inlined_call_operand.vmem [shape: f32[8,32], index: 13, kind: input, shape index: {}]   ;;  %s5719_s14 = inlined_call_operand.vmem [shape: f32[8,32], index: 14, kind: input, shape index: {}]   ;;  %s5720_s15 = inlined_call_operand.hbm [shape: bf16[6,8,128], index: 15, kind: output, shape index: {0}]   ;;  %s5721_s16 = inlined_call_operand.hbm [shape: bf16[6,8,128], index: 16, kind: output, shape index: {1}]   ;;  %s5722_s17 = inlined_call_operand.hbm [shape: f32[8,32], index: 17, kind: output, shape index: {2}]   ;;  %s5723_s18 = inlined_call_operand.hbm [shape: f32[8,32], index: 18, kind: output, shape index: {3}]  }
   0x1   :  { %5741 = sst [smem:[#allocation26_spill]] %s5705_s0 }
   0x2   :  { %5742 = sst [smem:[#allocation27_spill]] %s5706_s1 }
   0x3   :  { %5743 = sst [smem:[#allocation28_spill]] %s5707_s2 }
   0x4   :  { %5744 = sst [smem:[#allocation29_spill]] %s5708_s3 }
   0x5   :  { %5745 = sst [smem:[#allocation30_spill]] %s5709_s4 }
   0x6   :  { %5746 = sst [smem:[#allocation31_spill]] %s5710_s5 }
   0x7   :  { %5747 = sst [smem:[#allocation32_spill]] %s5711_s6 }
   0x8   :  { %24 = vsyncpa [#allocation6], 0 }
   0x9   :  { %26 = vsyncpa [#allocation6 + $0x1], 0 }
   0xa   :  { %27 = vsyncpa [#allocation8], 0 }
   0xb   :  { %29 = vsyncpa [#allocation8 + $0x1], 0 }
   0xc   :  { %30 = vsyncpa [#allocation11], 0  ;;  %s4522_s27 = smov 0   ;;  %s4524_s28 = smov 0  }
   0xd   :  { %s4526_s29 = smov 0   ;;  %s4528_s30 = smov 0  }
   0xe   :  { %s4530_s0 = smov 0   ;;  %s4532_s19 = smov 0  }
   0xf LB: > { %5748 = sst [smem:[#allocation16_spill]] %s4392_s27  ;;  %s5727_s1 = sadd.s32 4294967295, %s4412_s19   ;;  %s4412_s19 = sphi %s4532_s19, %s36_s19   ;;  %s4408_s0 = sphi %s4530_s0, %s5786_s0   ;;  %s4404_s30 = sphi %s4528_s30, %s5785_s30   ;;  %s4400_s29 = sphi %s4526_s29, %s5784_s29   ;;  %s4396_s28 = sphi %s4524_s28, %s5788_s28   ;;  %s4392_s27 = sphi %s4522_s27, %s5787_s27  }
  0x10   : > { %5749 = sst [smem:[#allocation17_spill]] %s4400_s29  ;;  %s5729_s20 = sadd.s32 4294967294, %s4412_s19  }
  0x11   : > { %5750 = sst [smem:[#allocation18_spill]] %s4408_s0  ;;  %s45_s21 = sadd.s32 1, %s4408_s0 }
  0x12   : > { %s387_s22 = sadd.s32 1, %s4400_s29  ;;  %p46_p0 = scmp.ge.s32.totalorder %s45_s21, 6 }
  0x13   : > { %p397_p1 = scmp.ne.s32.totalorder %s4400_s29, %s4396_s28  ;;  %p4560_p2 = scmp.eq.s32.totalorder %s5727_s1, 5 }
  0x14   : > { %p403_p3 = scmp.ne.s32.totalorder %s4396_s28, %s4392_s27  ;;  %s5790_s21 = smov (%p46_p0, %s45_s21), 0 }
  0x15   : > { %5752 = sst [smem:[#allocation19_spill]] %s5790_s21  ;;  %p4570_p4 = por %p4560_p2, %p397_p1 }
  0x16   : > { %p404_p5 = scmp.eq.s32.totalorder %s5729_s20, 5  ;;  %s382_s24 = ssub.s32 %s4408_s0, %s5790_s21 }
  0x17   : > { %p3269_p6 = scmp.ge.s32.totalorder %s4412_s19, 1  ;;  %p385_p7 = scmp.eq.s32.totalorder %s382_s24, 0 }
  0x18   : > { %p4579_p8 = por %p404_p5, %p403_p3  ;;  %p562_p9 = scmp.lt.s32.totalorder %s4412_s19, 7 }
  0x19   : > { %s4585_s26 = scalar_select %p385_p7, %s4400_s29, %s387_s22  }
  0x1a   : > { %s5754_s25 = scalar_select %p4579_p8, 1, 0 }
  0x1b   : > { %5756 = sst [smem:[#allocation21_spill]] %s4585_s26  ;;  %p563_p10 = pnand %p3269_p6, %p562_p9 }
  0x1c   : > { %5755 = sst [smem:[#allocation20_spill]] %s5754_s25 }
  0x1d   : > { %566 = sbr.rel (%p563_p10) target bundleno = 3132 (0xc3c), region = 80 }
  0x24   : > { %s5734_s1 = sand.u32 1, %s4396_s28   ;;  %p3272_p11 = scmp.ne.s32.totalorder %s4404_s30, 0 }
  0x25   : > { %s4590_s27 = sshll.u32 %s5734_s1, 2  ;;  %v650_v0 = vld [vmem:[%s5718_s13] sm:$0xff] (!%p3272_p11)  ;;  %vm651_vm0 = vcmask (!%p3272_p11), 261120   ;;  %s5757_s1 = sld [smem:[#allocation27_spill]] (!%p3272_p11) }
  0x26   : > { %649 = sbr.rel (%p3272_p11) target bundleno = 45 (0x2d), region = 84  ;;  %v653_v1 = vld [vmem:[%s5719_s14] sm:$0xff] (!%p3272_p11)  ;;  %652 = vst.msk [vmem:[#allocation2] sm:$0xff] (!%p3272_p11), %vm651_vm0, %v650_v0 }
  0x27   : > { %654 = vst.msk [vmem:[#allocation3] sm:$0xff] (!%p3272_p11), %vm651_vm0, %v653_v1 }
  0x2b   : > { %v3273_v2 = vld [vmem:[%s5757_s1] ss:$0 sm:$0xff] (!%p3272_p11) }
  0x2c   : > { %662 = vst.msk [vmem:[#allocation4] sm:$0xff] (!%p3272_p11), %vm651_vm0, %v3273_v2 }
  0x2d PF: > { %s5758_s3 = sld [smem:[#allocation29_spill]]  ;;  %v4414_v4 = vmov 0.0   ;;  %vm4415_vm1 = vmmov 0   ;;  %v663_v6 = vld [vmem:[#allocation2] sm:$0xff]  ;;  %s5759_s20 = sld [smem:[#allocation26_spill]]  ;;  %vm823_vm2 = vcmask 261120   ;;  %v794_v40 = vlaneseq }
  0x2e   : > { %3602 = vmatprep.subr.bf16.mxu0 %v4414_v4  ;;  %3610 = vmatprep.subr.bf16.mxu1 %v4414_v4  ;;  %v4625_v9 = vpack.c.bf16 %v663_v6, %v663_v6  ;;  %v4416_v41 = vmov 1966171168   ;;  %s5761_s4 = sld [smem:[#allocation30_spill]]  ;;  %vm1799_vm5 = vcmask 1040384   ;;  %vm2313_vm6 = vcmask 1041409   ;;  %s5768_s29 = scalar_lea.vmem [#allocation7], %s4590_s27 }
  0x2f   : > { %3606 = vmatprep.mubr.msk.bf16.mxu0 %vm4415_vm1, %v4414_v4  ;;  %3626 = vmatprep.mubr.msk.bf16.mxu1 %vm4415_vm1, %v4414_v4  ;;  %v870_v42 = vunpack.c.l.s4 %v4416_v41  ;;  %v873_v44 = vshrl.u32 %v794_v40, 7  ;;  %vm2316_vm7 = vcmask 1042434   ;;  %vm2319_vm8 = vcmask 1043459   ;;  %s5769_s5 = sld [smem:[#allocation31_spill]]  ;;  %s5770_s6 = sld [smem:[#allocation32_spill]] }
  0x30   : > { %5760 = vst [vmem:[#allocation22_spill] sm:$0xff] %v4625_v9  ;;  %vm2322_vm9 = vcmask 1044484   ;;  %vm2325_vm10 = vcmask 1045509   ;;  %vm2328_vm11 = vcmask 1046534   ;;  %vm2331_vm12 = vcmask 1047559   ;;  %s5739_s22 = smov 32  }
  0x31   : > { %v871_v43 = vunpack.c.0.s8 %v870_v42  ;;  %s4418_s26 = smov 64   ;;  %s5772_s0 = smov 32  }
  0x32   : > { %s5773_s24 = sld [smem:[#allocation28_spill]]  ;;  %p3388_p12 = scmp.ge.s32.totalorder %s4404_s30, 5 }
  0x33   : > { %v4101_v3 = vld [vmem:[%s5758_s3] sm:$0xff]   ;;  %v4102_v5 = vld [vmem:[%s5758_s3 + $0x8] sm:$0xff]   ;;  %v4642_v13 = vld [vmem:[%s5759_s20 + $0x10] sm:$0xff]   ;;  %v874_v46 = vsub.s32 %v871_v43, %v873_v44  ;;  %s4419_s3 = smov 96   ;;  %s5775_s21 = sld [smem:[#allocation28_spill]] (!%p3388_p12)  ;;  %vm4421_vm15 = vmmov (!%p3388_p12), 0  }
  0x34   : > { %3603 = vmatpush3.bf16.msra.mxu0 %v4101_v3  ;;  %v4618_v7 = vld [vmem:[%s5759_s20] sm:$0xff]   ;;  %v4632_v11 = vld [vmem:[%s5759_s20 + $0x8] sm:$0xff]   ;;  %v4108_v14 = vld [vmem:[%s5759_s20 + $0x50] sm:$0xff]   ;;  %v983_v22 = vsel %vm823_vm2, %v4642_v13, 0 }
  0x35   : > { %3604 = vmatprep.subr.bf16.mxu0 %v4414_v4  ;;  %v4104_v8 = vld [vmem:[%s5759_s20 + $0x40] sm:$0xff]   ;;  %v977_v10 = vsel %vm823_vm2, %v4618_v7, 0  ;;  %v4106_v12 = vld [vmem:[%s5759_s20 + $0x48] sm:$0xff]   ;;  %v4652_v15 = vld [vmem:[%s5759_s20 + $0x18] sm:$0xff]   ;;  %v980_v18 = vsel %vm823_vm2, %v4632_v11, 0  ;;  %v1090_v24 = vsel %vm823_vm2, %v4108_v14, 0 }
  0x36   : > { %3611 = vmatpush3.bf16.xpose.msra.mxu1 %v977_v10  ;;  %v1084_v16 = vsel %vm823_vm2, %v4104_v8, 0  ;;  %v4110_v17 = vld [vmem:[%s5759_s20 + $0x58] sm:$0xff]   ;;  %v4665_v19 = vld [vmem:[%s5759_s20 + $0x20] sm:$0xff]   ;;  %v1087_v20 = vsel %vm823_vm2, %v4106_v12, 0  ;;  %v4676_v23 = vld [vmem:[%s5759_s20 + $0x28] sm:$0xff]   ;;  %v986_v26 = vsel %vm823_vm2, %v4652_v15, 0 }
  0x37   : > { %3612 = vmatprep.subr.bf16.mxu1 %v4414_v4  ;;  %v4112_v21 = vld [vmem:[%s5759_s20 + $0x60] sm:$0xff]   ;;  %v4114_v25 = vld [vmem:[%s5759_s20 + $0x68] sm:$0xff]   ;;  %v4688_v27 = vld [vmem:[%s5759_s20 + $0x30] sm:$0xff]   ;;  %v1093_v28 = vsel %vm823_vm2, %v4110_v17, 0  ;;  %v989_v29 = vsel %vm823_vm2, %v4665_v19, 0  ;;  %v992_v32 = vsel %vm823_vm2, %v4676_v23, 0 }
  0x38   : > { %3605 = vmatpush3.bf16.msra.mxu0 %v4102_v5  ;;  %v1096_v30 = vsel %vm823_vm2, %v4112_v21, 0  ;;  %v4116_v31 = vld [vmem:[%s5759_s20 + $0x70] sm:$0xff]   ;;  %v1099_v33 = vsel %vm823_vm2, %v4114_v25, 0  ;;  %v995_v34 = vsel %vm823_vm2, %v4688_v27, 0  ;;  %v4718_v36 = vld [vmem:[%s5759_s20 + $0x38] sm:$0xff]   ;;  %v4738_v54 = vld [vmem:[%s5759_s20 + $0x80] sm:$0xff]  }
  0x39   : > { %3630 = vmatprep.subr.bf16.mxu0 %v4414_v4  ;;  %v1102_v35 = vsel %vm823_vm2, %v4116_v31, 0  ;;  %v998_v37 = vsel %vm823_vm2, %v4718_v36, 0  ;;  %v4725_v38 = vld [vmem:[%s5759_s20 + $0x78] sm:$0xff]   ;;  %v3274_v45 = vld [vmem:[%s5761_s4] ss:$0 sm:$0xff]  ;;  %v1191_v63 = vsel %vm823_vm2, %v4738_v54, 0 }
  0x3a   : > { %v1105_v39 = vsel %vm823_vm2, %v4725_v38, 0  ;;  %v4745_v58 = vld [vmem:[%s5759_s20 + $0xc0] sm:$0xff]   ;;  %v4767_v3 = vld [vmem:[%s5759_s20 + $0x88] sm:$0xff]   ;;  %v4787_v10 = vld [vmem:[%s5759_s20 + $0x90] sm:$0xff]  }
  0x3b   : > { %3607 = vmatmul.mubr.msk.bf16.vlgmr.msra.gmra.mrb[0].mxu0 %vm823_vm2, %v4625_v9  ;;  %v1298_v2 = vsel %vm823_vm2, %v4745_v58, 0  ;;  %v4775_v5 = vld [vmem:[%s5759_s20 + $0xc8] sm:$0xff]   ;;  %v1194_v6 = vsel %vm823_vm2, %v4767_v3, 0  ;;  %v4793_v12 = vld [vmem:[%s5759_s20 + $0xd0] sm:$0xff]   ;;  %v1197_v14 = vsel %vm823_vm2, %v4787_v10, 0  ;;  %v4803_v17 = vld [vmem:[%s5759_s20 + $0x98] sm:$0xff]  }
  0x3c   : > { %3646 = vmatprep.mubr.msk.bf16.mxu0 %vm4415_vm1, %v4414_v4  ;;  %v1301_v8 = vsel %vm823_vm2, %v4775_v5, 0  ;;  %v4885_v44 = vld [vmem:[%s5759_s20 + $0x100] sm:$0xff]  }
  0x3e   : > { %3613 = vmatpush3.bf16.xpose.msra.mxu1 %v980_v18  ;;  %v4809_v18 = vld [vmem:[%s5759_s20 + $0xd8] sm:$0xff]  }
  0x3f   : > { %3614 = vmatprep.subr.bf16.mxu1 %v4414_v4  ;;  %v1307_v21 = vsel %vm823_vm2, %v4809_v18, 0 }
  0x41   : > { %3631 = vmatpush3.bf16.xpose.msra.mxu0 %v1084_v16  ;;  %v1304_v16 = vsel %vm823_vm2, %v4793_v12, 0 }
  0x42   : > { %3632 = vmatprep.subr.bf16.mxu0 %v4414_v4 }
  0x46   : > { %3615 = vmatpush3.bf16.xpose.msra.mxu1 %v983_v22  ;;  %v4819_v22 = vld [vmem:[%s5759_s20 + $0xa0] sm:$0xff]  }
  0x47   : > { %3616 = vmatprep.subr.bf16.mxu1 %v4414_v4  ;;  %v1203_v25 = vsel %vm823_vm2, %v4819_v22, 0 }
  0x49   : > { %3633 = vmatpush3.bf16.xpose.msra.mxu0 %v1087_v20  ;;  %v1200_v20 = vsel %vm823_vm2, %v4803_v17, 0 }
  0x4a   : > { %3634 = vmatprep.subr.bf16.mxu0 %v4414_v4 }
  0x4e   : > { %3617 = vmatpush3.bf16.xpose.msra.mxu1 %v986_v26 }
  0x4f   : > { %3618 = vmatprep.subr.bf16.mxu1 %v4414_v4 }
  0x51   : > { %3635 = vmatpush3.bf16.xpose.msra.mxu0 %v1090_v24  ;;  %v4825_v24 = vld [vmem:[%s5759_s20 + $0xe0] sm:$0xff]  }
  0x52   : > { %3636 = vmatprep.subr.bf16.mxu0 %v4414_v4  ;;  %v1310_v26 = vsel %vm823_vm2, %v4825_v24, 0 }
  0x56   : > { %3619 = vmatpush3.bf16.xpose.msra.mxu1 %v989_v29  ;;  %v4841_v29 = vld [vmem:[%s5759_s20 + $0xe8] sm:$0xff]  }
  0x57   : > { %3620 = vmatprep.subr.bf16.mxu1 %v4414_v4  ;;  %v1313_v31 = vsel %vm823_vm2, %v4841_v29, 0 }
  0x59   : > { %3637 = vmatpush3.bf16.xpose.msra.mxu0 %v1093_v28  ;;  %v4835_v28 = vld [vmem:[%s5759_s20 + $0xa8] sm:$0xff]  }
  0x5a   : > { %3638 = vmatprep.subr.bf16.mxu0 %v4414_v4 }
  0x5e   : > { %3621 = vmatpush3.bf16.xpose.msra.mxu1 %v992_v32  ;;  %v4851_v32 = vld [vmem:[%s5759_s20 + $0xb0] sm:$0xff]  }
  0x5f   : > { %3622 = vmatprep.subr.bf16.mxu1 %v4414_v4 }
  0x61   : > { %3639 = vmatpush3.bf16.xpose.msra.mxu0 %v1096_v30  ;;  %v1206_v30 = vsel %vm823_vm2, %v4835_v28, 0 }
  0x62   : > { %3640 = vmatprep.subr.bf16.mxu0 %v4414_v4 }
  0x66   : > { %3623 = vmatpush3.bf16.xpose.msra.mxu1 %v995_v34  ;;  %v1209_v34 = vsel %vm823_vm2, %v4851_v32, 0 }
  0x67   : > { %3624 = vmatprep.subr.bf16.mxu1 %v4414_v4 }
  0x69   : > { %3641 = vmatpush3.bf16.xpose.msra.mxu0 %v1099_v33  ;;  %v4857_v33 = vld [vmem:[%s5759_s20 + $0xf0] sm:$0xff]  }
  0x6a   : > { %3642 = vmatprep.subr.bf16.mxu0 %v4414_v4 }
  0x6e   : > { %3625 = vmatpush3.bf16.xpose.msra.mxu1 %v998_v37  ;;  %v4867_v37 = vld [vmem:[%s5759_s20 + $0xb8] sm:$0xff]  }
  0x6f   : > { %3650 = vmatprep.subr.bf16.mxu1 %v4414_v4  ;;  %v1212_v41 = vsel %vm823_vm2, %v4867_v37, 0 }
  0x71   : > { %3643 = vmatpush3.bf16.xpose.msra.mxu0 %v1102_v35  ;;  %v1316_v35 = vsel %vm823_vm2, %v4857_v33, 0 }
  0x72   : > { %3644 = vmatprep.subr.bf16.mxu0 %v4414_v4 }
  0x79   : > { %3645 = vmatpush3.bf16.xpose.msra.mxu0 %v1105_v39  ;;  %v4873_v39 = vld [vmem:[%s5759_s20 + $0xf8] sm:$0xff]  }
  0x7a   : > { %3670 = vmatprep.subr.bf16.mxu0 %v4414_v4  ;;  %v1319_v42 = vsel %vm823_vm2, %v4873_v39, 0 }
 0x10e   : > { %v861_v47 = vpop.f32.mrb[0].mxu0 }
 0x10f   : > { %v862_v48 = vadd.f32 %v3274_v45, %v861_v47  ;;  %v3608_v49 = vpop.f32.mrb[1].mxu0 }
 0x110   : > { %v864_v50 = vpop.f32.mrb[2].mxu0 }
 0x111   : > { %v868_v51 = vcombine.high %v862_v48, %v862_v48  ;;  %v875_v52 = vrot.slane %v862_v48, %v874_v46  ;;  %v3609_v53 = vpop.f32.mrb[3].mxu0  ;;  %v1405_v48 = vsel %vm823_vm2, %v4885_v44, 0 }
 0x112   : > { %v4918_v53 = vld [vmem:[%s5759_s20 + $0x148] sm:$0xff]  }
 0x113   : > { %v882_v55 = vrot.slane %v868_v51, %v874_v46  ;;  %v883_v56 = vcombine.high %v875_v52, %v875_v52  ;;  %v4740_v57 = vrot.slane %v875_v52, %v874_v46  ;;  %v4907_v51 = vld [vmem:[%s5759_s20 + $0x108] sm:$0xff]   ;;  %v4910_v52 = vand.u32 127, %v794_v40 }
 0x114   : > { %v1515_v40 = vsel %vm823_vm2, %v4918_v53, 0 }
 0x115   : > { %v884_v59 = vcombine.high %v882_v55, %v882_v55  ;;  %v4747_v60 = vrot.slane %v882_v55, %v874_v46  ;;  %v4749_v61 = vrot.slane %v883_v56, %v874_v46  ;;  %v925_v62 = vpack.c.bf16 %v4740_v57, %v4740_v57  ;;  %v4929_v56 = vld [vmem:[%s5759_s20 + $0x110] sm:$0xff]  }
 0x116   : > { %v913_v43 = vcombine.high %v4740_v57, %v4740_v57  ;;  %vm797_vm3 = vcmp.lt.s32.totalorder %v4910_v52, 64  ;;  %v1408_v55 = vsel %vm823_vm2, %v4907_v51, 0  ;;  %v4935_v57 = vld [vmem:[%s5759_s20 + $0x150] sm:$0xff]   ;;  %vm796_vm4 = vcmp.lt.s32.totalorder %v4910_v52, 8 }
 0x117   : > { %v4755_v0 = vrot.slane %v884_v59, %v874_v46  ;;  %v926_v1 = vpack.c.bf16 %v4749_v61, %v4749_v61  ;;  %3627 = vmatmul.mubr.msk.bf16.vlgmr.msra.gmra.mrb[0].mxu1 %vm823_vm2, %v925_v62  ;;  %v915_v45 = vcombine.high %v4749_v61, %v4749_v61  ;;  %v4893_v46 = vld [vmem:[%s5759_s20 + $0x140] sm:$0xff]   ;;  %v1411_v59 = vsel %vm823_vm2, %v4929_v56, 0  ;;  %v4945_v62 = vld [vmem:[%s5759_s20 + $0x118] sm:$0xff]  }
 0x118   : > { %3651 = vmatpush3.bf16.xpose.msra.mxu1 %v1191_v63  ;;  %3666 = vmatprep.mubr.msk.bf16.mxu1 %vm4415_vm1, %v4414_v4  ;;  %v927_v47 = vpack.c.bf16 %v913_v43, %v913_v43  ;;  %v1512_v50 = vsel %vm823_vm2, %v4893_v46, 0  ;;  %v1518_v61 = vsel %vm823_vm2, %v4935_v57, 0  ;;  %v4951_v63 = vld [vmem:[%s5759_s20 + $0x158] sm:$0xff]  }
 0x119   : > { %3647 = vmatmul.mubr.msk.bf16.vlgmr.msra.gmra.mrb[4].mxu0 %vm823_vm2, %v926_v1  ;;  %3652 = vmatprep.subr.bf16.mxu1 %v4414_v4  ;;  %v928_v49 = vpack.c.bf16 %v915_v45, %v915_v45  ;;  %v1414_v1 = vsel %vm823_vm2, %v4945_v62, 0 }
 0x11a   : > { %3671 = vmatpush3.bf16.xpose.msra.mxu0 %v1298_v2  ;;  %3686 = vmatprep.mubr.msk.bf16.mxu0 %vm4415_vm1, %v4414_v4  ;;  %v1521_v2 = vsel %vm823_vm2, %v4951_v63, 0 }
 0x11b   : > { %3672 = vmatprep.subr.bf16.mxu0 %v4414_v4 }
 0x120   : > { %3653 = vmatpush3.bf16.xpose.msra.mxu1 %v1194_v6  ;;  %v4961_v6 = vld [vmem:[%s5759_s20 + $0x120] sm:$0xff]  }
 0x121   : > { %3654 = vmatprep.subr.bf16.mxu1 %v4414_v4 }
 0x122   : > { %3673 = vmatpush3.bf16.xpose.msra.mxu0 %v1301_v8  ;;  %v4967_v8 = vld [vmem:[%s5759_s20 + $0x160] sm:$0xff]  }
 0x123   : > { %3674 = vmatprep.subr.bf16.mxu0 %v4414_v4 }
 0x128   : > { %3655 = vmatpush3.bf16.xpose.msra.mxu1 %v1197_v14  ;;  %v1417_v14 = vsel %vm823_vm2, %v4961_v6, 0 }
 0x129   : > { %3656 = vmatprep.subr.bf16.mxu1 %v4414_v4 }
 0x12a   : > { %3675 = vmatpush3.bf16.xpose.msra.mxu0 %v1304_v16  ;;  %v1524_v16 = vsel %vm823_vm2, %v4967_v8, 0 }
 0x12b   : > { %3676 = vmatprep.subr.bf16.mxu0 %v4414_v4 }
 0x130   : > { %3657 = vmatpush3.bf16.xpose.msra.mxu1 %v1200_v20  ;;  %v4977_v20 = vld [vmem:[%s5759_s20 + $0x128] sm:$0xff]  }
 0x131   : > { %3658 = vmatprep.subr.bf16.mxu1 %v4414_v4 }
 0x132   : > { %3677 = vmatpush3.bf16.xpose.msra.mxu0 %v1307_v21  ;;  %v4983_v21 = vld [vmem:[%s5759_s20 + $0x168] sm:$0xff]  }
 0x133   : > { %3678 = vmatprep.subr.bf16.mxu0 %v4414_v4 }
 0x138   : > { %3659 = vmatpush3.bf16.xpose.msra.mxu1 %v1203_v25  ;;  %v1420_v25 = vsel %vm823_vm2, %v4977_v20, 0 }
 0x139   : > { %3660 = vmatprep.subr.bf16.mxu1 %v4414_v4 }
 0x13a   : > { %3679 = vmatpush3.bf16.xpose.msra.mxu0 %v1310_v26  ;;  %v1527_v26 = vsel %vm823_vm2, %v4983_v21, 0 }
 0x13b   : > { %3680 = vmatprep.subr.bf16.mxu0 %v4414_v4 }
 0x140   : > { %3661 = vmatpush3.bf16.xpose.msra.mxu1 %v1206_v30  ;;  %v4993_v30 = vld [vmem:[%s5759_s20 + $0x130] sm:$0xff]  }
 0x141   : > { %3662 = vmatprep.subr.bf16.mxu1 %v4414_v4 }
 0x142   : > { %3681 = vmatpush3.bf16.xpose.msra.mxu0 %v1313_v31  ;;  %v4999_v31 = vld [vmem:[%s5759_s20 + $0x170] sm:$0xff]  }
 0x143   : > { %3682 = vmatprep.subr.bf16.mxu0 %v4414_v4 }
 0x148   : > { %3663 = vmatpush3.bf16.xpose.msra.mxu1 %v1209_v34  ;;  %v1423_v34 = vsel %vm823_vm2, %v4993_v30, 0 }
 0x149   : > { %3664 = vmatprep.subr.bf16.mxu1 %v4414_v4 }
 0x14a   : > { %3683 = vmatpush3.bf16.xpose.msra.mxu0 %v1316_v35  ;;  %v1530_v35 = vsel %vm823_vm2, %v4999_v31, 0 }
 0x14b   : > { %3684 = vmatprep.subr.bf16.mxu0 %v4414_v4 }
 0x150   : > { %3665 = vmatpush3.bf16.xpose.msra.mxu1 %v1212_v41  ;;  %v5009_v41 = vld [vmem:[%s5759_s20 + $0x138] sm:$0xff]  }
 0x151   : > { %3690 = vmatprep.subr.bf16.mxu1 %v4414_v4  ;;  %v1426_v43 = vsel %vm823_vm2, %v5009_v41, 0 }
 0x152   : > { %3685 = vmatpush3.bf16.xpose.msra.mxu0 %v1319_v42  ;;  %v5015_v42 = vld [vmem:[%s5759_s20 + $0x178] sm:$0xff]  }
 0x153   : > { %3710 = vmatprep.subr.bf16.mxu0 %v4414_v4  ;;  %v1533_v45 = vsel %vm823_vm2, %v5015_v42, 0 }
 0x157   : > { %3667 = vmatmul.mubr.msk.bf16.vlgmr.msra.gmra.mrb[4].mxu1 %vm823_vm2, %v927_v47  ;;  %v5025_v47 = vld [vmem:[%s5759_s20 + $0x180] sm:$0xff]  }
 0x158   : > { %3691 = vmatpush3.bf16.xpose.msra.mxu1 %v1405_v48  ;;  %3706 = vmatprep.mubr.msk.bf16.mxu1 %vm4415_vm1, %v4414_v4  ;;  %v5031_v48 = vld [vmem:[%s5759_s20 + $0x1c0] sm:$0xff]  }
 0x159   : > { %3687 = vmatmul.mubr.msk.bf16.vlgmr.msra.gmra.mrb[8].mxu0 %vm823_vm2, %v928_v49  ;;  %3692 = vmatprep.subr.bf16.mxu1 %v4414_v4  ;;  %v929_v49 = vpack.c.bf16 %v4747_v60, %v4747_v60 }
 0x15a   : > { %3711 = vmatpush3.bf16.xpose.msra.mxu0 %v1512_v50  ;;  %3726 = vmatprep.mubr.msk.bf16.mxu0 %vm4415_vm1, %v4414_v4  ;;  %v1619_v50 = vsel %vm823_vm2, %v5025_v47, 0 }
 0x15b   : > { %3712 = vmatprep.subr.bf16.mxu0 %v4414_v4 }
 0x160   : > { %3693 = vmatpush3.bf16.xpose.msra.mxu1 %v1408_v55  ;;  %v930_v55 = vpack.c.bf16 %v4755_v0, %v4755_v0 }
 0x161   : > { %3694 = vmatprep.subr.bf16.mxu1 %v4414_v4 }
 0x162   : > { %3713 = vmatpush3.bf16.xpose.msra.mxu0 %v1515_v40  ;;  %v1726_v40 = vsel %vm823_vm2, %v5031_v48, 0 }
 0x163   : > { %3714 = vmatprep.subr.bf16.mxu0 %v4414_v4 }
 0x168   : > { %3695 = vmatpush3.bf16.xpose.msra.mxu1 %v1411_v59  ;;  %v5049_v59 = vld [vmem:[%s5759_s20 + $0x188] sm:$0xff]  }
 0x169   : > { %3696 = vmatprep.subr.bf16.mxu1 %v4414_v4 }
 0x16a   : > { %3715 = vmatpush3.bf16.xpose.msra.mxu0 %v1518_v61  ;;  %v5057_v61 = vld [vmem:[%s5759_s20 + $0x1c8] sm:$0xff]  }
 0x16b   : > { %3716 = vmatprep.subr.bf16.mxu0 %v4414_v4 }
 0x170   : > { %3697 = vmatpush3.bf16.xpose.msra.mxu1 %v1414_v1  ;;  %v1622_v1 = vsel %vm823_vm2, %v5049_v59, 0 }
 0x171   : > { %3698 = vmatprep.subr.bf16.mxu1 %v4414_v4 }
 0x172   : > { %3717 = vmatpush3.bf16.xpose.msra.mxu0 %v1521_v2  ;;  %v1729_v2 = vsel %vm823_vm2, %v5057_v61, 0 }
 0x173   : > { %3718 = vmatprep.subr.bf16.mxu0 %v4414_v4 }
 0x178   : > { %3699 = vmatpush3.bf16.xpose.msra.mxu1 %v1417_v14  ;;  %v5067_v14 = vld [vmem:[%s5759_s20 + $0x190] sm:$0xff]  }
 0x179   : > { %3700 = vmatprep.subr.bf16.mxu1 %v4414_v4 }
 0x17a   : > { %3719 = vmatpush3.bf16.xpose.msra.mxu0 %v1524_v16  ;;  %v5073_v16 = vld [vmem:[%s5759_s20 + $0x1d0] sm:$0xff]  }
 0x17b   : > { %3720 = vmatprep.subr.bf16.mxu0 %v4414_v4 }
 0x180   : > { %3701 = vmatpush3.bf16.xpose.msra.mxu1 %v1420_v25  ;;  %v1625_v25 = vsel %vm823_vm2, %v5067_v14, 0 }
 0x181   : > { %3702 = vmatprep.subr.bf16.mxu1 %v4414_v4 }
 0x182   : > { %3721 = vmatpush3.bf16.xpose.msra.mxu0 %v1527_v26  ;;  %v1732_v26 = vsel %vm823_vm2, %v5073_v16, 0 }
 0x183   : > { %3722 = vmatprep.subr.bf16.mxu0 %v4414_v4 }
 0x188   : > { %3703 = vmatpush3.bf16.xpose.msra.mxu1 %v1423_v34  ;;  %v5083_v34 = vld [vmem:[%s5759_s20 + $0x198] sm:$0xff]  }
 0x189   : > { %3704 = vmatprep.subr.bf16.mxu1 %v4414_v4 }
 0x18a   : > { %3723 = vmatpush3.bf16.xpose.msra.mxu0 %v1530_v35  ;;  %v5089_v35 = vld [vmem:[%s5759_s20 + $0x1d8] sm:$0xff]  }
 0x18b   : > { %3724 = vmatprep.subr.bf16.mxu0 %v4414_v4 }
 0x190   : > { %3705 = vmatpush3.bf16.xpose.msra.mxu1 %v1426_v43  ;;  %v1628_v43 = vsel %vm823_vm2, %v5083_v34, 0 }
 0x191   : > { %3730 = vmatprep.subr.bf16.mxu1 %v4414_v4 }
 0x192   : > { %3725 = vmatpush3.bf16.xpose.msra.mxu0 %v1533_v45  ;;  %v1735_v45 = vsel %vm823_vm2, %v5089_v35, 0 }
 0x193   : > { %3750 = vmatprep.subr.bf16.mxu0 %v4414_v4 }
 0x197   : > { %3707 = vmatmul.mubr.msk.bf16.vlgmr.msra.gmra.mrb[8].mxu1 %vm823_vm2, %v929_v49  ;;  %v5099_v49 = vld [vmem:[%s5759_s20 + $0x1a0] sm:$0xff]  }
 0x198   : > { %3731 = vmatpush3.bf16.xpose.msra.mxu1 %v1619_v50  ;;  %3746 = vmatprep.mubr.msk.bf16.mxu1 %vm4415_vm1, %v4414_v4  ;;  %v5105_v50 = vld [vmem:[%s5759_s20 + $0x1e0] sm:$0xff]  }
 0x199   : > { %3727 = vmatmul.mubr.msk.bf16.vlgmr.msra.gmra.mrb[12].mxu0 %vm823_vm2, %v930_v55  ;;  %3732 = vmatprep.subr.bf16.mxu1 %v4414_v4  ;;  %5762 = vst [vmem:[#allocation23_spill] sm:$0xff] %v5105_v50  ;;  %v1631_v55 = vsel %vm823_vm2, %v5099_v49, 0 }
 0x19a   : > { %3751 = vmatpush3.bf16.xpose.msra.mxu0 %v1726_v40  ;;  %3766 = vmatprep.mubr.msk.bf16.mxu0 %vm4415_vm1, %v4414_v4  ;;  %v1738_v40 = vsel %vm823_vm2, %v5105_v50, 0 }
 0x19b   : > { %3752 = vmatprep.subr.bf16.mxu0 %v4414_v4 }
 0x1a0   : > { %3733 = vmatpush3.bf16.xpose.msra.mxu1 %v1622_v1  ;;  %v5115_v1 = vld [vmem:[%s5759_s20 + $0x1a8] sm:$0xff]  }
 0x1a1   : > { %3734 = vmatprep.subr.bf16.mxu1 %v4414_v4 }
 0x1a2   : > { %3753 = vmatpush3.bf16.xpose.msra.mxu0 %v1729_v2  ;;  %v5121_v2 = vld [vmem:[%s5759_s20 + $0x1e8] sm:$0xff]  }
 0x1a3   : > { %3754 = vmatprep.subr.bf16.mxu0 %v4414_v4  ;;  %5763 = vst [vmem:[#allocation24_spill] sm:$0xff] %v5121_v2 }
 0x1a8   : > { %3735 = vmatpush3.bf16.xpose.msra.mxu1 %v1625_v25  ;;  %v1634_v25 = vsel %vm823_vm2, %v5115_v1, 0 }
 0x1a9   : > { %3736 = vmatprep.subr.bf16.mxu1 %v4414_v4 }
 0x1aa   : > { %3755 = vmatpush3.bf16.xpose.msra.mxu0 %v1732_v26  ;;  %v1741_v26 = vsel %vm823_vm2, %v5121_v2, 0 }
 0x1ab   : > { %3756 = vmatprep.subr.bf16.mxu0 %v4414_v4 }
 0x1b0   : > { %3737 = vmatpush3.bf16.xpose.msra.mxu1 %v1628_v43  ;;  %v5131_v43 = vld [vmem:[%s5759_s20 + $0x1b0] sm:$0xff]  }
 0x1b1   : > { %3738 = vmatprep.subr.bf16.mxu1 %v4414_v4 }
 0x1b2   : > { %3757 = vmatpush3.bf16.xpose.msra.mxu0 %v1735_v45  ;;  %v5137_v45 = vld [vmem:[%s5759_s20 + $0x1f0] sm:$0xff]  }
 0x1b3   : > { %3758 = vmatprep.subr.bf16.mxu0 %v4414_v4  ;;  %5764 = vst [vmem:[#allocation25_spill] sm:$0xff] %v5137_v45 }
 0x1b8   : > { %3739 = vmatpush3.bf16.xpose.msra.mxu1 %v1631_v55  ;;  %v1637_v55 = vsel %vm823_vm2, %v5131_v43, 0 }
 0x1b9   : > { %3740 = vmatprep.subr.bf16.mxu1 %v4414_v4 }
 0x1ba   : > { %3759 = vmatpush3.bf16.xpose.msra.mxu0 %v1738_v40  ;;  %v1744_v40 = vsel %vm823_vm2, %v5137_v45, 0  ;;  %v914_v45 = vcombine.high %v4747_v60, %v4747_v60 }
 0x1bb   : > { %3760 = vmatprep.subr.bf16.mxu0 %v4414_v4 }
 0x1bc   : > { %v931_v2 = vpack.c.bf16 %v914_v45, %v914_v45 }
 0x1c0   : > { %3741 = vmatpush3.bf16.xpose.msra.mxu1 %v1634_v25  ;;  %v5147_v25 = vld [vmem:[%s5759_s20 + $0x1b8] sm:$0xff]  }
 0x1c1   : > { %3742 = vmatprep.subr.bf16.mxu1 %v4414_v4  ;;  %v1640_v9 = vsel %vm823_vm2, %v5147_v25, 0 }
 0x1c2   : > { %3761 = vmatpush3.bf16.xpose.msra.mxu0 %v1741_v26  ;;  %v5153_v26 = vld [vmem:[%s5759_s20 + $0x1f8] sm:$0xff]  }
 0x1c3   : > { %3762 = vmatprep.subr.bf16.mxu0 %v4414_v4 }
 0x1c8   : > { %3743 = vmatpush3.bf16.xpose.msra.mxu1 %v1637_v55  ;;  %v1747_v55 = vsel %vm823_vm2, %v5153_v26, 0 }
 0x1c9   : > { %3744 = vmatprep.subr.bf16.mxu1 %v4414_v4 }
 0x1ca   : > { %3763 = vmatpush3.bf16.xpose.msra.mxu0 %v1744_v40  ;;  %v916_v40 = vcombine.high %v4755_v0, %v4755_v0 }
 0x1cb   : > { %3764 = vmatprep.subr.bf16.mxu0 %v4414_v4 }
 0x1cc   : > { %v932_v50 = vpack.c.bf16 %v916_v40, %v916_v40 }
 0x1d0   : > { %3745 = vmatpush3.bf16.xpose.msra.mxu1 %v1640_v9 }
 0x1d1   : > { %3810 = vmatprep.subr.bf16.mxu1 %v4414_v4 }
 0x1d2   : > { %3765 = vmatpush3.bf16.xpose.msra.mxu0 %v1747_v55 }
 0x1d3   : > { %3770 = vmatprep.subr.bf16.mxu0 %v4414_v4 }
 0x1d7   : > { %3747 = vmatmul.mubr.msk.bf16.vlgmr.msra.gmra.mrb[12].mxu1 %vm823_vm2, %v931_v2 }
 0x1d8   : > { %3811 = vmatpush3.bf16.msra.mxu1 %v4738_v54  ;;  %3826 = vmatprep.mubr.msk.bf16.mxu1 %vm4415_vm1, %v4414_v4 }
 0x1d9   : > { %3767 = vmatmul.mubr.msk.bf16.vlgmr.msra.gmra.mrb[16].mxu0 %vm823_vm2, %v932_v50  ;;  %3812 = vmatprep.subr.bf16.mxu1 %v4414_v4 }
 0x1da   : > { %3771 = vmatpush3.bf16.msra.mxu0 %v4618_v7  ;;  %3786 = vmatprep.mubr.msk.bf16.mxu0 %vm4415_vm1, %v4414_v4 }
 0x1db   : > { %3772 = vmatprep.subr.bf16.mxu0 %v4414_v4 }
 0x1dc   : > { %3813 = vmatpush3.bf16.msra.mxu1 %v4767_v3 }
 0x1dd   : > { %3814 = vmatprep.subr.bf16.mxu1 %v4414_v4 }
 0x1de   : > { %3773 = vmatpush3.bf16.msra.mxu0 %v4632_v11 }
 0x1df   : > { %3774 = vmatprep.subr.bf16.mxu0 %v4414_v4 }
 0x1e0   : > { %3815 = vmatpush3.bf16.msra.mxu1 %v4787_v10 }
 0x1e1   : > { %3816 = vmatprep.subr.bf16.mxu1 %v4414_v4 }
 0x1e2   : > { %3775 = vmatpush3.bf16.msra.mxu0 %v4642_v13 }
 0x1e3   : > { %3776 = vmatprep.subr.bf16.mxu0 %v4414_v4 }
 0x1e4   : > { %3817 = vmatpush3.bf16.msra.mxu1 %v4803_v17 }
 0x1e5   : > { %3818 = vmatprep.subr.bf16.mxu1 %v4414_v4 }
 0x1e6   : > { %3777 = vmatpush3.bf16.msra.mxu0 %v4652_v15 }
 0x1e7   : > { %3778 = vmatprep.subr.bf16.mxu0 %v4414_v4 }
 0x1e8   : > { %3819 = vmatpush3.bf16.msra.mxu1 %v4819_v22 }
 0x1e9   : > { %3820 = vmatprep.subr.bf16.mxu1 %v4414_v4 }
 0x1ea   : > { %v1034_v7 = vpop.f32.mrb[0].mxu1  ;;  %3779 = vmatpush3.bf16.msra.mxu0 %v4665_v19 }
 0x1eb   : > { %v1791_v9 = vsel %vm796_vm4, %v1034_v7, -1e+30  ;;  %v3628_v11 = vpop.f32.mrb[1].mxu1  ;;  %3780 = vmatprep.subr.bf16.mxu0 %v4414_v4 }
 0x1ec   : > { %v1037_v13 = vpop.f32.mrb[2].mxu1  ;;  %v1141_v15 = vpop.f32.mrb[4].mxu0  ;;  %v1800_v54 = vsel %vm1799_vm5, %v1791_v9, -inf  ;;  %3821 = vmatpush3.bf16.msra.mxu1 %v4835_v28 }
 0x1ed   : > { %v1792_v60 = vsel %vm796_vm4, %v1141_v15, -1e+30  ;;  %1801 = vmax.xlane.f32.xlu0 %v1800_v54  ;;  %v3629_v0 = vpop.f32.mrb[3].mxu1  ;;  %v3648_v3 = vpop.f32.mrb[5].mxu0  ;;  %3822 = vmatprep.subr.bf16.mxu1 %v4414_v4 }
 0x1ee   : > { %v1144_v19 = vpop.f32.mrb[6].mxu0  ;;  %3781 = vmatpush3.bf16.msra.mxu0 %v4676_v23  ;;  %v1803_v17 = vsel %vm1799_vm5, %v1792_v60, -inf }
 0x1ef   : > { %v3649_v10 = vpop.f32.mrb[7].mxu0  ;;  %3782 = vmatprep.subr.bf16.mxu0 %v4414_v4 }
 0x1f0   : > { %3823 = vmatpush3.bf16.msra.mxu1 %v4851_v32 }
 0x1f1   : > { %1804 = vmax.xlane.f32.xlu0 %v1803_v17  ;;  %3824 = vmatprep.subr.bf16.mxu1 %v4414_v4 }
 0x1f2   : > { %3783 = vmatpush3.bf16.msra.mxu0 %v4688_v27 }
 0x1f3   : > { %3784 = vmatprep.subr.bf16.mxu0 %v4414_v4 }
 0x1f4   : > { %3825 = vmatpush3.bf16.msra.mxu1 %v4867_v37 }
 0x1f5   : > { %3850 = vmatprep.subr.bf16.mxu1 %v4414_v4 }
 0x1f6   : > { %3785 = vmatpush3.bf16.msra.mxu0 %v4718_v36 }
 0x1f7   : > { %3790 = vmatprep.subr.bf16.mxu0 %v4414_v4 }
 0x22a   : > { %v1248_v23 = vpop.f32.mrb[4].mxu1 }
 0x22b   : > { %v1793_v22 = vsel %vm796_vm4, %v1248_v23, -1e+30  ;;  %v3668_v28 = vpop.f32.mrb[5].mxu1 }
 0x22c   : > { %v1251_v32 = vpop.f32.mrb[6].mxu1  ;;  %v1355_v50 = vpop.f32.mrb[8].mxu0  ;;  %v1806_v2 = vsel %vm1799_vm5, %v1793_v22, -inf }
 0x22d   : > { %v1794_v27 = vsel %vm796_vm4, %v1355_v50, -1e+30  ;;  %1807 = vmax.xlane.f32.xlu1 %v1806_v2  ;;  %v3669_v37 = vpop.f32.mrb[7].mxu1  ;;  %v3688_v45 = vpop.f32.mrb[9].mxu0 }
 0x22e   : > { %v1358_v55 = vpop.f32.mrb[10].mxu0  ;;  %v1809_v36 = vsel %vm1799_vm5, %v1794_v27, -inf }
 0x22f   : > { %v3689_v40 = vpop.f32.mrb[11].mxu0 }
 0x231   : > { %1810 = vmax.xlane.f32.xlu1 %v1809_v36 }
 0x26a   : > { %v1462_v7 = vpop.f32.mrb[8].mxu1 }
 0x26b   : > { %v1795_v11 = vsel %vm796_vm4, %v1462_v7, -1e+30  ;;  %v3708_v13 = vpop.f32.mrb[9].mxu1 }
 0x26c   : > { %v1465_v15 = vpop.f32.mrb[10].mxu1  ;;  %v1569_v54 = vpop.f32.mrb[12].mxu0  ;;  %v1812_v0 = vsel %vm1799_vm5, %v1795_v11, -inf }
 0x26d   : > { %v3709_v3 = vpop.f32.mrb[11].mxu1  ;;  %1813 = vmax.xlane.f32.xlu1 %v1812_v0  ;;  %v3728_v19 = vpop.f32.mrb[13].mxu0  ;;  %v1796_v40 = vsel %vm796_vm4, %v1569_v54, -1e+30 }
 0x26e   : > { %v1572_v10 = vpop.f32.mrb[14].mxu0  ;;  %v1815_v13 = vsel %vm1799_vm5, %v1796_v40, -inf }
 0x26f   : > { %v3729_v17 = vpop.f32.mrb[15].mxu0 }
 0x27a   : > { %v1802_v23 = vpop.xlane.xlu0 %1801 }
 0x27b   : > { %v1824_v28 = vsub.f32 %v1791_v9, %v1802_v23 }
 0x27d   : > { %v1832_v32 = vmul.f32 1.442695, %v1824_v28 }
 0x27e   : > { %v1805_v50 = vpop.xlane.xlu0 %1804 }
 0x27f   : > { %4187 = vpow2.f32 %v1832_v32  ;;  %v1825_v2 = vsub.f32 %v1792_v60, %v1805_v50 }
 0x281   : > { %v1834_v37 = vmul.f32 1.442695, %v1825_v2 }
 0x283   : > { %4189 = vpow2.f32 %v1834_v37 }
 0x289   : > { %v4188_v45 = vpop.eup %4187 }
 0x28a   : > { %v1848_v55 = vsel %vm1799_vm5, %v4188_v45, 0.0 }
 0x28b   : > { %1849 = vadd.xlane.f32.xlu0 %v1848_v55 }
 0x28d   : > { %v4190_v36 = vpop.eup %4189 }
 0x28e   : > { %v1851_v7 = vsel %vm1799_vm5, %v4190_v36, 0.0 }
 0x28f   : > { %1852 = vadd.xlane.f32.xlu1 %v1851_v7  ;;  %1816 = vmax.xlane.f32.xlu0 %v1815_v13 }
 0x2aa   : > { %v1676_v9 = vpop.f32.mrb[12].mxu1 }
 0x2ab   : > { %v5226_v60 = vsel %vm796_vm4, %v1676_v9, -1e+30  ;;  %v3748_v15 = vpop.f32.mrb[13].mxu1 }
 0x2ac   : > { %v1679_v0 = vpop.f32.mrb[14].mxu1  ;;  %v1783_v3 = vpop.f32.mrb[16].mxu0  ;;  %v1818_v19 = vsel %vm1799_vm5, %v5226_v60, -inf }
 0x2ad   : > { %v5232_v54 = vsel %vm796_vm4, %v1783_v3, -1e+30  ;;  %v3749_v10 = vpop.f32.mrb[15].mxu1  ;;  %1819 = vmax.xlane.f32.xlu0 %v1818_v19  ;;  %v3768_v17 = vpop.f32.mrb[17].mxu0 }
 0x2ae   : > { %v1786_v23 = vpop.f32.mrb[18].mxu0  ;;  %v1821_v28 = vsel %vm1799_vm5, %v5232_v54, -inf }
 0x2af   : > { %1822 = vmax.xlane.f32.xlu1 %v1821_v28  ;;  %v3769_v32 = vpop.f32.mrb[19].mxu0 }
 0x2ba   : > { %v1808_v50 = vpop.xlane.xlu1 %1807 }
 0x2bb   : > { %v1826_v2 = vsub.f32 %v1793_v22, %v1808_v50 }
 0x2bd   : > { %v1836_v37 = vmul.f32 1.442695, %v1826_v2 }
 0x2be   : > { %v1811_v55 = vpop.xlane.xlu1 %1810 }
 0x2bf   : > { %4191 = vpow2.f32 %v1836_v37  ;;  %v1827_v7 = vsub.f32 %v1794_v27, %v1811_v55 }
 0x2c1   : > { %v1838_v13 = vmul.f32 1.442695, %v1827_v7 }
 0x2c3   : > { %4193 = vpow2.f32 %v1838_v13 }
 0x2c9   : > { %v5236_v9 = vpop.eup %4191 }
 0x2ca   : > { %v1854_v15 = vsel %vm1799_vm5, %v5236_v9, 0.0 }
 0x2cb   : > { %1855 = vadd.xlane.f32.xlu0 %v1854_v15  ;;  %v4227_v15 = vld [vmem:[%s5759_s20 + $0x40] sm:$0xff]  }
 0x2cd   : > { %v5240_v0 = vpop.eup %4193 }
 0x2ce   : > { %v1857_v3 = vsel %vm1799_vm5, %v5240_v0, 0.0 }
 0x2cf   : > { %1858 = vadd.xlane.f32.xlu1 %v1857_v3 }
 0x2fa   : > { %v1814_v19 = vpop.xlane.xlu1 %1813 }
 0x2fb   : > { %v1828_v22 = vsub.f32 %v1795_v11, %v1814_v19 }
 0x2fd   : > { %v1840_v10 = vmul.f32 1.442695, %v1828_v22 }
 0x2ff   : > { %4195 = vpow2.f32 %v1840_v10 }
 0x309   : > { %v5244_v17 = vpop.eup %4195 }
 0x30a   : > { %v1860_v27 = vsel %vm1799_vm5, %v5244_v17, 0.0 }
 0x30b   : > { %1861 = vadd.xlane.f32.xlu0 %v1860_v27 }
 0x318   : > { %v1850_v23 = vpop.xlane.xlu0 %1849 }
 0x319   : > { %4197 = vrcp.f32 %v1850_v23  ;;  %v4229_v23 = vld [vmem:[%s5759_s20 + $0x50] sm:$0xff]  }
 0x31c   : > { %v1853_v28 = vpop.xlane.xlu1 %1852  ;;  %v1817_v32 = vpop.xlane.xlu0 %1816 }
 0x31d   : > { %4199 = vrcp.f32 %v1853_v28  ;;  %v1829_v50 = vsub.f32 %v1796_v40, %v1817_v32  ;;  %v4230_v28 = vld [vmem:[%s5759_s20 + $0x58] sm:$0xff]   ;;  %v4231_v32 = vld [vmem:[%s5759_s20 + $0x60] sm:$0xff]  }
 0x31f   : > { %v1842_v2 = vmul.f32 1.442695, %v1829_v50 }
 0x321   : > { %4201 = vpow2.f32 %v1842_v2 }
 0x323   : > { %v4198_v37 = vpop.eup %4197 }
 0x324   : > { %v1880_v55 = vmul.f32 %v4198_v37, %v4188_v45 }
 0x326   : > { %v1888_v7 = vpack.c.bf16 %v1880_v55, %v1880_v55 }
 0x327   : > { %v4200_v11 = vpop.eup %4199 }
 0x328   : > { %3787 = vmatmul.mubr.bf16.vlgmr.msra.gmra.mrb[20].mxu0 %v1888_v7  ;;  %v1881_v13 = vmul.f32 %v4200_v11, %v4190_v36  ;;  %v4228_v36 = vld [vmem:[%s5759_s20 + $0x48] sm:$0xff]   ;;  %v2871_v22 = vunpack.c.l.b16 %v1888_v7 }
 0x329   : > { %3791 = vmatpush3.bf16.msra.mxu0 %v4227_v15  ;;  %3806 = vmatprep.mubr.msk.bf16.mxu0 %vm4415_vm1, %v4414_v4  ;;  %v4232_v11 = vld [vmem:[%s5759_s20 + $0x68] sm:$0xff]   ;;  %v4233_v15 = vld [vmem:[%s5759_s20 + $0x70] sm:$0xff]  }
 0x32a   : > { %3792 = vmatprep.subr.bf16.mxu0 %v4414_v4  ;;  %v1889_v3 = vpack.c.bf16 %v1881_v13, %v1881_v13 }
 0x32b   : > { %v5254_v40 = vpop.eup %4201 }
 0x32c   : > { %v1863_v45 = vsel %vm1799_vm5, %v5254_v40, 0.0  ;;  %v2872_v19 = vunpack.c.l.b16 %v1889_v3 }
 0x32d   : > { %3793 = vmatpush3.bf16.msra.mxu0 %v4228_v36  ;;  %1864 = vadd.xlane.f32.xlu1 %v1863_v45 }
 0x32e   : > { %3794 = vmatprep.subr.bf16.mxu0 %v4414_v4  ;;  %v2879_v10 = vrot.slane %v2872_v19, 7 }
 0x330   : > { %v5263_v27 = vsel %vm2313_vm6, %v2879_v10, %v2871_v22 }
 0x331   : > { %3795 = vmatpush3.bf16.msra.mxu0 %v4229_v23 }
 0x332   : > { %3796 = vmatprep.subr.bf16.mxu0 %v4414_v4 }
 0x335   : > { %3797 = vmatpush3.bf16.msra.mxu0 %v4230_v28 }
 0x336   : > { %3798 = vmatprep.subr.bf16.mxu0 %v4414_v4 }
 0x339   : > { %3799 = vmatpush3.bf16.msra.mxu0 %v4231_v32 }
 0x33a   : > { %v1820_v50 = vpop.xlane.xlu0 %1819  ;;  %3800 = vmatprep.subr.bf16.mxu0 %v4414_v4 }
 0x33b   : > { %v1830_v2 = vsub.f32 %v5226_v60, %v1820_v50 }
 0x33c   : > { %v1823_v37 = vpop.xlane.xlu1 %1822 }
 0x33d   : > { %v1844_v55 = vmul.f32 1.442695, %v1830_v2  ;;  %v1831_v7 = vsub.f32 %v5232_v54, %v1823_v37  ;;  %3801 = vmatpush3.bf16.msra.mxu0 %v4232_v11 }
 0x33e   : > { %3802 = vmatprep.subr.bf16.mxu0 %v4414_v4 }
 0x33f   : > { %4203 = vpow2.f32 %v1844_v55  ;;  %v1846_v13 = vmul.f32 1.442695, %v1831_v7 }
 0x341   : > { %4205 = vpow2.f32 %v1846_v13  ;;  %3803 = vmatpush3.bf16.msra.mxu0 %v4233_v15 }
 0x342   : > { %3804 = vmatprep.subr.bf16.mxu0 %v4414_v4 }
 0x345   : > { %3805 = vmatpush3.bf16.msra.mxu0 %v4725_v38 }
 0x346   : > { %3830 = vmatprep.subr.bf16.mxu0 %v4414_v4 }
 0x348   : > { %3807 = vmatmul.mubr.bf16.vlgmr.msra.gmra.mrb[24].mxu0 %v1889_v3 }
 0x349   : > { %v5289_v60 = vpop.eup %4203  ;;  %3831 = vmatpush3.bf16.msra.mxu0 %v4745_v58  ;;  %3846 = vmatprep.mubr.msk.bf16.mxu0 %vm4415_vm1, %v4414_v4 }
 0x34a   : > { %v1866_v54 = vsel %vm1799_vm5, %v5289_v60, 0.0  ;;  %3832 = vmatprep.subr.bf16.mxu0 %v4414_v4 }
 0x34b   : > { %v5297_v45 = vpop.eup %4205  ;;  %1867 = vadd.xlane.f32.xlu0 %v1866_v54 }
 0x34c   : > { %v1869_v38 = vsel %vm1799_vm5, %v5297_v45, 0.0 }
 0x34d   : > { %1870 = vadd.xlane.f32.xlu1 %v1869_v38  ;;  %3833 = vmatpush3.bf16.msra.mxu0 %v4775_v5  ;;  %v4168_v38 = vld [vmem:[%s5769_s5 + $0x8] sm:$0xff]  }
 0x34e   : > { %3834 = vmatprep.subr.bf16.mxu0 %v4414_v4 }
 0x351   : > { %3835 = vmatpush3.bf16.msra.mxu0 %v4793_v12 }
 0x352   : > { %3836 = vmatprep.subr.bf16.mxu0 %v4414_v4 }
 0x355   : > { %3837 = vmatpush3.bf16.msra.mxu0 %v4809_v18 }
 0x356   : > { %3838 = vmatprep.subr.bf16.mxu0 %v4414_v4 }
 0x358   : > { %v1856_v58 = vpop.xlane.xlu0 %1855 }
 0x359   : > { %4207 = vrcp.f32 %v1856_v58  ;;  %3839 = vmatpush3.bf16.msra.mxu0 %v4825_v24 }
 0x35a   : > { %3840 = vmatprep.subr.bf16.mxu0 %v4414_v4 }
 0x35c   : > { %v1859_v3 = vpop.xlane.xlu1 %1858 }
 0x35d   : > { %4209 = vrcp.f32 %v1859_v3  ;;  %3841 = vmatpush3.bf16.msra.mxu0 %v4841_v29 }
 0x35e   : > { %3842 = vmatprep.subr.bf16.mxu0 %v4414_v4 }
 0x361   : > { %3843 = vmatpush3.bf16.msra.mxu0 %v4857_v33 }
 0x362   : > { %3844 = vmatprep.subr.bf16.mxu0 %v4414_v4 }
 0x363   : > { %v4208_v5 = vpop.eup %4207 }
 0x364   : > { %v1882_v12 = vmul.f32 %v4208_v5, %v5236_v9 }
 0x365   : > { %3845 = vmatpush3.bf16.msra.mxu0 %v4873_v39 }
 0x366   : > { %v1890_v18 = vpack.c.bf16 %v1882_v12, %v1882_v12  ;;  %3870 = vmatprep.subr.bf16.mxu0 %v4414_v4 }
 0x367   : > { %v4210_v24 = vpop.eup %4209 }
 0x368   : > { %3827 = vmatmul.mubr.bf16.vlgmr.msra.gmra.mrb[16].mxu1 %v1890_v18  ;;  %v2873_v19 = vunpack.c.l.b16 %v1890_v18  ;;  %v1883_v36 = vmul.f32 %v4210_v24, %v5240_v0 }
 0x369   : > { %3851 = vmatpush3.bf16.msra.mxu1 %v4885_v44  ;;  %3866 = vmatprep.mubr.msk.bf16.mxu1 %vm4415_vm1, %v4414_v4 }
 0x36a   : > { %v2881_v29 = vrot.slane %v2873_v19, 6  ;;  %v1891_v33 = vpack.c.bf16 %v1883_v36, %v1883_v36  ;;  %3852 = vmatprep.subr.bf16.mxu1 %v4414_v4  ;;  %v4169_v19 = vld [vmem:[%s5770_s6] sm:$0xff]  }
 0x36b   : > { %v4170_v36 = vld [vmem:[%s5715_s10] sm:$0xff]  }
 0x36c   : > { %3847 = vmatmul.mubr.bf16.vlgmr.msra.gmra.mrb[28].mxu0 %v1891_v33  ;;  %v2874_v39 = vunpack.c.l.b16 %v1891_v33  ;;  %v2882_v9 = vsel %vm2316_vm7, %v2881_v29, %v5263_v27  ;;  %v5771_v33 = vld [vmem:[#allocation22_spill] sm:$0xff] }
 0x36d   : > { %3853 = vmatpush3.bf16.msra.mxu1 %v4907_v51  ;;  %3871 = vmatpush3.bf16.msra.mxu0 %v4893_v46 }
 0x36e   : > { %v2883_v0 = vrot.slane %v2874_v39, 5  ;;  %3854 = vmatprep.subr.bf16.mxu1 %v4414_v4  ;;  %3872 = vmatprep.subr.bf16.mxu0 %v4414_v4 }
 0x36f   : > { %3886 = vmatprep.mubr.msk.bf16.mxu0 %vm4415_vm1, %v4414_v4 }
 0x370   : > { %v2884_v44 = vsel %vm2319_vm8, %v2883_v0, %v2882_v9 }
 0x371   : > { %3855 = vmatpush3.bf16.msra.mxu1 %v4929_v56  ;;  %3873 = vmatpush3.bf16.msra.mxu0 %v4918_v53 }
 0x372   : > { %3856 = vmatprep.subr.bf16.mxu1 %v4414_v4  ;;  %3874 = vmatprep.subr.bf16.mxu0 %v4414_v4 }
 0x375   : > { %3857 = vmatpush3.bf16.msra.mxu1 %v4945_v62  ;;  %3875 = vmatpush3.bf16.msra.mxu0 %v4935_v57 }
 0x376   : > { %3858 = vmatprep.subr.bf16.mxu1 %v4414_v4  ;;  %3876 = vmatprep.subr.bf16.mxu0 %v4414_v4 }
 0x379   : > { %3859 = vmatpush3.bf16.msra.mxu1 %v4961_v6  ;;  %3877 = vmatpush3.bf16.msra.mxu0 %v4951_v63 }
 0x37a   : > { %3860 = vmatprep.subr.bf16.mxu1 %v4414_v4  ;;  %3878 = vmatprep.subr.bf16.mxu0 %v4414_v4 }
 0x37d   : > { %3861 = vmatpush3.bf16.msra.mxu1 %v4977_v20  ;;  %3879 = vmatpush3.bf16.msra.mxu0 %v4967_v8 }
 0x37e   : > { %3862 = vmatprep.subr.bf16.mxu1 %v4414_v4  ;;  %3880 = vmatprep.subr.bf16.mxu0 %v4414_v4 }
 0x381   : > { %3863 = vmatpush3.bf16.msra.mxu1 %v4993_v30  ;;  %3881 = vmatpush3.bf16.msra.mxu0 %v4983_v21 }
 0x382   : > { %3864 = vmatprep.subr.bf16.mxu1 %v4414_v4  ;;  %3882 = vmatprep.subr.bf16.mxu0 %v4414_v4 }
 0x385   : > { %3865 = vmatpush3.bf16.msra.mxu1 %v5009_v41  ;;  %3883 = vmatpush3.bf16.msra.mxu0 %v4999_v31  ;;  %v5765_v41 = vld [vmem:[#allocation23_spill] sm:$0xff] }
 0x386   : > { %3884 = vmatprep.subr.bf16.mxu0 %v4414_v4  ;;  %3890 = vmatprep.subr.bf16.mxu1 %v4414_v4 }
 0x389   : > { %3885 = vmatpush3.bf16.msra.mxu0 %v5015_v42  ;;  %v5766_v42 = vld [vmem:[#allocation24_spill] sm:$0xff] }
 0x38a   : > { %3910 = vmatprep.subr.bf16.mxu0 %v4414_v4 }
 0x398   : > { %v1862_v46 = vpop.xlane.xlu0 %1861 }
 0x399   : > { %4211 = vrcp.f32 %v1862_v46 }
 0x3a3   : > { %v4212_v51 = vpop.eup %4211 }
 0x3a4   : > { %v1884_v53 = vmul.f32 %v4212_v51, %v5244_v17 }
 0x3a6   : > { %v1892_v56 = vpack.c.bf16 %v1884_v53, %v1884_v53 }
 0x3a8   : > { %3867 = vmatmul.mubr.bf16.vlgmr.msra.gmra.mrb[20].mxu1 %v1892_v56  ;;  %v2875_v57 = vunpack.c.l.b16 %v1892_v56  ;;  %v4171_v56 = vld [vmem:[%s5770_s6 + $0x8] sm:$0xff]  }
 0x3a9   : > { %3891 = vmatpush3.bf16.msra.mxu1 %v5025_v47  ;;  %3906 = vmatprep.mubr.msk.bf16.mxu1 %vm4415_vm1, %v4414_v4 }
 0x3aa   : > { %v2885_v62 = vrot.slane %v2875_v57, 4  ;;  %3892 = vmatprep.subr.bf16.mxu1 %v4414_v4  ;;  %v4172_v57 = vld [vmem:[%s5715_s10 + $0x8] sm:$0xff]  }
 0x3ac   : > { %v2886_v63 = vsel %vm2322_vm9, %v2885_v62, %v2884_v44 }
 0x3ad   : > { %3893 = vmatpush3.bf16.msra.mxu1 %v5049_v59  ;;  %v5767_v59 = vld [vmem:[#allocation25_spill] sm:$0xff] }
 0x3ae   : > { %3894 = vmatprep.subr.bf16.mxu1 %v4414_v4 }
 0x3b1   : > { %3895 = vmatpush3.bf16.msra.mxu1 %v5067_v14 }
 0x3b2   : > { %3896 = vmatprep.subr.bf16.mxu1 %v4414_v4 }
 0x3b5   : > { %3897 = vmatpush3.bf16.msra.mxu1 %v5083_v34 }
 0x3b6   : > { %3898 = vmatprep.subr.bf16.mxu1 %v4414_v4 }
 0x3b9   : > { %3899 = vmatpush3.bf16.msra.mxu1 %v5099_v49 }
 0x3ba   : > { %v1865_v6 = vpop.xlane.xlu1 %1864  ;;  %3900 = vmatprep.subr.bf16.mxu1 %v4414_v4 }
 0x3bb   : > { %4213 = vrcp.f32 %v1865_v6  ;;  %v664_v6 = vld [vmem:[#allocation3] sm:$0xff] }
 0x3bc   : > { %2517 = vrot.lane.b32.xlu1 %v664_v6, %s5739_s22 }
 0x3bd   : > { %3901 = vmatpush3.bf16.msra.mxu1 %v5115_v1 }
 0x3be   : > { %3902 = vmatprep.subr.bf16.mxu1 %v4414_v4 }
 0x3c1   : > { %3903 = vmatpush3.bf16.msra.mxu1 %v5131_v43 }
 0x3c2   : > { %3904 = vmatprep.subr.bf16.mxu1 %v4414_v4 }
 0x3c5   : > { %v4214_v8 = vpop.eup %4213  ;;  %3905 = vmatpush3.bf16.msra.mxu1 %v5147_v25 }
 0x3c6   : > { %v1885_v20 = vmul.f32 %v4214_v8, %v5254_v40  ;;  %3930 = vmatprep.subr.bf16.mxu1 %v4414_v4 }
 0x3c8   : > { %v1893_v21 = vpack.c.bf16 %v1885_v20, %v1885_v20 }
 0x3ca   : > { %3887 = vmatmul.mubr.bf16.vlgmr.msra.gmra.mrb[32].mxu0 %v1893_v21 }
 0x3cb   : > { %3911 = vmatpush3.bf16.msra.mxu0 %v5031_v48  ;;  %3926 = vmatprep.mubr.msk.bf16.mxu0 %vm4415_vm1, %v4414_v4  ;;  %v2876_v48 = vunpack.c.l.b16 %v1893_v21 }
 0x3cc   : > { %3912 = vmatprep.subr.bf16.mxu0 %v4414_v4 }
 0x3cf   : > { %3913 = vmatpush3.bf16.msra.mxu0 %v5057_v61 }
 0x3d0   : > { %3914 = vmatprep.subr.bf16.mxu0 %v4414_v4 }
 0x3d3   : > { %3915 = vmatpush3.bf16.msra.mxu0 %v5073_v16 }
 0x3d4   : > { %3916 = vmatprep.subr.bf16.mxu0 %v4414_v4 }
 0x3d7   : > { %3917 = vmatpush3.bf16.msra.mxu0 %v5089_v35  ;;  %v2887_v35 = vrot.slane %v2876_v48, 3 }
 0x3d8   : > { %v1868_v30 = vpop.xlane.xlu0 %1867  ;;  %3918 = vmatprep.subr.bf16.mxu0 %v4414_v4 }
 0x3d9   : > { %4215 = vrcp.f32 %v1868_v30  ;;  %v2888_v17 = vsel %vm2325_vm10, %v2887_v35, %v2886_v63 }
 0x3da   : > { %v1871_v31 = vpop.xlane.xlu1 %1870 }
 0x3db   : > { %4217 = vrcp.f32 %v1871_v31  ;;  %3919 = vmatpush3.bf16.msra.mxu0 %v5765_v41 }
 0x3dc   : > { %3920 = vmatprep.subr.bf16.mxu0 %v4414_v4 }
 0x3df   : > { %3921 = vmatpush3.bf16.msra.mxu0 %v5766_v42 }
 0x3e0   : > { %3922 = vmatprep.subr.bf16.mxu0 %v4414_v4 }
 0x3e3   : > { %v4216_v47 = vpop.eup %4215  ;;  %3923 = vmatpush3.bf16.msra.mxu0 %v5767_v59 }
 0x3e4   : > { %3924 = vmatprep.subr.bf16.mxu0 %v4414_v4  ;;  %v1886_v61 = vmul.f32 %v4216_v47, %v5289_v60 }
 0x3e5   : > { %v4218_v14 = vpop.eup %4217 }
 0x3e6   : > { %v1894_v16 = vpack.c.bf16 %v1886_v61, %v1886_v61  ;;  %v1887_v34 = vmul.f32 %v4218_v14, %v5297_v45  ;;  %v4167_v45 = vld [vmem:[%s5769_s5] sm:$0xff]  }
 0x3e7   : > { %3925 = vmatpush3.bf16.msra.mxu0 %v5153_v26 }
 0x3e8   : > { %3907 = vmatmul.mubr.bf16.vlgmr.msra.gmra.mrb[24].mxu1 %v1894_v16  ;;  %v2877_v49 = vunpack.c.l.b16 %v1894_v16  ;;  %v1895_v1 = vpack.c.bf16 %v1887_v34, %v1887_v34  ;;  %3938 = vmatprep.subr.bf16.mxu0 %v4414_v4 }
 0x3e9   : > { %3934 = vmatprep.mubr.msk.bf16.mxu1 %vm4415_vm1, %v4414_v4  ;;  %3931 = vmatpush3.bf16.msra.mxu1 %v4169_v19 }
 0x3ea   : > { %v2889_v43 = vrot.slane %v2877_v49, 2  ;;  %3927 = vmatmul.mubr.bf16.vlgmr.msra.gmra.mrb[36].mxu0 %v1895_v1  ;;  %v2878_v25 = vunpack.c.l.b16 %v1895_v1  ;;  %3932 = vmatprep.subr.bf16.mxu1 %v4414_v4 }
 0x3eb   : > { %3942 = vmatprep.mubr.msk.bf16.mxu0 %vm4415_vm1, %v4414_v4  ;;  %3939 = vmatpush3.bf16.msra.mxu0 %v4167_v45 }
 0x3ec   : > { %v2891_v26 = vrot.slane %v2878_v25, 1  ;;  %v2890_v40 = vsel %vm2328_vm11, %v2889_v43, %v2888_v17  ;;  %3940 = vmatprep.subr.bf16.mxu0 %v4414_v4 }
 0x3ed   : > { %3933 = vmatpush3.bf16.msra.mxu1 %v4171_v56 }
 0x3ee   : > { %v2892_v22 = vsel %vm2331_vm12, %v2891_v26, %v2890_v40  ;;  %3946 = vmatprep.subr.bf16.mxu1 %v4414_v4 }
 0x3ef   : > { %v2893_v10 = vpack.c.b16 %v2892_v22, %v2892_v22  ;;  %3941 = vmatpush3.bf16.msra.mxu0 %v4168_v38 }
 0x3f0   : > { %3954 = vmatprep.subr.bf16.mxu0 %v4414_v4 }
 0x3f1   : > { %2895 = vst [vmem:[%s5768_s29] sm:$0xf] %v2893_v10 }
 0x3f2   : > { %3943 = vmatmul.mubr.msk.bf16.vlgmr.msra.gmra.mrb[40].mxu0 %vm823_vm2, %v5771_v33 }
 0x3f3   : > { %3955 = vmatpush3.bf16.msra.mxu0 %v4170_v36  ;;  %3958 = vmatprep.mubr.msk.bf16.mxu0 %vm4415_vm1, %v4414_v4 }
 0x3f4   : > { %3956 = vmatprep.subr.bf16.mxu0 %v4414_v4 }
 0x3f7   : > { %3957 = vmatpush3.bf16.msra.mxu0 %v4172_v57 }
 0x3f8   : > { %3970 = vmatprep.subr.bf16.mxu0 %v4414_v4 }
 0x3fb   : > { %v1938_v27 = vpop.f32.mrb[20].mxu0 }
 0x3fc   : > { %v3788_v23 = vpop.f32.mrb[21].mxu0  ;;  %v2280_v2 = vpack.c.bf16 %v1938_v27, %v1938_v27 }
 0x3fd   : > { %v1941_v28 = vpop.f32.mrb[22].mxu0 }
 0x3fe   : > { %v3789_v32 = vpop.f32.mrb[23].mxu0  ;;  %v2304_v15 = vunpack.c.l.b16 %v2280_v2 }
 0x41b   : > { %v1986_v50 = vpop.f32.mrb[24].mxu0 }
 0x41c   : > { %v2281_v37 = vpack.c.bf16 %v1986_v50, %v1986_v50  ;;  %v3808_v55 = vpop.f32.mrb[25].mxu0 }
 0x41d   : > { %v1989_v7 = vpop.f32.mrb[26].mxu0 }
 0x41e   : > { %v2305_v11 = vunpack.c.l.b16 %v2281_v37  ;;  %v3809_v13 = vpop.f32.mrb[27].mxu0  ;;  %v4173_v7 = vld [vmem:[%s5712_s7] sm:$0xff]  }
 0x41f   : > { %v4174_v13 = vld [vmem:[%s5712_s7 + $0x8] sm:$0xff]  }
 0x420   : > { %v2312_v60 = vrot.slane %v2305_v11, 7 }
 0x422   : > { %v2314_v54 = vsel %vm2313_vm6, %v2312_v60, %v2304_v15  ;;  %v665_v15 = vld [vmem:[#allocation4] sm:$0xff] }
 0x423   : > { %v799_v60 = vpack.c.bf16 %v665_v15, %v665_v15  ;;  %v4186_v15 = vld [vmem:[%s5773_s24 + $0x38] sm:$0xff]  }
 0x43b   : > { %v2034_v58 = vpop.f32.mrb[16].mxu1 }
 0x43c   : > { %v2282_v3 = vpack.c.bf16 %v2034_v58, %v2034_v58  ;;  %v3828_v5 = vpop.f32.mrb[17].mxu1 }
 0x43d   : > { %v2037_v12 = vpop.f32.mrb[18].mxu1 }
 0x43e   : > { %v2306_v18 = vunpack.c.l.b16 %v2282_v3  ;;  %v3829_v24 = vpop.f32.mrb[19].mxu1 }
 0x43f   : > { %v2082_v29 = vpop.f32.mrb[28].mxu0 }
 0x440   : > { %v2315_v39 = vrot.slane %v2306_v18, 6  ;;  %v2283_v9 = vpack.c.bf16 %v2082_v29, %v2082_v29  ;;  %v3848_v0 = vpop.f32.mrb[29].mxu0 }
 0x441   : > { %v2085_v44 = vpop.f32.mrb[30].mxu0 }
 0x442   : > { %v2317_v46 = vsel %vm2316_vm7, %v2315_v39, %v2314_v54  ;;  %v2307_v51 = vunpack.c.l.b16 %v2283_v9  ;;  %v3849_v53 = vpop.f32.mrb[31].mxu0  ;;  %v3359_v9 = vld [vmem:[%s5713_s8] ss:$0 sm:$0xff] }
 0x444   : > { %v2318_v62 = vrot.slane %v2307_v51, 5 }
 0x446   : > { %v2320_v63 = vsel %vm2319_vm8, %v2318_v62, %v2317_v46 }
 0x47b   : > { %v2130_v8 = vpop.f32.mrb[20].mxu1 }
 0x47c   : > { %v2284_v20 = vpack.c.bf16 %v2130_v8, %v2130_v8  ;;  %v3868_v21 = vpop.f32.mrb[21].mxu1 }
 0x47d   : > { %v2133_v30 = vpop.f32.mrb[22].mxu1  ;;  %v2518_v21 = vpop.permute.xlu1 %2517 }
 0x47e   : > { %v2308_v31 = vunpack.c.l.b16 %v2284_v20  ;;  %v3869_v41 = vpop.f32.mrb[23].mxu1 }
 0x480   : > { %v2321_v42 = vrot.slane %v2308_v31, 4 }
 0x482   : > { %v2323_v47 = vsel %vm2322_vm9, %v2321_v42, %v2320_v63  ;;  %v4175_v42 = vld [vmem:[%s5714_s9] sm:$0xff]  }
 0x49d   : > { %v2178_v48 = vpop.f32.mrb[32].mxu0 }
 0x49e   : > { %v2285_v59 = vpack.c.bf16 %v2178_v48, %v2178_v48  ;;  %v3888_v61 = vpop.f32.mrb[33].mxu0  ;;  %v4177_v48 = vld [vmem:[%s5714_s9 + $0x8] sm:$0xff]  }
 0x49f   : > { %v2181_v14 = vpop.f32.mrb[34].mxu0 }
 0x4a0   : > { %v2309_v16 = vunpack.c.l.b16 %v2285_v59  ;;  %v3889_v34 = vpop.f32.mrb[35].mxu0  ;;  %v4178_v59 = vld [vmem:[%s5716_s11 + $0x8] sm:$0xff]  }
 0x4a2   : > { %v2324_v35 = vrot.slane %v2309_v16, 3 }
 0x4a4   : > { %v2326_v49 = vsel %vm2325_vm10, %v2324_v35, %v2323_v47  ;;  %v4176_v47 = vld [vmem:[%s5716_s11] sm:$0xff]  }
 0x4bb   : > { %v2226_v1 = vpop.f32.mrb[24].mxu1 }
 0x4bc   : > { %v2286_v43 = vpack.c.bf16 %v2226_v1, %v2226_v1  ;;  %v3908_v25 = vpop.f32.mrb[25].mxu1 }
 0x4bd   : > { %v2229_v17 = vpop.f32.mrb[26].mxu1  ;;  %v2274_v26 = vpop.f32.mrb[36].mxu0  ;;  %v4179_v25 = vld [vmem:[%s5773_s24] sm:$0xff]  }
 0x4be   : > { %v2310_v40 = vunpack.c.l.b16 %v2286_v43  ;;  %v2287_v22 = vpack.c.bf16 %v2274_v26, %v2274_v26  ;;  %v3909_v10 = vpop.f32.mrb[27].mxu1  ;;  %v3928_v27 = vpop.f32.mrb[37].mxu0  ;;  %v2782_v26 = vsel %vm823_vm2, %v4179_v25, 0 }
 0x4bf   : > { %v2277_v23 = vpop.f32.mrb[38].mxu0 }
 0x4c0   : > { %v2327_v28 = vrot.slane %v2310_v40, 2  ;;  %v2311_v32 = vunpack.c.l.b16 %v2287_v22  ;;  %v3929_v50 = vpop.f32.mrb[39].mxu0  ;;  %v4180_v22 = vld [vmem:[%s5773_s24 + $0x8] sm:$0xff]   ;;  %v4181_v23 = vld [vmem:[%s5773_s24 + $0x10] sm:$0xff]  }
 0x4c1   : > { %v2785_v27 = vsel %vm823_vm2, %v4180_v22, 0 }
 0x4c2   : > { %v2329_v2 = vsel %vm2328_vm11, %v2327_v28, %v2326_v49  ;;  %v2330_v37 = vrot.slane %v2311_v32, 1  ;;  %v2788_v28 = vsel %vm823_vm2, %v4181_v23, 0  ;;  %v4182_v32 = vld [vmem:[%s5773_s24 + $0x18] sm:$0xff]  }
 0x4c3   : > { %v2791_v50 = vsel %vm823_vm2, %v4182_v32, 0 }
 0x4c4   : > { %v2332_v55 = vsel %vm2331_vm12, %v2330_v37, %v2329_v2  ;;  %v4183_v2 = vld [vmem:[%s5773_s24 + $0x20] sm:$0xff]  }
 0x4c5   : > { %v2333_v11 = vpack.c.b16 %v2332_v55, %v2332_v55  ;;  %v2435_v54 = vpop.f32.mrb[40].mxu0  ;;  %v2794_v37 = vsel %vm823_vm2, %v4183_v2, 0  ;;  %v4184_v55 = vld [vmem:[%s5773_s24 + $0x28] sm:$0xff]  }
 0x4c6   : > { %v3944_v45 = vpop.f32.mrb[41].mxu0 }
 0x4c7   : > { %3935 = vmatmul.mubr.msk.bf16.vlgmr.msra.gmra.mrb[28].mxu1 %vm823_vm2, %v2333_v11  ;;  %3959 = vmatmul.mubr.msk.bf16.vlgmr.msra.gmra.mrb[44].mxu0 %vm823_vm2, %v2333_v11  ;;  %v2438_v38 = vpop.f32.mrb[42].mxu0  ;;  %v4185_v11 = vld [vmem:[%s5773_s24 + $0x30] sm:$0xff]   ;;  %s5774_s24 = scalar_lea.vmem [#allocation5], %s4590_s27 }
 0x4c8   : > { %3947 = vmatpush3.bf16.msra.mxu1 %v4173_v7  ;;  %3950 = vmatprep.mubr.msk.bf16.mxu1 %vm4415_vm1, %v4414_v4  ;;  %v3945_v58 = vpop.f32.mrb[43].mxu0  ;;  %v2797_v7 = vsel %vm823_vm2, %v4184_v55, 0 }
 0x4c9   : > { %3948 = vmatprep.subr.bf16.mxu1 %v4414_v4  ;;  %3974 = vmatprep.mubr.msk.bf16.mxu0 %vm4415_vm1, %v4414_v4  ;;  %v3370_v58 = vld [vmem:[%s5717_s12] ss:$0 sm:$0xff] }
 0x4ca   : > { %3971 = vmatpush3.bf16.msra.mxu0 %v4176_v47 }
 0x4cb   : > { %3972 = vmatprep.subr.bf16.mxu0 %v4414_v4 }
 0x4cc   : > { %3949 = vmatpush3.bf16.msra.mxu1 %v4174_v13  ;;  %v2800_v13 = vsel %vm823_vm2, %v4185_v11, 0 }
 0x4cd   : > { %3962 = vmatprep.subr.bf16.mxu1 %v4414_v4 }
 0x4ce   : > { %3973 = vmatpush3.bf16.msra.mxu0 %v4178_v59 }
 0x4cf   : > { %3951 = vmatmul.mubr.msk.bf16.vlgmr.msra.gmra.mrb[32].mxu1 %vm823_vm2, %v799_v60 }
 0x4d0   : > { %3966 = vmatprep.mubr.msk.bf16.mxu1 %vm4415_vm1, %v4414_v4  ;;  %3963 = vmatpush3.bf16.msra.mxu1 %v4175_v42 }
 0x4d1   : > { %3964 = vmatprep.subr.bf16.mxu1 %v4414_v4  ;;  %3975 = vmatmul.mubr.msk.bf16.vlgmr.msra.gmra.mrb[48].mxu0 %vm823_vm2, %v799_v60  ;;  %v2803_v60 = vsel %vm823_vm2, %v4186_v15, 0 }
 0x4d4   : > { %3965 = vmatpush3.bf16.msra.mxu1 %v4177_v48 }
 0x4d5   : > { %3978 = vmatprep.subr.bf16.mxu1 %v4414_v4 }
 0x59a   : > { %v2383_v3 = vpop.f32.mrb[28].mxu1  ;;  %v5459_v5 = vpop.f32.mrb[44].mxu0 }
 0x59b   : > { %v2436_v12 = vadd.f32 %v2435_v54, %v2383_v3  ;;  %v3936_v18 = vpop.f32.mrb[29].mxu1  ;;  %v3960_v24 = vpop.f32.mrb[45].mxu0 }
 0x59c   : > { %v2386_v19 = vpop.f32.mrb[30].mxu1  ;;  %v2595_v36 = vpop.f32.mrb[46].mxu0 }
 0x59d   : > { %v3937_v29 = vpop.f32.mrb[31].mxu1  ;;  %v3961_v33 = vpop.f32.mrb[47].mxu0 }
 0x5a2   : > { %v2494_v39 = vpop.f32.mrb[32].mxu1 }
 0x5a3   : > { %v2500_v0 = vadd.f32 %v2494_v39, %v2436_v12  ;;  %v3952_v44 = vpop.f32.mrb[33].mxu1 }
 0x5a4   : > { %v2497_v46 = vpop.f32.mrb[34].mxu1  ;;  %v2706_v35 = vpop.f32.mrb[48].mxu0 }
 0x5a5   : > { %v2508_v51 = vadd.f32 %v3359_v9, %v2500_v0  ;;  %v3953_v53 = vpop.f32.mrb[35].mxu1  ;;  %v3976_v49 = vpop.f32.mrb[49].mxu0 }
 0x5a6   : > { %v2709_v1 = vpop.f32.mrb[50].mxu0  ;;  %v4420_v53 = vmov (!%p3388_p12), 0.0  }
 0x5a7   : > { %4219 = vtanh.f32 %v2508_v51  ;;  %v3360_v57 = vmul.f32 -1.442695, %v2508_v51  ;;  %v3977_v43 = vpop.f32.mrb[51].mxu0  ;;  %v4234_v51 = vld [vmem:[%s5775_s21] sm:$0xff] (!%p3388_p12)   ;;  %3998 = vmatprep.subr.bf16.mxu0 (!%p3388_p12), %v4420_v53  ;;  %4014 = vmatprep.mubr.msk.bf16.mxu0 (!%p3388_p12), %vm4421_vm15, %v4420_v53 }
 0x5a8   : > { %3999 = vmatpush3.bf16.msra.mxu0 (!%p3388_p12), %v4234_v51 }
 0x5a9   : > { %4221 = vpow2.f32 %v3360_v57  ;;  %4000 = vmatprep.subr.bf16.mxu0 (!%p3388_p12), %v4420_v53  ;;  %v4236_v57 = vld [vmem:[%s5775_s21 + $0x10] sm:$0xff] (!%p3388_p12)  }
 0x5b1   : > { %v4220_v56 = vpop.eup %4219 }
 0x5b2   : > { %2522 = vrot.lane.b32.xlu0 %v4220_v56, %s4418_s26  ;;  %v4235_v56 = vld [vmem:[%s5775_s21 + $0x8] sm:$0xff] (!%p3388_p12)  }
 0x5b3   : > { %v4222_v62 = vpop.eup %4221  ;;  %4001 = vmatpush3.bf16.msra.mxu0 (!%p3388_p12), %v4235_v56 }
 0x5b4   : > { %v2512_v63 = vadd.f32 1.0, %v4222_v62  ;;  %4002 = vmatprep.subr.bf16.mxu0 (!%p3388_p12), %v4420_v53  ;;  %v4237_v62 = vld [vmem:[%s5775_s21 + $0x18] sm:$0xff] (!%p3388_p12)  }
 0x5b6   : > { %4223 = vrcp.f32 %v2512_v63  ;;  %v4238_v63 = vld [vmem:[%s5775_s21 + $0x20] sm:$0xff] (!%p3388_p12)  }
 0x5b7   : > { %4003 = vmatpush3.bf16.msra.mxu0 (!%p3388_p12), %v4236_v57 }
 0x5b8   : > { %4004 = vmatprep.subr.bf16.mxu0 (!%p3388_p12), %v4420_v53 }
 0x5bb   : > { %4005 = vmatpush3.bf16.msra.mxu0 (!%p3388_p12), %v4237_v62 }
 0x5bc   : > { %4006 = vmatprep.subr.bf16.mxu0 (!%p3388_p12), %v4420_v53 }
 0x5bf   : > { %4007 = vmatpush3.bf16.msra.mxu0 (!%p3388_p12), %v4238_v63 }
 0x5c0   : > { %v4224_v6 = vpop.eup %4223  ;;  %4008 = vmatprep.subr.bf16.mxu0 (!%p3388_p12), %v4420_v53 }
 0x5c1   : > { %v2520_v30 = vmul.f32 %v4224_v6, %v2518_v21 }
 0x624   : > { %v2523_v8 = vpop.permute.xlu0 %2522 }
 0x625   : > { %v2525_v20 = vmul.f32 %v4224_v6, %v2523_v8  ;;  %v4240_v8 = vld [vmem:[%s5775_s21 + $0x30] sm:$0xff] (!%p3388_p12)  }
 0x627   : > { %2527 = vrot.lane.b32.xlu1 %v2525_v20, %s5739_s22 }
 0x699   : > { %v2528_v31 = vpop.permute.xlu1 %2527 }
 0x69a   : > { %v2530_v41 = vadd.f32 %v2528_v31, %v2520_v30 }
 0x69c   : > { %4225 = vtanh.f32 %v2530_v41 }
 0x6a6   : > { %v4226_v61 = vpop.eup %4225 }
 0x6a7   : > { %2533 = vrot.lane.b32.xlu1 %v4226_v61, %s4418_s26 }
 0x719   : > { %v2534_v14 = vpop.permute.xlu1 %2533 }
 0x71a   : > { %v2536_v16 = vmul.f32 %v4224_v6, %v2534_v14  ;;  %v4239_v6 = vld [vmem:[%s5775_s21 + $0x28] sm:$0xff] (!%p3388_p12)   ;;  %v4422_v14 = vmov (!%p3388_p12), 1.0|1.0  }
 0x71b   : > { %4009 = vmatpush3.bf16.msra.mxu0 (!%p3388_p12), %v4239_v6 }
 0x71c   : > { %v2537_v34 = vpack.c.bf16 %v2536_v16, %v2536_v16  ;;  %2897 = vrot.lane.b32.xlu1 %v2536_v16, %s5772_s0  ;;  %4010 = vmatprep.subr.bf16.mxu0 (!%p3388_p12), %v4420_v53 }
 0x71e   : > { %2599 = vrot.lane.b32.xlu0 %v2537_v34, %s5772_s0 }
 0x71f   : > { %4011 = vmatpush3.bf16.msra.mxu0 (!%p3388_p12), %v4240_v8 }
 0x720   : > { %4012 = vmatprep.subr.bf16.mxu0 (!%p3388_p12), %v4420_v53 }
 0x722   : > { %2902 = vrot.lane.b32.xlu0 %v2530_v41, %s4419_s3  ;;  %v4241_v41 = vld [vmem:[%s5775_s21 + $0x38] sm:$0xff] (!%p3388_p12)  }
 0x723   : > { %4013 = vmatpush3.bf16.msra.mxu0 (!%p3388_p12), %v4241_v41 }
 0x78e   : > { %v5486_v17 = vpop.permute.xlu1 %2897 }
 0x78f   : > { %2900 = vst.msk [vmem:[#allocation2] sm:$0xff] %vm823_vm2, %v5486_v17 }
 0x790   : > { %v2600_v40 = vpop.permute.xlu0 %2599 }
 0x791   : > { %3967 = vmatmul.mubr.msk.bf16.vlgmr.msra.gmra.mrb[36].mxu1 %vm823_vm2, %v2600_v40 }
 0x792   : > { %3979 = vmatpush3.bf16.xpose.msra.mxu1 %v2782_v26  ;;  %3994 = vmatprep.mubr.msk.bf16.mxu1 %vm4415_vm1, %v4414_v4 }
 0x793   : > { %3980 = vmatprep.subr.bf16.mxu1 %v4414_v4 }
 0x794   : > { %v5498_v10 = vpop.permute.xlu0 %2902 }
 0x795   : > { %2905 = vst.msk [vmem:[#allocation3] sm:$0xff] %vm823_vm2, %v5498_v10 }
 0x79a   : > { %3981 = vmatpush3.bf16.xpose.msra.mxu1 %v2785_v27 }
 0x79b   : > { %3982 = vmatprep.subr.bf16.mxu1 %v4414_v4 }
 0x7a2   : > { %3983 = vmatpush3.bf16.xpose.msra.mxu1 %v2788_v28 }
 0x7a3   : > { %3984 = vmatprep.subr.bf16.mxu1 %v4414_v4 }
 0x7aa   : > { %3985 = vmatpush3.bf16.xpose.msra.mxu1 %v2791_v50 }
 0x7ab   : > { %3986 = vmatprep.subr.bf16.mxu1 %v4414_v4 }
 0x7b2   : > { %3987 = vmatpush3.bf16.xpose.msra.mxu1 %v2794_v37 }
 0x7b3   : > { %3988 = vmatprep.subr.bf16.mxu1 %v4414_v4 }
 0x7ba   : > { %3989 = vmatpush3.bf16.xpose.msra.mxu1 %v2797_v7 }
 0x7bb   : > { %3990 = vmatprep.subr.bf16.mxu1 %v4414_v4 }
 0x7c2   : > { %3991 = vmatpush3.bf16.xpose.msra.mxu1 %v2800_v13 }
 0x7c3   : > { %3992 = vmatprep.subr.bf16.mxu1 %v4414_v4 }
 0x7ca   : > { %3993 = vmatpush3.bf16.xpose.msra.mxu1 %v2803_v60 }
 0x864   : > { %v2650_v54 = vpop.f32.mrb[36].mxu1 }
 0x865   : > { %v2651_v45 = vadd.f32 %v2650_v54, %v5459_v5  ;;  %v3968_v38 = vpop.f32.mrb[37].mxu1 }
 0x866   : > { %v2653_v3 = vpop.f32.mrb[38].mxu1 }
 0x867   : > { %v2712_v12 = vadd.f32 %v2706_v35, %v2651_v45  ;;  %v3969_v18 = vpop.f32.mrb[39].mxu1 }
 0x869   : > { %v2720_v4 = vadd.f32 %v3370_v58, %v2712_v12 }
 0x86b   : > { %v2721_v24 = vpack.c.bf16 %v2720_v4, %v2720_v4 }
 0x86d   : > { %3995 = vmatmul.mubr.msk.bf16.vlgmr.msra.gmra.mrb[40].mxu1 %vm823_vm2, %v2721_v24 }
 0x93d   : > { %2909 = sbr.rel (%p3388_p12) target bundleno = 3025 (0xbd1), region = 88 }
 0x940   : > { %v2839_v19 = vpop.f32.mrb[40].mxu1 }
 0x941   : > { %v2845_v36 = vpack.c.bf16 %v2839_v19, %v2839_v19  ;;  %v3996_v29 = vpop.f32.mrb[41].mxu1  ;;  %v2910_v5 = vsel (!%p3388_p12), %vm797_vm3, %v2839_v19, -1e+30 }
 0x942   : > { %v2842_v33 = vpop.f32.mrb[42].mxu1  ;;  %2911 = vmax.xlane.f32.xlu0 (!%p3388_p12), %v2910_v5 }
 0x943   : > { %2846 = vst [vmem:[%s5774_s24] sm:$0xf] %v2845_v36  ;;  %v3997_v39 = vpop.f32.mrb[43].mxu1 }
 0x9cf   : > { %v2912_v9 = vpop.xlane.xlu0 %2911 }
 0x9d0   : > { %vm2913_vm13 = vcmp.eq.f32.partialorder %v2910_v5, %v2912_v9 }
 0x9d1   : > { %v2914_v0 = vsel %vm2913_vm13, %v4910_v52, 128 }
 0x9d2   : > { %v2916_v44 = vshra.s32 %v2914_v0, 16  ;;  %v2915_v20 = vand.u32 65535, %v2914_v0 }
 0x9d4   : > { %v2918_v46 = vcvt.s32.f32 %v2916_v44  ;;  %v2917_v30 = vcvt.s32.f32 %v2915_v20 }
 0x9d6   : > { %2919 = vmin.xlane.f32.xlu0 %v2918_v46 }
 0xa63   : > { %v2920_v21 = vpop.xlane.xlu0 %2919 }
 0xa64   : > { %vm2921_vm14 = vcmp.eq.f32.partialorder %v2918_v46, %v2920_v21  ;;  %v2926_v42 = vcvt.f32.s32 %v2920_v21 }
 0xa65   : > { %v2922_v31 = vsel %vm2921_vm14, %v2917_v30, inf }
 0xa66   : > { %2923 = vmin.xlane.f32.xlu1 %v2922_v31  ;;  %v2927_v48 = vshll.u32 %v2926_v42, 16 }
 0xaf3   : > { %v2924_v47 = vpop.xlane.xlu1 %2923 }
 0xaf4   : > { %v2925_v59 = vcvt.f32.s32 %v2924_v47 }
 0xaf6   : > { %v2928_v61 = vadd.s32 %v2927_v48, %v2925_v59 }
 0xaf8   : > { %vm2929_vm0 = vcmp.eq.s32.totalorder %v4910_v52, %v2928_v61 }
 0xaf9   : > { %vm3398_vm1 = vmpackc.low %vm2929_vm0, %vm2929_vm0 }
 0xafa   : > { %4015 = vmatmul.mubr.msk.bf16.vlgmr.msra.gmra.mrb[0].mxu0 %vm3398_vm1, %v4422_v14 }
 0xbcd   : > { %v3031_v16 = vpop.f32.mrb[0].mxu0 }
 0xbce   : > { %3037 = vst.msk [vmem:[#allocation4] sm:$0xff] %vm823_vm2, %v3031_v16  ;;  %v4016_v34 = vpop.f32.mrb[1].mxu0 }
 0xbcf   : > { %v3034_v35 = vpop.f32.mrb[2].mxu0 }
 0xbd0   : > { %v4017_v49 = vpop.f32.mrb[3].mxu0 }
 0xbd1 PF: > { %p3400_p13 = scmp.ne.s32.totalorder %s4404_s30, 5 }
 0xbd2   : > { %3042 = vst.msk [vmem:[#allocation9] sm:$0xff] (!%p3400_p13), %vm823_vm2, %v5486_v17  ;;  %3043 = vst.msk [vmem:[#allocation10] sm:$0xff] (!%p3400_p13), %vm823_vm2, %v5498_v10 }
 0xbd3   : > { %3041 = sbr.rel (%p3400_p13) target bundleno = 3034 (0xbda), region = 92 }
 0xbda PF: > { %s5776_s21 = sadd.s32 4294967295, %s4412_s19   ;;  %s3403_s1 = sshll.u32 %s4404_s30, 6 }
 0xbdb   : > { %s5577_s29 = sand.u32 1, %s5776_s21   ;;  %s5583_s3 = scalar_lea.hbm %s5721_s16, %s3403_s1 }
 0xbdc   : > { %s5777_s22 = scalar_lea.vmem [#allocation7], %s4590_s27  ;;  %s5592_s5 = scalar_lea.hbm %s5720_s15, %s3403_s1 }
 0xbdd   : > { %s3078_s26 = sshll.u32 %s5777_s22, 4  ;;  %s3050_s21 = scalar_lea.sflag [#allocation8], %s5577_s29  ;;  %s5587_s26 = int_to_ptr.vmem [resolvable:$true] %s3078_s26 }
 0xbde   : > { %s4242_s6 = scalar_lea.vmem %s5587_s26, 64  ;;  %s4423_s30 = smov [#allocation7]  }
 0xbdf   : > { %p4243_p0 = scmp.ne.s32.totalorder %s5587_s26, %s4242_s6  ;;  %s4246_s25 = sshll.u32 %s4423_s30, 4  ;;  %s4247_s25 = int_to_ptr.vmem [resolvable:$false] %s4246_s25 }
 0xbe0   : > { %s4248_s0 = scalar_lea.vmem %s4247_s25, 128  ;;  %p4249_p5 = scmp.lt.s32.totalorder %s5587_s26, %s4247_s25 }
 0xbe1   : > { %p4244_p1 = pnand %p4243_p0, %p4570_p4  ;;  %p4250_p6 = scmp.lt.s32.totalorder %s4248_s0, %s4242_s6 }
 0xbe3   : > { %p4245_p3 = pneg %p4244_p1  ;;  %p4251_p7 = por %p4250_p6, %p4249_p5 }
 0xbe5   : > { %p4252_p9 = pnand %p4251_p7, %p4245_p3 }
 0xbe7   : > { %4255 = shalt.err (!%p4252_p9)
}
 0xbe8   : > { %s4256_s4 = scalar_lea.hbm %s5583_s3, 64  ;;  %s4260_s22 = scalar_lea.hbm %s5721_s16, 384 }
 0xbe9   : > { %p4257_p10 = scmp.ne.s32.totalorder %s5583_s3, %s4256_s4  ;;  %p4261_p13 = scmp.lt.u32.totalorder %s5583_s3, %s5721_s16 }
 0xbea   : > { %p4262_p0 = scmp.lt.u32.totalorder %s4260_s22, %s4256_s4  ;;  %p4264_p3 = scmp.lt.u32.totalorder %s4256_s4, %s5583_s3 }
 0xbeb   : > { %p4258_p11 = pnand %p4257_p10, %p4570_p4 }
 0xbec   : > { %p4263_p1 = por %p4262_p0, %p4261_p13 }
 0xbed   : > { %p4259_p12 = pneg %p4258_p11 }
 0xbee   : > { %p4265_p5 = por %p4264_p3, %p4263_p1 }
 0xbf0   : > { %p4266_p6 = pnand %p4265_p5, %p4259_p12 }
 0xbf2   : > { %4269 = shalt.err (!%p4266_p6)
}
 0xbf3   : > { %4019 = dma.vmem_to_hbm [thread:$0]  (%p4570_p4), %s5587_s26, 64, %s5583_s3, %s3050_s21  }
 0xbf4   : > { %s5778_s6 = scalar_lea.vmem [#allocation5], %s4590_s27  ;;  %s5779_s0 = sand.u32 1, %s4396_s28  }
 0xbf5   : > { %s3064_s25 = sshll.u32 %s5778_s6, 4  ;;  %s3045_s29 = scalar_lea.sflag [#allocation6], %s5779_s0  ;;  %s3065_s25 = int_to_ptr.vmem [resolvable:$true] %s3064_s25 }
 0xbf6   : > { %s4270_s1 = scalar_lea.vmem %s3065_s25, 64  ;;  %s4424_s4 = smov [#allocation5]  }
 0xbf7   : > { %p4271_p7 = scmp.ne.s32.totalorder %s3065_s25, %s4270_s1  ;;  %s4274_s22 = sshll.u32 %s4424_s4, 4  ;;  %s4275_s22 = int_to_ptr.vmem [resolvable:$false] %s4274_s22 }
 0xbf8   : > { %s4276_s24 = scalar_lea.vmem %s4275_s22, 128  ;;  %p4277_p11 = scmp.lt.s32.totalorder %s3065_s25, %s4275_s22 }
 0xbf9   : > { %p4272_p9 = pnand %p4271_p7, %p4570_p4  ;;  %p4278_p12 = scmp.lt.s32.totalorder %s4276_s24, %s4270_s1 }
 0xbfb   : > { %p4273_p10 = pneg %p4272_p9  ;;  %p4279_p13 = por %p4278_p12, %p4277_p11 }
 0xbfd   : > { %p4280_p0 = pnand %p4279_p13, %p4273_p10 }
 0xbff   : > { %4283 = shalt.err (!%p4280_p0)
}
 0xc00   : > { %s4284_s27 = scalar_lea.hbm %s5592_s5, 64  ;;  %s4288_s21 = scalar_lea.hbm %s5720_s15, 384 }
 0xc01   : > { %p4285_p1 = scmp.ne.s32.totalorder %s5592_s5, %s4284_s27  ;;  %p4289_p6 = scmp.lt.u32.totalorder %s5592_s5, %s5720_s15 }
 0xc02   : > { %p4290_p7 = scmp.lt.u32.totalorder %s4288_s21, %s4284_s27  ;;  %p4292_p10 = scmp.lt.u32.totalorder %s4284_s27, %s5592_s5 }
 0xc03   : > { %p4286_p3 = pnand %p4285_p1, %p4570_p4 }
 0xc04   : > { %p4291_p9 = por %p4290_p7, %p4289_p6 }
 0xc05   : > { %p4287_p5 = pneg %p4286_p3 }
 0xc06   : > { %p4293_p11 = por %p4292_p10, %p4291_p9 }
 0xc08   : > { %p4294_p12 = pnand %p4293_p11, %p4287_p5 }
 0xc0a   : > { %4297 = shalt.err (!%p4294_p12)
}
 0xc0b   : > { %4018 = dma.vmem_to_hbm [thread:$0]  (%p4570_p4), %s3065_s25, 64, %s5592_s5, %s3045_s29  }
 0xc0c   : > { %s4425_s0 = smov [#allocation9]   ;;  %s4426_s4 = smov [#allocation10]  }
 0xc0d   : > { %s3091_s1 = sshll.u32 %s4425_s0, 4  ;;  %s3104_s22 = sshll.u32 %s4426_s4, 4  ;;  %s3092_s1 = int_to_ptr.vmem [resolvable:$true] %s3091_s1  ;;  %s3105_s22 = int_to_ptr.vmem [resolvable:$true] %s3104_s22 }
 0xc0e   : > { %s4298_s24 = scalar_lea.vmem %s3092_s1, 128  ;;  %p4305_p3 = scmp.lt.s32.totalorder %s3092_s1, %s3092_s1 }
 0xc0f   : > { %p4299_p13 = scmp.ne.s32.totalorder %s3092_s1, %s4298_s24  ;;  %p4306_p6 = scmp.lt.s32.totalorder %s4298_s24, %s4298_s24 }
 0xc11   : > { %p4300_p0 = pnand %p4299_p13, %p4560_p2  ;;  %p4307_p7 = por %p4306_p6, %p4305_p3 }
 0xc13   : > { %p4301_p1 = pneg %p4300_p0 }
 0xc15   : > { %p4308_p5 = pnand %p4307_p7, %p4301_p1 }
 0xc17   : > { %4311 = shalt.err (!%p4308_p5)
}
 0xc18   : > { %s4312_s5 = scalar_lea.hbm %s5722_s17, 128 }
 0xc19   : > { %p4313_p4 = scmp.ne.s32.totalorder %s5722_s17, %s4312_s5  ;;  %p4318_p11 = scmp.lt.u32.totalorder %s4312_s5, %s5722_s17 }
 0xc1b   : > { %p4314_p9 = pnand %p4313_p4, %p4560_p2 }
 0xc1d   : > { %p4315_p10 = pneg %p4314_p9 }
 0xc1f   : > { %p4320_p12 = pnand %p4318_p11, %p4315_p10 }
 0xc21   : > { %4323 = shalt.err (!%p4320_p12)
}
 0xc22   : > { %4021 = dma.vmem_to_hbm [thread:$0]  (%p4560_p2), %s3092_s1, 128, %s5722_s17, [#allocation8]  }
 0xc23   : > { %s4324_s6 = scalar_lea.vmem %s3105_s22, 128  ;;  %p4331_p3 = scmp.lt.s32.totalorder %s3105_s22, %s3105_s22 }
 0xc24   : > { %p4325_p13 = scmp.ne.s32.totalorder %s3105_s22, %s4324_s6  ;;  %p4332_p6 = scmp.lt.s32.totalorder %s4324_s6, %s4324_s6 }
 0xc26   : > { %p4326_p0 = pnand %p4325_p13, %p4560_p2  ;;  %p4333_p7 = por %p4332_p6, %p4331_p3 }
 0xc28   : > { %p4327_p1 = pneg %p4326_p0 }
 0xc2a   : > { %p4334_p5 = pnand %p4333_p7, %p4327_p1 }
 0xc2c   : > { %4337 = shalt.err (!%p4334_p5)
}
 0xc2d   : > { %s4338_s24 = scalar_lea.hbm %s5723_s18, 128 }
 0xc2e   : > { %p4339_p4 = scmp.ne.s32.totalorder %s5723_s18, %s4338_s24  ;;  %p4344_p11 = scmp.lt.u32.totalorder %s4338_s24, %s5723_s18 }
 0xc30   : > { %p4340_p9 = pnand %p4339_p4, %p4560_p2 }
 0xc32   : > { %p4341_p10 = pneg %p4340_p9 }
 0xc34   : > { %p4346_p12 = pnand %p4344_p11, %p4341_p10 }
 0xc36   : > { %4349 = shalt.err (!%p4346_p12)
}
 0xc37   : > { %4023 = dma.vmem_to_hbm [thread:$0]  (%p4560_p2), %s3105_s22, 128, %s5723_s18, [#allocation11]  }
 0xc38   : > { %4375 = dma.done.wait (%p4560_p2), [#allocation8], 128  }
 0xc39   : > { %4377 = vsyncadd (%p4560_p2), [#allocation8], 4294967168 }
 0xc3a   : > { %4379 = dma.done.wait (%p4560_p2), [#allocation11], 128  }
 0xc3b   : > { %4381 = vsyncadd (%p4560_p2), [#allocation11], 4294967168 }
 0xc3c PF: > { %s5780_s3 = sld [smem:[#allocation16_spill]]  ;;  %p4041_p13 = scmp.ge.s32.totalorder %s4412_s19, 2 }
 0xc3e   : > { %p4031_p0 = pnand %p4041_p13, %p4579_p8 }
 0xc42   : > { %s3124_s21 = sand.u32 1, %s5780_s3  }
 0xc43   : > { %s3125_s22 = scalar_lea.sflag [#allocation6], %s3124_s21 }
 0xc44   : > { %4383 = dma.done.wait (!%p4031_p0), %s3125_s22, 64  }
 0xc45   : > { %4385 = vsyncadd (!%p4031_p0), %s3125_s22, 4294967232  ;;  %s5782_s30 = sadd.s32 4294967294, %s4412_s19  }
 0xc46   : > { %s3133_s6 = sand.u32 1, %s5782_s30  }
 0xc47   : > { %s3134_s0 = scalar_lea.sflag [#allocation8], %s3133_s6 }
 0xc48   : > { %4387 = dma.done.wait (!%p4031_p0), %s3134_s0, 64  }
 0xc49   : > { %4389 = vsyncadd (!%p4031_p0), %s3134_s0, 4294967232  ;;  %s36_s19 = sadd.s32 1, %s4412_s19   ;;  %s5783_s2 = sld [smem:[#allocation17_spill]] }
 0xc4a   : > { %p33_p2 = scmp.ge.s32.totalorder %s36_s19, 8   ;;  %s5784_s29 = sld [smem:[#allocation21_spill]] }
 0xc4b   : > { %s5785_s30 = sld [smem:[#allocation18_spill]]  ;;  %s5786_s0 = sld [smem:[#allocation19_spill]] }
 0xc4c   : > { %s5787_s27 = smov %s4396_s28  ;;  %35 = sbr.rel (!%p33_p2) target bundleno = 15 (0xf), region = 168 }
 0xc4f   : > { %s5788_s28 = smov %s5783_s2 }
 0xc53   :  { %3139 = vsyncpa [#allocation6], 1 }
 0xc54   :  { %3141 = vsyncpa [#allocation6 + $0x1], 1 }
 0xc55   :  { %3142 = vsyncpa [#allocation8], 1 }
 0xc56   :  { %3144 = vsyncpa [#allocation8 + $0x1], 1 }
 0xc57   :  { %3145 = vsyncpa [#allocation11], 1 }

// kernel: tpu_custom_call.1
= control target key start
LH: loop header
LB: loop body
LE: loop exit
PB: predicated region body
PF: predicated region fallthrough
CT: control target
= control target key end

     0   :  { %s5705_s0 = inlined_call_operand.vmem [shape: bf16[8,128,32], index: 0, kind: input, shape index: {}]   ;;  %s5706_s1 = inlined_call_operand.vmem [shape: f32[1,32], index: 1, kind: input, shape index: {}]   ;;  %s5707_s2 = inlined_call_operand.vmem [shape: bf16[128,32], index: 2, kind: input, shape index: {}]   ;;  %s5708_s3 = inlined_call_operand.vmem [shape: bf16[32,32], index: 3, kind: input, shape index: {}]   ;;  %s5709_s4 = inlined_call_operand.vmem [shape: f32[1,32], index: 4, kind: input, shape index: {}]   ;;  %s5710_s5 = inlined_call_operand.vmem [shape: bf16[32,128], index: 5, kind: input, shape index: {}]   ;;  %s5711_s6 = inlined_call_operand.vmem [shape: bf16[32,128], index: 6, kind: input, shape index: {}]   ;;  %s5712_s7 = inlined_call_operand.vmem [shape: bf16[32,128], index: 7, kind: input, shape index: {}]   ;;  %s5713_s8 = inlined_call_operand.vmem [shape: f32[1,128], index: 8, kind: input, shape index: {}]   ;;  %s5714_s9 = inlined_call_operand.vmem [shape: bf16[32,32], index: 9, kind: input, shape index: {}]   ;;  %s5715_s10 = inlined_call_operand.vmem [shape: bf16[32,32], index: 10, kind: input, shape index: {}]   ;;  %s5716_s11 = inlined_call_operand.vmem [shape: bf16[32,32], index: 11, kind: input, shape index: {}]   ;;  %s5717_s12 = inlined_call_operand.vmem [shape: f32[1,32], index: 12, kind: input, shape index: {}]   ;;  %s5718_s13 = inlined_call_operand.vmem [shape: f32[8,32], index: 13, kind: input, shape index: {}]   ;;  %s5719_s14 = inlined_call_operand.vmem [shape: f32[8,32], index: 14, kind: input, shape index: {}]   ;;  %s5720_s15 = inlined_call_operand.hbm [shape: bf16[6,8,128], index: 15, kind: output, shape index: {0}]   ;;  %s5721_s16 = inlined_call_operand.hbm [shape: bf16[6,8,128], index: 16, kind: output, shape index: {1}]   ;;  %s5722_s17 = inlined_call_operand.hbm [shape: f32[8,32], index: 17, kind: output, shape index: {2}]   ;;  %s5723_s18 = inlined_call_operand.hbm [shape: f32[8,32], index: 18, kind: output, shape index: {3}]  }
   0x1   :  { %5741 = sst [smem:[#allocation26_spill]] %s5705_s0 }
   0x2   :  { %5742 = sst [smem:[#allocation27_spill]] %s5706_s1 }
   0x3   :  { %5743 = sst [smem:[#allocation28_spill]] %s5707_s2 }
   0x4   :  { %5744 = sst [smem:[#allocation29_spill]] %s5708_s3 }
   0x5   :  { %5745 = sst [smem:[#allocation30_spill]] %s5709_s4 }
   0x6   :  { %5746 = sst [smem:[#allocation31_spill]] %s5710_s5 }
   0x7   :  { %5747 = sst [smem:[#allocation32_spill]] %s5711_s6 }
   0x8   :  { %24 = vsyncpa [#allocation6], 0 }
   0x9   :  { %26 = vsyncpa [#allocation6 + $0x1], 0 }
   0xa   :  { %27 = vsyncpa [#allocation8], 0 }
   0xb   :  { %29 = vsyncpa [#allocation8 + $0x1], 0 }
   0xc   :  { %30 = vsyncpa [#allocation11], 0  ;;  %s4522_s27 = smov 0   ;;  %s4524_s28 = smov 0  }
   0xd   :  { %s4526_s29 = smov 0   ;;  %s4528_s30 = smov 0  }
   0xe   :  { %s4530_s0 = smov 0   ;;  %s4532_s19 = smov 0  }
   0xf LB: > { %5748 = sst [smem:[#allocation16_spill]] %s4392_s27  ;;  %s5727_s1 = sadd.s32 4294967295, %s4412_s19   ;;  %s4412_s19 = sphi %s4532_s19, %s36_s19   ;;  %s4408_s0 = sphi %s4530_s0, %s5786_s0   ;;  %s4404_s30 = sphi %s4528_s30, %s5785_s30   ;;  %s4400_s29 = sphi %s4526_s29, %s5784_s29   ;;  %s4396_s28 = sphi %s4524_s28, %s5788_s28   ;;  %s4392_s27 = sphi %s4522_s27, %s5787_s27  }
  0x10   : > { %5749 = sst [smem:[#allocation17_spill]] %s4400_s29  ;;  %s5729_s20 = sadd.s32 4294967294, %s4412_s19  }
  0x11   : > { %5750 = sst [smem:[#allocation18_spill]] %s4408_s0  ;;  %s45_s21 = sadd.s32 1, %s4408_s0 }
  0x12   : > { %s387_s22 = sadd.s32 1, %s4400_s29  ;;  %p46_p0 = scmp.ge.s32.totalorder %s45_s21, 6 }
  0x13   : > { %p397_p1 = scmp.ne.s32.totalorder %s4400_s29, %s4396_s28  ;;  %p4560_p2 = scmp.eq.s32.totalorder %s5727_s1, 5 }
  0x14   : > { %p403_p3 = scmp.ne.s32.totalorder %s4396_s28, %s4392_s27  ;;  %s5790_s21 = smov (%p46_p0, %s45_s21), 0 }
  0x15   : > { %5752 = sst [smem:[#allocation19_spill]] %s5790_s21  ;;  %p4570_p4 = por %p4560_p2, %p397_p1 }
  0x16   : > { %p404_p5 = scmp.eq.s32.totalorder %s5729_s20, 5  ;;  %s382_s24 = ssub.s32 %s4408_s0, %s5790_s21 }
  0x17   : > { %p3269_p6 = scmp.ge.s32.totalorder %s4412_s19, 1  ;;  %p385_p7 = scmp.eq.s32.totalorder %s382_s24, 0 }
  0x18   : > { %p4579_p8 = por %p404_p5, %p403_p3  ;;  %p562_p9 = scmp.lt.s32.totalorder %s4412_s19, 7 }
  0x19   : > { %s4585_s26 = scalar_select %p385_p7, %s4400_s29, %s387_s22  }
  0x1a   : > { %s5754_s25 = scalar_select %p4579_p8, 1, 0 }
  0x1b   : > { %5756 = sst [smem:[#allocation21_spill]] %s4585_s26  ;;  %p563_p10 = pnand %p3269_p6, %p562_p9 }
  0x1c   : > { %5755 = sst [smem:[#allocation20_spill]] %s5754_s25 }
  0x1d   : > { %566 = sbr.rel (%p563_p10) target bundleno = 3132 (0xc3c), region = 80 }
  0x24   : > { %s5734_s1 = sand.u32 1, %s4396_s28   ;;  %p3272_p11 = scmp.ne.s32.totalorder %s4404_s30, 0 }
  0x25   : > { %s4590_s27 = sshll.u32 %s5734_s1, 2  ;;  %v650_v0 = vld [vmem:[%s5718_s13] sm:$0xff] (!%p3272_p11)  ;;  %vm651_vm0 = vcmask (!%p3272_p11), 261120   ;;  %s5757_s1 = sld [smem:[#allocation27_spill]] (!%p3272_p11) }
  0x26   : > { %649 = sbr.rel (%p3272_p11) target bundleno = 45 (0x2d), region = 84  ;;  %v653_v1 = vld [vmem:[%s5719_s14] sm:$0xff] (!%p3272_p11)  ;;  %652 = vst.msk [vmem:[#allocation2] sm:$0xff] (!%p3272_p11), %vm651_vm0, %v650_v0 }
  0x27   : > { %654 = vst.msk [vmem:[#allocation3] sm:$0xff] (!%p3272_p11), %vm651_vm0, %v653_v1 }
  0x2b   : > { %v3273_v2 = vld [vmem:[%s5757_s1] ss:$0 sm:$0xff] (!%p3272_p11) }
  0x2c   : > { %662 = vst.msk [vmem:[#allocation4] sm:$0xff] (!%p3272_p11), %vm651_vm0, %v3273_v2 }
  0x2d PF: > { %s5758_s3 = sld [smem:[#allocation29_spill]]  ;;  %v4414_v4 = vmov 0.0   ;;  %vm4415_vm1 = vmmov 0   ;;  %v663_v6 = vld [vmem:[#allocation2] sm:$0xff]  ;;  %s5759_s20 = sld [smem:[#allocation26_spill]]  ;;  %vm823_vm2 = vcmask 261120   ;;  %v794_v40 = vlaneseq }
  0x2e   : > { %3602 = vmatprep.subr.bf16.mxu0 %v4414_v4  ;;  %3610 = vmatprep.subr.bf16.mxu1 %v4414_v4  ;;  %v4625_v9 = vpack.c.bf16 %v663_v6, %v663_v6  ;;  %v4416_v41 = vmov 1966171168   ;;  %s5761_s4 = sld [smem:[#allocation30_spill]]  ;;  %vm1799_vm5 = vcmask 1040384   ;;  %vm2313_vm6 = vcmask 1041409   ;;  %s5768_s29 = scalar_lea.vmem [#allocation7], %s4590_s27 }
  0x2f   : > { %3606 = vmatprep.mubr.msk.bf16.mxu0 %vm4415_vm1, %v4414_v4  ;;  %3626 = vmatprep.mubr.msk.bf16.mxu1 %vm4415_vm1, %v4414_v4  ;;  %v870_v42 = vunpack.c.l.s4 %v4416_v41  ;;  %v873_v44 = vshrl.u32 %v794_v40, 7  ;;  %vm2316_vm7 = vcmask 1042434   ;;  %vm2319_vm8 = vcmask 1043459   ;;  %s5769_s5 = sld [smem:[#allocation31_spill]]  ;;  %s5770_s6 = sld [smem:[#allocation32_spill]] }
  0x30   : > { %5760 = vst [vmem:[#allocation22_spill] sm:$0xff] %v4625_v9  ;;  %vm2322_vm9 = vcmask 1044484   ;;  %vm2325_vm10 = vcmask 1045509   ;;  %vm2328_vm11 = vcmask 1046534   ;;  %vm2331_vm12 = vcmask 1047559   ;;  %s5739_s22 = smov 32  }
  0x31   : > { %v871_v43 = vunpack.c.0.s8 %v870_v42  ;;  %s4418_s26 = smov 64   ;;  %s5772_s0 = smov 32  }
  0x32   : > { %s5773_s24 = sld [smem:[#allocation28_spill]]  ;;  %p3388_p12 = scmp.ge.s32.totalorder %s4404_s30, 5 }
  0x33   : > { %v4101_v3 = vld [vmem:[%s5758_s3] sm:$0xff]   ;;  %v4102_v5 = vld [vmem:[%s5758_s3 + $0x8] sm:$0xff]   ;;  %v4642_v13 = vld [vmem:[%s5759_s20 + $0x10] sm:$0xff]   ;;  %v874_v46 = vsub.s32 %v871_v43, %v873_v44  ;;  %s4419_s3 = smov 96   ;;  %s5775_s21 = sld [smem:[#allocation28_spill]] (!%p3388_p12)  ;;  %vm4421_vm15 = vmmov (!%p3388_p12), 0  }
  0x34   : > { %3603 = vmatpush3.bf16.msra.mxu0 %v4101_v3  ;;  %v4618_v7 = vld [vmem:[%s5759_s20] sm:$0xff]   ;;  %v4632_v11 = vld [vmem:[%s5759_s20 + $0x8] sm:$0xff]   ;;  %v4108_v14 = vld [vmem:[%s5759_s20 + $0x50] sm:$0xff]   ;;  %v983_v22 = vsel %vm823_vm2, %v4642_v13, 0 }
  0x35   : > { %3604 = vmatprep.subr.bf16.mxu0 %v4414_v4  ;;  %v4104_v8 = vld [vmem:[%s5759_s20 + $0x40] sm:$0xff]   ;;  %v977_v10 = vsel %vm823_vm2, %v4618_v7, 0  ;;  %v4106_v12 = vld [vmem:[%s5759_s20 + $0x48] sm:$0xff]   ;;  %v4652_v15 = vld [vmem:[%s5759_s20 + $0x18] sm:$0xff]   ;;  %v980_v18 = vsel %vm823_vm2, %v4632_v11, 0  ;;  %v1090_v24 = vsel %vm823_vm2, %v4108_v14, 0 }
  0x36   : > { %3611 = vmatpush3.bf16.xpose.msra.mxu1 %v977_v10  ;;  %v1084_v16 = vsel %vm823_vm2, %v4104_v8, 0  ;;  %v4110_v17 = vld [vmem:[%s5759_s20 + $0x58] sm:$0xff]   ;;  %v4665_v19 = vld [vmem:[%s5759_s20 + $0x20] sm:$0xff]   ;;  %v1087_v20 = vsel %vm823_vm2, %v4106_v12, 0  ;;  %v4676_v23 = vld [vmem:[%s5759_s20 + $0x28] sm:$0xff]   ;;  %v986_v26 = vsel %vm823_vm2, %v4652_v15, 0 }
  0x37   : > { %3612 = vmatprep.subr.bf16.mxu1 %v4414_v4  ;;  %v4112_v21 = vld [vmem:[%s5759_s20 + $0x60] sm:$0xff]   ;;  %v4114_v25 = vld [vmem:[%s5759_s20 + $0x68] sm:$0xff]   ;;  %v4688_v27 = vld [vmem:[%s5759_s20 + $0x30] sm:$0xff]   ;;  %v1093_v28 = vsel %vm823_vm2, %v4110_v17, 0  ;;  %v989_v29 = vsel %vm823_vm2, %v4665_v19, 0  ;;  %v992_v32 = vsel %vm823_vm2, %v4676_v23, 0 }
  0x38   : > { %3605 = vmatpush3.bf16.msra.mxu0 %v4102_v5  ;;  %v1096_v30 = vsel %vm823_vm2, %v4112_v21, 0  ;;  %v4116_v31 = vld [vmem:[%s5759_s20 + $0x70] sm:$0xff]   ;;  %v1099_v33 = vsel %vm823_vm2, %v4114_v25, 0  ;;  %v995_v34 = vsel %vm823_vm2, %v4688_v27, 0  ;;  %v4718_v36 = vld [vmem:[%s5759_s20 + $0x38] sm:$0xff]   ;;  %v4738_v54 = vld [vmem:[%s5759_s20 + $0x80] sm:$0xff]  }
  0x39   : > { %3630 = vmatprep.subr.bf16.mxu0 %v4414_v4  ;;  %v1102_v35 = vsel %vm823_vm2, %v4116_v31, 0  ;;  %v998_v37 = vsel %vm823_vm2, %v4718_v36, 0  ;;  %v4725_v38 = vld [vmem:[%s5759_s20 + $0x78] sm:$0xff]   ;;  %v3274_v45 = vld [vmem:[%s5761_s4] ss:$0 sm:$0xff]  ;;  %v1191_v63 = vsel %vm823_vm2, %v4738_v54, 0 }
  0x3a   : > { %v1105_v39 = vsel %vm823_vm2, %v4725_v38, 0  ;;  %v4745_v58 = vld [vmem:[%s5759_s20 + $0xc0] sm:$0xff]   ;;  %v4767_v3 = vld [vmem:[%s5759_s20 + $0x88] sm:$0xff]   ;;  %v4787_v10 = vld [vmem:[%s5759_s20 + $0x90] sm:$0xff]  }
  0x3b   : > { %3607 = vmatmul.mubr.msk.bf16.vlgmr.msra.gmra.mrb[0].mxu0 %vm823_vm2, %v4625_v9  ;;  %v1298_v2 = vsel %vm823_vm2, %v4745_v58, 0  ;;  %v4775_v5 = vld [vmem:[%s5759_s20 + $0xc8] sm:$0xff]   ;;  %v1194_v6 = vsel %vm823_vm2, %v4767_v3, 0  ;;  %v4793_v12 = vld [vmem:[%s5759_s20 + $0xd0] sm:$0xff]   ;;  %v1197_v14 = vsel %vm823_vm2, %v4787_v10, 0  ;;  %v4803_v17 = vld [vmem:[%s5759_s20 + $0x98] sm:$0xff]  }
  0x3c   : > { %3646 = vmatprep.mubr.msk.bf16.mxu0 %vm4415_vm1, %v4414_v4  ;;  %v1301_v8 = vsel %vm823_vm2, %v4775_v5, 0  ;;  %v4885_v44 = vld [vmem:[%s5759_s20 + $0x100] sm:$0xff]  }
  0x3e   : > { %3613 = vmatpush3.bf16.xpose.msra.mxu1 %v980_v18  ;;  %v4809_v18 = vld [vmem:[%s5759_s20 + $0xd8] sm:$0xff]  }
  0x3f   : > { %3614 = vmatprep.subr.bf16.mxu1 %v4414_v4  ;;  %v1307_v21 = vsel %vm823_vm2, %v4809_v18, 0 }
  0x41   : > { %3631 = vmatpush3.bf16.xpose.msra.mxu0 %v1084_v16  ;;  %v1304_v16 = vsel %vm823_vm2, %v4793_v12, 0 }
  0x42   : > { %3632 = vmatprep.subr.bf16.mxu0 %v4414_v4 }
  0x46   : > { %3615 = vmatpush3.bf16.xpose.msra.mxu1 %v983_v22  ;;  %v4819_v22 = vld [vmem:[%s5759_s20 + $0xa0] sm:$0xff]  }
  0x47   : > { %3616 = vmatprep.subr.bf16.mxu1 %v4414_v4  ;;  %v1203_v25 = vsel %vm823_vm2, %v4819_v22, 0 }
  0x49   : > { %3633 = vmatpush3.bf16.xpose.msra.mxu0 %v1087_v20  ;;  %v1200_v20 = vsel %vm823_vm2, %v4803_v17, 0 }
  0x4a   : > { %3634 = vmatprep.subr.bf16.mxu0 %v4414_v4 }
  0x4e   : > { %3617 = vmatpush3.bf16.xpose.msra.mxu1 %v986_v26 }
  0x4f   : > { %3618 = vmatprep.subr.bf16.mxu1 %v4414_v4 }
  0x51   : > { %3635 = vmatpush3.bf16.xpose.msra.mxu0 %v1090_v24  ;;  %v4825_v24 = vld [vmem:[%s5759_s20 + $0xe0] sm:$0xff]  }
  0x52   : > { %3636 = vmatprep.subr.bf16.mxu0 %v4414_v4  ;;  %v1310_v26 = vsel %vm823_vm2, %v4825_v24, 0 }
  0x56   : > { %3619 = vmatpush3.bf16.xpose.msra.mxu1 %v989_v29  ;;  %v4841_v29 = vld [vmem:[%s5759_s20 + $0xe8] sm:$0xff]  }
  0x57   : > { %3620 = vmatprep.subr.bf16.mxu1 %v4414_v4  ;;  %v1313_v31 = vsel %vm823_vm2, %v4841_v29, 0 }
  0x59   : > { %3637 = vmatpush3.bf16.xpose.msra.mxu0 %v1093_v28  ;;  %v4835_v28 = vld [vmem:[%s5759_s20 + $0xa8] sm:$0xff]  }
  0x5a   : > { %3638 = vmatprep.subr.bf16.mxu0 %v4414_v4 }
  0x5e   : > { %3621 = vmatpush3.bf16.xpose.msra.mxu1 %v992_v32  ;;  %v4851_v32 = vld [vmem:[%s5759_s20 + $0xb0] sm:$0xff]  }
  0x5f   : > { %3622 = vmatprep.subr.bf16.mxu1 %v4414_v4 }
  0x61   : > { %3639 = vmatpush3.bf16.xpose.msra.mxu0 %v1096_v30  ;;  %v1206_v30 = vsel %vm823_vm2, %v4835_v28, 0 }
  0x62   : > { %3640 = vmatprep.subr.bf16.mxu0 %v4414_v4 }
  0x66   : > { %3623 = vmatpush3.bf16.xpose.msra.mxu1 %v995_v34  ;;  %v1209_v34 = vsel %vm823_vm2, %v4851_v32, 0 }
  0x67   : > { %3624 = vmatprep.subr.bf16.mxu1 %v4414_v4 }
  0x69   : > { %3641 = vmatpush3.bf16.xpose.msra.mxu0 %v1099_v33  ;;  %v4857_v33 = vld [vmem:[%s5759_s20 + $0xf0] sm:$0xff]  }
  0x6a   : > { %3642 = vmatprep.subr.bf16.mxu0 %v4414_v4 }
  0x6e   : > { %3625 = vmatpush3.bf16.xpose.msra.mxu1 %v998_v37  ;;  %v4867_v37 = vld [vmem:[%s5759_s20 + $0xb8] sm:$0xff]  }
  0x6f   : > { %3650 = vmatprep.subr.bf16.mxu1 %v4414_v4  ;;  %v1212_v41 = vsel %vm823_vm2, %v4867_v37, 0 }
  0x71   : > { %3643 = vmatpush3.bf16.xpose.msra.mxu0 %v1102_v35  ;;  %v1316_v35 = vsel %vm823_vm2, %v4857_v33, 0 }
  0x72   : > { %3644 = vmatprep.subr.bf16.mxu0 %v4414_v4 }
  0x79   : > { %3645 = vmatpush3.bf16.xpose.msra.mxu0 %v1105_v39  ;;  %v4873_v39 = vld [vmem:[%s5759_s20 + $0xf8] sm:$0xff]  }
  0x7a   : > { %3670 = vmatprep.subr.bf16.mxu0 %v4414_v4  ;;  %v1319_v42 = vsel %vm823_vm2, %v4873_v39, 0 }
 0x10e   : > { %v861_v47 = vpop.f32.mrb[0].mxu0 }
 0x10f   : > { %v862_v48 = vadd.f32 %v3274_v45, %v861_v47  ;;  %v3608_v49 = vpop.f32.mrb[1].mxu0 }
 0x110   : > { %v864_v50 = vpop.f32.mrb[2].mxu0 }
 0x111   : > { %v868_v51 = vcombine.high %v862_v48, %v862_v48  ;;  %v875_v52 = vrot.slane %v862_v48, %v874_v46  ;;  %v3609_v53 = vpop.f32.mrb[3].mxu0  ;;  %v1405_v48 = vsel %vm823_vm2, %v4885_v44, 0 }
 0x112   : > { %v4918_v53 = vld [vmem:[%s5759_s20 + $0x148] sm:$0xff]  }
 0x113   : > { %v882_v55 = vrot.slane %v868_v51, %v874_v46  ;;  %v883_v56 = vcombine.high %v875_v52, %v875_v52  ;;  %v4740_v57 = vrot.slane %v875_v52, %v874_v46  ;;  %v4907_v51 = vld [vmem:[%s5759_s20 + $0x108] sm:$0xff]   ;;  %v4910_v52 = vand.u32 127, %v794_v40 }
 0x114   : > { %v1515_v40 = vsel %vm823_vm2, %v4918_v53, 0 }
 0x115   : > { %v884_v59 = vcombine.high %v882_v55, %v882_v55  ;;  %v4747_v60 = vrot.slane %v882_v55, %v874_v46  ;;  %v4749_v61 = vrot.slane %v883_v56, %v874_v46  ;;  %v925_v62 = vpack.c.bf16 %v4740_v57, %v4740_v57  ;;  %v4929_v56 = vld [vmem:[%s5759_s20 + $0x110] sm:$0xff]  }
 0x116   : > { %v913_v43 = vcombine.high %v4740_v57, %v4740_v57  ;;  %vm797_vm3 = vcmp.lt.s32.totalorder %v4910_v52, 64  ;;  %v1408_v55 = vsel %vm823_vm2, %v4907_v51, 0  ;;  %v4935_v57 = vld [vmem:[%s5759_s20 + $0x150] sm:$0xff]   ;;  %vm796_vm4 = vcmp.lt.s32.totalorder %v4910_v52, 8 }
 0x117   : > { %v4755_v0 = vrot.slane %v884_v59, %v874_v46  ;;  %v926_v1 = vpack.c.bf16 %v4749_v61, %v4749_v61  ;;  %3627 = vmatmul.mubr.msk.bf16.vlgmr.msra.gmra.mrb[0].mxu1 %vm823_vm2, %v925_v62  ;;  %v915_v45 = vcombine.high %v4749_v61, %v4749_v61  ;;  %v4893_v46 = vld [vmem:[%s5759_s20 + $0x140] sm:$0xff]   ;;  %v1411_v59 = vsel %vm823_vm2, %v4929_v56, 0  ;;  %v4945_v62 = vld [vmem:[%s5759_s20 + $0x118] sm:$0xff]  }
 0x118   : > { %3651 = vmatpush3.bf16.xpose.msra.mxu1 %v1191_v63  ;;  %3666 = vmatprep.mubr.msk.bf16.mxu1 %vm4415_vm1, %v4414_v4  ;;  %v927_v47 = vpack.c.bf16 %v913_v43, %v913_v43  ;;  %v1512_v50 = vsel %vm823_vm2, %v4893_v46, 0  ;;  %v1518_v61 = vsel %vm823_vm2, %v4935_v57, 0  ;;  %v4951_v63 = vld [vmem:[%s5759_s20 + $0x158] sm:$0xff]  }
 0x119   : > { %3647 = vmatmul.mubr.msk.bf16.vlgmr.msra.gmra.mrb[4].mxu0 %vm823_vm2, %v926_v1  ;;  %3652 = vmatprep.subr.bf16.mxu1 %v4414_v4  ;;  %v928_v49 = vpack.c.bf16 %v915_v45, %v915_v45  ;;  %v1414_v1 = vsel %vm823_vm2, %v4945_v62, 0 }
 0x11a   : > { %3671 = vmatpush3.bf16.xpose.msra.mxu0 %v1298_v2  ;;  %3686 = vmatprep.mubr.msk.bf16.mxu0 %vm4415_vm1, %v4414_v4  ;;  %v1521_v2 = vsel %vm823_vm2, %v4951_v63, 0 }
 0x11b   : > { %3672 = vmatprep.subr.bf16.mxu0 %v4414_v4 }
 0x120   : > { %3653 = vmatpush3.bf16.xpose.msra.mxu1 %v1194_v6  ;;  %v4961_v6 = vld [vmem:[%s5759_s20 + $0x120] sm:$0xff]  }
 0x121   : > { %3654 = vmatprep.subr.bf16.mxu1 %v4414_v4 }
 0x122   : > { %3673 = vmatpush3.bf16.xpose.msra.mxu0 %v1301_v8  ;;  %v4967_v8 = vld [vmem:[%s5759_s20 + $0x160] sm:$0xff]  }
 0x123   : > { %3674 = vmatprep.subr.bf16.mxu0 %v4414_v4 }
 0x128   : > { %3655 = vmatpush3.bf16.xpose.msra.mxu1 %v1197_v14  ;;  %v1417_v14 = vsel %vm823_vm2, %v4961_v6, 0 }
 0x129   : > { %3656 = vmatprep.subr.bf16.mxu1 %v4414_v4 }
 0x12a   : > { %3675 = vmatpush3.bf16.xpose.msra.mxu0 %v1304_v16  ;;  %v1524_v16 = vsel %vm823_vm2, %v4967_v8, 0 }
 0x12b   : > { %3676 = vmatprep.subr.bf16.mxu0 %v4414_v4 }
 0x130   : > { %3657 = vmatpush3.bf16.xpose.msra.mxu1 %v1200_v20  ;;  %v4977_v20 = vld [vmem:[%s5759_s20 + $0x128] sm:$0xff]  }
 0x131   : > { %3658 = vmatprep.subr.bf16.mxu1 %v4414_v4 }
 0x132   : > { %3677 = vmatpush3.bf16.xpose.msra.mxu0 %v1307_v21  ;;  %v4983_v21 = vld [vmem:[%s5759_s20 + $0x168] sm:$0xff]  }
 0x133   : > { %3678 = vmatprep.subr.bf16.mxu0 %v4414_v4 }
 0x138   : > { %3659 = vmatpush3.bf16.xpose.msra.mxu1 %v1203_v25  ;;  %v1420_v25 = vsel %vm823_vm2, %v4977_v20, 0 }
 0x139   : > { %3660 = vmatprep.subr.bf16.mxu1 %v4414_v4 }
 0x13a   : > { %3679 = vmatpush3.bf16.xpose.msra.mxu0 %v1310_v26  ;;  %v1527_v26 = vsel %vm823_vm2, %v4983_v21, 0 }
 0x13b   : > { %3680 = vmatprep.subr.bf16.mxu0 %v4414_v4 }
 0x140   : > { %3661 = vmatpush3.bf16.xpose.msra.mxu1 %v1206_v30  ;;  %v4993_v30 = vld [vmem:[%s5759_s20 + $0x130] sm:$0xff]  }
 0x141   : > { %3662 = vmatprep.subr.bf16.mxu1 %v4414_v4 }
 0x142   : > { %3681 = vmatpush3.bf16.xpose.msra.mxu0 %v1313_v31  ;;  %v4999_v31 = vld [vmem:[%s5759_s20 + $0x170] sm:$0xff]  }
 0x143   : > { %3682 = vmatprep.subr.bf16.mxu0 %v4414_v4 }
 0x148   : > { %3663 = vmatpush3.bf16.xpose.msra.mxu1 %v1209_v34  ;;  %v1423_v34 = vsel %vm823_vm2, %v4993_v30, 0 }
 0x149   : > { %3664 = vmatprep.subr.bf16.mxu1 %v4414_v4 }
 0x14a   : > { %3683 = vmatpush3.bf16.xpose.msra.mxu0 %v1316_v35  ;;  %v1530_v35 = vsel %vm823_vm2, %v4999_v31, 0 }
 0x14b   : > { %3684 = vmatprep.subr.bf16.mxu0 %v4414_v4 }
 0x150   : > { %3665 = vmatpush3.bf16.xpose.msra.mxu1 %v1212_v41  ;;  %v5009_v41 = vld [vmem:[%s5759_s20 + $0x138] sm:$0xff]  }
 0x151   : > { %3690 = vmatprep.subr.bf16.mxu1 %v4414_v4  ;;  %v1426_v43 = vsel %vm823_vm2, %v5009_v41, 0 }
 0x152   : > { %3685 = vmatpush3.bf16.xpose.msra.mxu0 %v1319_v42  ;;  %v5015_v42 = vld [vmem:[%s5759_s20 + $0x178] sm:$0xff]  }
 0x153   : > { %3710 = vmatprep.subr.bf16.mxu0 %v4414_v4  ;;  %v1533_v45 = vsel %vm823_vm2, %v5015_v42, 0 }
 0x157   : > { %3667 = vmatmul.mubr.msk.bf16.vlgmr.msra.gmra.mrb[4].mxu1 %vm823_vm2, %v927_v47  ;;  %v5025_v47 = vld [vmem:[%s5759_s20 + $0x180] sm:$0xff]  }
 0x158   : > { %3691 = vmatpush3.bf16.xpose.msra.mxu1 %v1405_v48  ;;  %3706 = vmatprep.mubr.msk.bf16.mxu1 %vm4415_vm1, %v4414_v4  ;;  %v5031_v48 = vld [vmem:[%s5759_s20 + $0x1c0] sm:$0xff]  }
 0x159   : > { %3687 = vmatmul.mubr.msk.bf16.vlgmr.msra.gmra.mrb[8].mxu0 %vm823_vm2, %v928_v49  ;;  %3692 = vmatprep.subr.bf16.mxu1 %v4414_v4  ;;  %v929_v49 = vpack.c.bf16 %v4747_v60, %v4747_v60 }
 0x15a   : > { %3711 = vmatpush3.bf16.xpose.msra.mxu0 %v1512_v50  ;;  %3726 = vmatprep.mubr.msk.bf16.mxu0 %vm4415_vm1, %v4414_v4  ;;  %v1619_v50 = vsel %vm823_vm2, %v5025_v47, 0 }
 0x15b   : > { %3712 = vmatprep.subr.bf16.mxu0 %v4414_v4 }
 0x160   : > { %3693 = vmatpush3.bf16.xpose.msra.mxu1 %v1408_v55  ;;  %v930_v55 = vpack.c.bf16 %v4755_v0, %v4755_v0 }
 0x161   : > { %3694 = vmatprep.subr.bf16.mxu1 %v4414_v4 }
 0x162   : > { %3713 = vmatpush3.bf16.xpose.msra.mxu0 %v1515_v40  ;;  %v1726_v40 = vsel %vm823_vm2, %v5031_v48, 0 }
 0x163   : > { %3714 = vmatprep.subr.bf16.mxu0 %v4414_v4 }
 0x168   : > { %3695 = vmatpush3.bf16.xpose.msra.mxu1 %v1411_v59  ;;  %v5049_v59 = vld [vmem:[%s5759_s20 + $0x188] sm:$0xff]  }
 0x169   : > { %3696 = vmatprep.subr.bf16.mxu1 %v4414_v4 }
 0x16a   : > { %3715 = vmatpush3.bf16.xpose.msra.mxu0 %v1518_v61  ;;  %v5057_v61 = vld [vmem:[%s5759_s20 + $0x1c8] sm:$0xff]  }
 0x16b   : > { %3716 = vmatprep.subr.bf16.mxu0 %v4414_v4 }
 0x170   : > { %3697 = vmatpush3.bf16.xpose.msra.mxu1 %v1414_v1  ;;  %v1622_v1 = vsel %vm823_vm2, %v5049_v59, 0 }
 0x171   : > { %3698 = vmatprep.subr.bf16.mxu1 %v4414_v4 }
 0x172   : > { %3717 = vmatpush3.bf16.xpose.msra.mxu0 %v1521_v2  ;;  %v1729_v2 = vsel %vm823_vm2, %v5057_v61, 0 }
 0x173   : > { %3718 = vmatprep.subr.bf16.mxu0 %v4414_v4 }
 0x178   : > { %3699 = vmatpush3.bf16.xpose.msra.mxu1 %v1417_v14  ;;  %v5067_v14 = vld [vmem:[%s5759_s20 + $0x190] sm:$0xff]  }
 0x179   : > { %3700 = vmatprep.subr.bf16.mxu1 %v4414_v4 }
 0x17a   : > { %3719 = vmatpush3.bf16.xpose.msra.mxu0 %v1524_v16  ;;  %v5073_v16 = vld [vmem:[%s5759_s20 + $0x1d0] sm:$0xff]  }
 0x17b   : > { %3720 = vmatprep.subr.bf16.mxu0 %v4414_v4 }
 0x180   : > { %3701 = vmatpush3.bf16.xpose.msra.mxu1 %v1420_v25  ;;  %v1625_v25 = vsel %vm823_vm2, %v5067_v14, 0 }
 0x181   : > { %3702 = vmatprep.subr.bf16.mxu1 %v4414_v4 }
 0x182   : > { %3721 = vmatpush3.bf16.xpose.msra.mxu0 %v1527_v26  ;;  %v1732_v26 = vsel %vm823_vm2, %v5073_v16, 0 }
 0x183   : > { %3722 = vmatprep.subr.bf16.mxu0 %v4414_v4 }
 0x188   : > { %3703 = vmatpush3.bf16.xpose.msra.mxu1 %v1423_v34  ;;  %v5083_v34 = vld [vmem:[%s5759_s20 + $0x198] sm:$0xff]  }
 0x189   : > { %3704 = vmatprep.subr.bf16.mxu1 %v4414_v4 }
 0x18a   : > { %3723 = vmatpush3.bf16.xpose.msra.mxu0 %v1530_v35  ;;  %v5089_v35 = vld [vmem:[%s5759_s20 + $0x1d8] sm:$0xff]  }
 0x18b   : > { %3724 = vmatprep.subr.bf16.mxu0 %v4414_v4 }
 0x190   : > { %3705 = vmatpush3.bf16.xpose.msra.mxu1 %v1426_v43  ;;  %v1628_v43 = vsel %vm823_vm2, %v5083_v34, 0 }
 0x191   : > { %3730 = vmatprep.subr.bf16.mxu1 %v4414_v4 }
 0x192   : > { %3725 = vmatpush3.bf16.xpose.msra.mxu0 %v1533_v45  ;;  %v1735_v45 = vsel %vm823_vm2, %v5089_v35, 0 }
 0x193   : > { %3750 = vmatprep.subr.bf16.mxu0 %v4414_v4 }
 0x197   : > { %3707 = vmatmul.mubr.msk.bf16.vlgmr.msra.gmra.mrb[8].mxu1 %vm823_vm2, %v929_v49  ;;  %v5099_v49 = vld [vmem:[%s5759_s20 + $0x1a0] sm:$0xff]  }
 0x198   : > { %3731 = vmatpush3.bf16.xpose.msra.mxu1 %v1619_v50  ;;  %3746 = vmatprep.mubr.msk.bf16.mxu1 %vm4415_vm1, %v4414_v4  ;;  %v5105_v50 = vld [vmem:[%s5759_s20 + $0x1e0] sm:$0xff]  }
 0x199   : > { %3727 = vmatmul.mubr.msk.bf16.vlgmr.msra.gmra.mrb[12].mxu0 %vm823_vm2, %v930_v55  ;;  %3732 = vmatprep.subr.bf16.mxu1 %v4414_v4  ;;  %5762 = vst [vmem:[#allocation23_spill] sm:$0xff] %v5105_v50  ;;  %v1631_v55 = vsel %vm823_vm2, %v5099_v49, 0 }
 0x19a   : > { %3751 = vmatpush3.bf16.xpose.msra.mxu0 %v1726_v40  ;;  %3766 = vmatprep.mubr.msk.bf16.mxu0 %vm4415_vm1, %v4414_v4  ;;  %v1738_v40 = vsel %vm823_vm2, %v5105_v50, 0 }
 0x19b   : > { %3752 = vmatprep.subr.bf16.mxu0 %v4414_v4 }
 0x1a0   : > { %3733 = vmatpush3.bf16.xpose.msra.mxu1 %v1622_v1  ;;  %v5115_v1 = vld [vmem:[%s5759_s20 + $0x1a8] sm:$0xff]  }
 0x1a1   : > { %3734 = vmatprep.subr.bf16.mxu1 %v4414_v4 }
 0x1a2   : > { %3753 = vmatpush3.bf16.xpose.msra.mxu0 %v1729_v2  ;;  %v5121_v2 = vld [vmem:[%s5759_s20 + $0x1e8] sm:$0xff]  }
 0x1a3   : > { %3754 = vmatprep.subr.bf16.mxu0 %v4414_v4  ;;  %5763 = vst [vmem:[#allocation24_spill] sm:$0xff] %v5121_v2 }
 0x1a8   : > { %3735 = vmatpush3.bf16.xpose.msra.mxu1 %v1625_v25  ;;  %v1634_v25 = vsel %vm823_vm2, %v5115_v1, 0 }
 0x1a9   : > { %3736 = vmatprep.subr.bf16.mxu1 %v4414_v4 }
 0x1aa   : > { %3755 = vmatpush3.bf16.xpose.msra.mxu0 %v1732_v26  ;;  %v1741_v26 = vsel %vm823_vm2, %v5121_v2, 0 }
 0x1ab   : > { %3756 = vmatprep.subr.bf16.mxu0 %v4414_v4 }
 0x1b0   : > { %3737 = vmatpush3.bf16.xpose.msra.mxu1 %v1628_v43  ;;  %v5131_v43 = vld [vmem:[%s5759_s20 + $0x1b0] sm:$0xff]  }
 0x1b1   : > { %3738 = vmatprep.subr.bf16.mxu1 %v4414_v4 }
 0x1b2   : > { %3757 = vmatpush3.bf16.xpose.msra.mxu0 %v1735_v45  ;;  %v5137_v45 = vld [vmem:[%s5759_s20 + $0x1f0] sm:$0xff]  }
 0x1b3   : > { %3758 = vmatprep.subr.bf16.mxu0 %v4414_v4  ;;  %5764 = vst [vmem:[#allocation25_spill] sm:$0xff] %v5137_v45 }
 0x1b8   : > { %3739 = vmatpush3.bf16.xpose.msra.mxu1 %v1631_v55  ;;  %v1637_v55 = vsel %vm823_vm2, %v5131_v43, 0 }
 0x1b9   : > { %3740 = vmatprep.subr.bf16.mxu1 %v4414_v4 }
 0x1ba   : > { %3759 = vmatpush3.bf16.xpose.msra.mxu0 %v1738_v40  ;;  %v1744_v40 = vsel %vm823_vm2, %v5137_v45, 0  ;;  %v914_v45 = vcombine.high %v4747_v60, %v4747_v60 }
 0x1bb   : > { %3760 = vmatprep.subr.bf16.mxu0 %v4414_v4 }
 0x1bc   : > { %v931_v2 = vpack.c.bf16 %v914_v45, %v914_v45 }
 0x1c0   : > { %3741 = vmatpush3.bf16.xpose.msra.mxu1 %v1634_v25  ;;  %v5147_v25 = vld [vmem:[%s5759_s20 + $0x1b8] sm:$0xff]  }
 0x1c1   : > { %3742 = vmatprep.subr.bf16.mxu1 %v4414_v4  ;;  %v1640_v9 = vsel %vm823_vm2, %v5147_v25, 0 }
 0x1c2   : > { %3761 = vmatpush3.bf16.xpose.msra.mxu0 %v1741_v26  ;;  %v5153_v26 = vld [vmem:[%s5759_s20 + $0x1f8] sm:$0xff]  }
 0x1c3   : > { %3762 = vmatprep.subr.bf16.mxu0 %v4414_v4 }
 0x1c8   : > { %3743 = vmatpush3.bf16.xpose.msra.mxu1 %v1637_v55  ;;  %v1747_v55 = vsel %vm823_vm2, %v5153_v26, 0 }
 0x1c9   : > { %3744 = vmatprep.subr.bf16.mxu1 %v4414_v4 }
 0x1ca   : > { %3763 = vmatpush3.bf16.xpose.msra.mxu0 %v1744_v40  ;;  %v916_v40 = vcombine.high %v4755_v0, %v4755_v0 }
 0x1cb   : > { %3764 = vmatprep.subr.bf16.mxu0 %v4414_v4 }
 0x1cc   : > { %v932_v50 = vpack.c.bf16 %v916_v40, %v916_v40 }
 0x1d0   : > { %3745 = vmatpush3.bf16.xpose.msra.mxu1 %v1640_v9 }
 0x1d1   : > { %3810 = vmatprep.subr.bf16.mxu1 %v4414_v4 }
 0x1d2   : > { %3765 = vmatpush3.bf16.xpose.msra.mxu0 %v1747_v55 }
 0x1d3   : > { %3770 = vmatprep.subr.bf16.mxu0 %v4414_v4 }
 0x1d7   : > { %3747 = vmatmul.mubr.msk.bf16.vlgmr.msra.gmra.mrb[12].mxu1 %vm823_vm2, %v931_v2 }
 0x1d8   : > { %3811 = vmatpush3.bf16.msra.mxu1 %v4738_v54  ;;  %3826 = vmatprep.mubr.msk.bf16.mxu1 %vm4415_vm1, %v4414_v4 }
 0x1d9   : > { %3767 = vmatmul.mubr.msk.bf16.vlgmr.msra.gmra.mrb[16].mxu0 %vm823_vm2, %v932_v50  ;;  %3812 = vmatprep.subr.bf16.mxu1 %v4414_v4 }
 0x1da   : > { %3771 = vmatpush3.bf16.msra.mxu0 %v4618_v7  ;;  %3786 = vmatprep.mubr.msk.bf16.mxu0 %vm4415_vm1, %v4414_v4 }
 0x1db   : > { %3772 = vmatprep.subr.bf16.mxu0 %v4414_v4 }
 0x1dc   : > { %3813 = vmatpush3.bf16.msra.mxu1 %v4767_v3 }
 0x1dd   : > { %3814 = vmatprep.subr.bf16.mxu1 %v4414_v4 }
 0x1de   : > { %3773 = vmatpush3.bf16.msra.mxu0 %v4632_v11 }
 0x1df   : > { %3774 = vmatprep.subr.bf16.mxu0 %v4414_v4 }
 0x1e0   : > { %3815 = vmatpush3.bf16.msra.mxu1 %v4787_v10 }
 0x1e1   : > { %3816 = vmatprep.subr.bf16.mxu1 %v4414_v4 }
 0x1e2   : > { %3775 = vmatpush3.bf16.msra.mxu0 %v4642_v13 }
 0x1e3   : > { %3776 = vmatprep.subr.bf16.mxu0 %v4414_v4 }
 0x1e4   : > { %3817 = vmatpush3.bf16.msra.mxu1 %v4803_v17 }
 0x1e5   : > { %3818 = vmatprep.subr.bf16.mxu1 %v4414_v4 }
 0x1e6   : > { %3777 = vmatpush3.bf16.msra.mxu0 %v4652_v15 }
 0x1e7   : > { %3778 = vmatprep.subr.bf16.mxu0 %v4414_v4 }
 0x1e8   : > { %3819 = vmatpush3.bf16.msra.mxu1 %v4819_v22 }
 0x1e9   : > { %3820 = vmatprep.subr.bf16.mxu1 %v4414_v4 }
 0x1ea   : > { %v1034_v7 = vpop.f32.mrb[0].mxu1  ;;  %3779 = vmatpush3.bf16.msra.mxu0 %v4665_v19 }
 0x1eb   : > { %v1791_v9 = vsel %vm796_vm4, %v1034_v7, -1e+30  ;;  %v3628_v11 = vpop.f32.mrb[1].mxu1  ;;  %3780 = vmatprep.subr.bf16.mxu0 %v4414_v4 }
 0x1ec   : > { %v1037_v13 = vpop.f32.mrb[2].mxu1  ;;  %v1141_v15 = vpop.f32.mrb[4].mxu0  ;;  %v1800_v54 = vsel %vm1799_vm5, %v1791_v9, -inf  ;;  %3821 = vmatpush3.bf16.msra.mxu1 %v4835_v28 }
 0x1ed   : > { %v1792_v60 = vsel %vm796_vm4, %v1141_v15, -1e+30  ;;  %1801 = vmax.xlane.f32.xlu0 %v1800_v54  ;;  %v3629_v0 = vpop.f32.mrb[3].mxu1  ;;  %v3648_v3 = vpop.f32.mrb[5].mxu0  ;;  %3822 = vmatprep.subr.bf16.mxu1 %v4414_v4 }
 0x1ee   : > { %v1144_v19 = vpop.f32.mrb[6].mxu0  ;;  %3781 = vmatpush3.bf16.msra.mxu0 %v4676_v23  ;;  %v1803_v17 = vsel %vm1799_vm5, %v1792_v60, -inf }
 0x1ef   : > { %v3649_v10 = vpop.f32.mrb[7].mxu0  ;;  %3782 = vmatprep.subr.bf16.mxu0 %v4414_v4 }
 0x1f0   : > { %3823 = vmatpush3.bf16.msra.mxu1 %v4851_v32 }
 0x1f1   : > { %1804 = vmax.xlane.f32.xlu0 %v1803_v17  ;;  %3824 = vmatprep.subr.bf16.mxu1 %v4414_v4 }
 0x1f2   : > { %3783 = vmatpush3.bf16.msra.mxu0 %v4688_v27 }
 0x1f3   : > { %3784 = vmatprep.subr.bf16.mxu0 %v4414_v4 }
 0x1f4   : > { %3825 = vmatpush3.bf16.msra.mxu1 %v4867_v37 }
 0x1f5   : > { %3850 = vmatprep.subr.bf16.mxu1 %v4414_v4 }
 0x1f6   : > { %3785 = vmatpush3.bf16.msra.mxu0 %v4718_v36 }
 0x1f7   : > { %3790 = vmatprep.subr.bf16.mxu0 %v4414_v4 }
 0x22a   : > { %v1248_v23 = vpop.f32.mrb[4].mxu1 }
 0x22b   : > { %v1793_v22 = vsel %vm796_vm4, %v1248_v23, -1e+30  ;;  %v3668_v28 = vpop.f32.mrb[5].mxu1 }
 0x22c   : > { %v1251_v32 = vpop.f32.mrb[6].mxu1  ;;  %v1355_v50 = vpop.f32.mrb[8].mxu0  ;;  %v1806_v2 = vsel %vm1799_vm5, %v1793_v22, -inf }
 0x22d   : > { %v1794_v27 = vsel %vm796_vm4, %v1355_v50, -1e+30  ;;  %1807 = vmax.xlane.f32.xlu1 %v1806_v2  ;;  %v3669_v37 = vpop.f32.mrb[7].mxu1  ;;  %v3688_v45 = vpop.f32.mrb[9].mxu0 }
 0x22e   : > { %v1358_v55 = vpop.f32.mrb[10].mxu0  ;;  %v1809_v36 = vsel %vm1799_vm5, %v1794_v27, -inf }
 0x22f   : > { %v3689_v40 = vpop.f32.mrb[11].mxu0 }
 0x231   : > { %1810 = vmax.xlane.f32.xlu1 %v1809_v36 }
 0x26a   : > { %v1462_v7 = vpop.f32.mrb[8].mxu1 }
 0x26b   : > { %v1795_v11 = vsel %vm796_vm4, %v1462_v7, -1e+30  ;;  %v3708_v13 = vpop.f32.mrb[9].mxu1 }
 0x26c   : > { %v1465_v15 = vpop.f32.mrb[10].mxu1  ;;  %v1569_v54 = vpop.f32.mrb[12].mxu0  ;;  %v1812_v0 = vsel %vm1799_vm5, %v1795_v11, -inf }
 0x26d   : > { %v3709_v3 = vpop.f32.mrb[11].mxu1  ;;  %1813 = vmax.xlane.f32.xlu1 %v1812_v0  ;;  %v3728_v19 = vpop.f32.mrb[13].mxu0  ;;  %v1796_v40 = vsel %vm796_vm4, %v1569_v54, -1e+30 }
 0x26e   : > { %v1572_v10 = vpop.f32.mrb[14].mxu0  ;;  %v1815_v13 = vsel %vm1799_vm5, %v1796_v40, -inf }
 0x26f   : > { %v3729_v17 = vpop.f32.mrb[15].mxu0 }
 0x27a   : > { %v1802_v23 = vpop.xlane.xlu0 %1801 }
 0x27b   : > { %v1824_v28 = vsub.f32 %v1791_v9, %v1802_v23 }
 0x27d   : > { %v1832_v32 = vmul.f32 1.442695, %v1824_v28 }
 0x27e   : > { %v1805_v50 = vpop.xlane.xlu0 %1804 }
 0x27f   : > { %4187 = vpow2.f32 %v1832_v32  ;;  %v1825_v2 = vsub.f32 %v1792_v60, %v1805_v50 }
 0x281   : > { %v1834_v37 = vmul.f32 1.442695, %v1825_v2 }
 0x283   : > { %4189 = vpow2.f32 %v1834_v37 }
 0x289   : > { %v4188_v45 = vpop.eup %4187 }
 0x28a   : > { %v1848_v55 = vsel %vm1799_vm5, %v4188_v45, 0.0 }
 0x28b   : > { %1849 = vadd.xlane.f32.xlu0 %v1848_v55 }
 0x28d   : > { %v4190_v36 = vpop.eup %4189 }
 0x28e   : > { %v1851_v7 = vsel %vm1799_vm5, %v4190_v36, 0.0 }
 0x28f   : > { %1852 = vadd.xlane.f32.xlu1 %v1851_v7  ;;  %1816 = vmax.xlane.f32.xlu0 %v1815_v13 }
 0x2aa   : > { %v1676_v9 = vpop.f32.mrb[12].mxu1 }
 0x2ab   : > { %v5226_v60 = vsel %vm796_vm4, %v1676_v9, -1e+30  ;;  %v3748_v15 = vpop.f32.mrb[13].mxu1 }
 0x2ac   : > { %v1679_v0 = vpop.f32.mrb[14].mxu1  ;;  %v1783_v3 = vpop.f32.mrb[16].mxu0  ;;  %v1818_v19 = vsel %vm1799_vm5, %v5226_v60, -inf }
 0x2ad   : > { %v5232_v54 = vsel %vm796_vm4, %v1783_v3, -1e+30  ;;  %v3749_v10 = vpop.f32.mrb[15].mxu1  ;;  %1819 = vmax.xlane.f32.xlu0 %v1818_v19  ;;  %v3768_v17 = vpop.f32.mrb[17].mxu0 }
 0x2ae   : > { %v1786_v23 = vpop.f32.mrb[18].mxu0  ;;  %v1821_v28 = vsel %vm1799_vm5, %v5232_v54, -inf }
 0x2af   : > { %1822 = vmax.xlane.f32.xlu1 %v1821_v28  ;;  %v3769_v32 = vpop.f32.mrb[19].mxu0 }
 0x2ba   : > { %v1808_v50 = vpop.xlane.xlu1 %1807 }
 0x2bb   : > { %v1826_v2 = vsub.f32 %v1793_v22, %v1808_v50 }
 0x2bd   : > { %v1836_v37 = vmul.f32 1.442695, %v1826_v2 }
 0x2be   : > { %v1811_v55 = vpop.xlane.xlu1 %1810 }
 0x2bf   : > { %4191 = vpow2.f32 %v1836_v37  ;;  %v1827_v7 = vsub.f32 %v1794_v27, %v1811_v55 }
 0x2c1   : > { %v1838_v13 = vmul.f32 1.442695, %v1827_v7 }
 0x2c3   : > { %4193 = vpow2.f32 %v1838_v13 }
 0x2c9   : > { %v5236_v9 = vpop.eup %4191 }
 0x2ca   : > { %v1854_v15 = vsel %vm1799_vm5, %v5236_v9, 0.0 }
 0x2cb   : > { %1855 = vadd.xlane.f32.xlu0 %v1854_v15  ;;  %v4227_v15 = vld [vmem:[%s5759_s20 + $0x40] sm:$0xff]  }
 0x2cd   : > { %v5240_v0 = vpop.eup %4193 }
 0x2ce   : > { %v1857_v3 = vsel %vm1799_vm5, %v5240_v0, 0.0 }
 0x2cf   : > { %1858 = vadd.xlane.f32.xlu1 %v1857_v3 }
 0x2fa   : > { %v1814_v19 = vpop.xlane.xlu1 %1813 }
 0x2fb   : > { %v1828_v22 = vsub.f32 %v1795_v11, %v1814_v19 }
 0x2fd   : > { %v1840_v10 = vmul.f32 1.442695, %v1828_v22 }
 0x2ff   : > { %4195 = vpow2.f32 %v1840_v10 }
 0x309   : > { %v5244_v17 = vpop.eup %4195 }
 0x30a   : > { %v1860_v27 = vsel %vm1799_vm5, %v5244_v17, 0.0 }
 0x30b   : > { %1861 = vadd.xlane.f32.xlu0 %v1860_v27 }
 0x318   : > { %v1850_v23 = vpop.xlane.xlu0 %1849 }
 0x319   : > { %4197 = vrcp.f32 %v1850_v23  ;;  %v4229_v23 = vld [vmem:[%s5759_s20 + $0x50] sm:$0xff]  }
 0x31c   : > { %v1853_v28 = vpop.xlane.xlu1 %1852  ;;  %v1817_v32 = vpop.xlane.xlu0 %1816 }
 0x31d   : > { %4199 = vrcp.f32 %v1853_v28  ;;  %v1829_v50 = vsub.f32 %v1796_v40, %v1817_v32  ;;  %v4230_v28 = vld [vmem:[%s5759_s20 + $0x58] sm:$0xff]   ;;  %v4231_v32 = vld [vmem:[%s5759_s20 + $0x60] sm:$0xff]  }
 0x31f   : > { %v1842_v2 = vmul.f32 1.442695, %v1829_v50 }
 0x321   : > { %4201 = vpow2.f32 %v1842_v2 }
 0x323   : > { %v4198_v37 = vpop.eup %4197 }
 0x324   : > { %v1880_v55 = vmul.f32 %v4198_v37, %v4188_v45 }
 0x326   : > { %v1888_v7 = vpack.c.bf16 %v1880_v55, %v1880_v55 }
 0x327   : > { %v4200_v11 = vpop.eup %4199 }
 0x328   : > { %3787 = vmatmul.mubr.bf16.vlgmr.msra.gmra.mrb[20].mxu0 %v1888_v7  ;;  %v1881_v13 = vmul.f32 %v4200_v11, %v4190_v36  ;;  %v4228_v36 = vld [vmem:[%s5759_s20 + $0x48] sm:$0xff]   ;;  %v2871_v22 = vunpack.c.l.b16 %v1888_v7 }
 0x329   : > { %3791 = vmatpush3.bf16.msra.mxu0 %v4227_v15  ;;  %3806 = vmatprep.mubr.msk.bf16.mxu0 %vm4415_vm1, %v4414_v4  ;;  %v4232_v11 = vld [vmem:[%s5759_s20 + $0x68] sm:$0xff]   ;;  %v4233_v15 = vld [vmem:[%s5759_s20 + $0x70] sm:$0xff]  }
 0x32a   : > { %3792 = vmatprep.subr.bf16.mxu0 %v4414_v4  ;;  %v1889_v3 = vpack.c.bf16 %v1881_v13, %v1881_v13 }
 0x32b   : > { %v5254_v40 = vpop.eup %4201 }
 0x32c   : > { %v1863_v45 = vsel %vm1799_vm5, %v5254_v40, 0.0  ;;  %v2872_v19 = vunpack.c.l.b16 %v1889_v3 }
 0x32d   : > { %3793 = vmatpush3.bf16.msra.mxu0 %v4228_v36  ;;  %1864 = vadd.xlane.f32.xlu1 %v1863_v45 }
 0x32e   : > { %3794 = vmatprep.subr.bf16.mxu0 %v4414_v4  ;;  %v2879_v10 = vrot.slane %v2872_v19, 7 }
 0x330   : > { %v5263_v27 = vsel %vm2313_vm6, %v2879_v10, %v2871_v22 }
 0x331   : > { %3795 = vmatpush3.bf16.msra.mxu0 %v4229_v23 }
 0x332   : > { %3796 = vmatprep.subr.bf16.mxu0 %v4414_v4 }
 0x335   : > { %3797 = vmatpush3.bf16.msra.mxu0 %v4230_v28 }
 0x336   : > { %3798 = vmatprep.subr.bf16.mxu0 %v4414_v4 }
 0x339   : > { %3799 = vmatpush3.bf16.msra.mxu0 %v4231_v32 }
 0x33a   : > { %v1820_v50 = vpop.xlane.xlu0 %1819  ;;  %3800 = vmatprep.subr.bf16.mxu0 %v4414_v4 }
 0x33b   : > { %v1830_v2 = vsub.f32 %v5226_v60, %v1820_v50 }
 0x33c   : > { %v1823_v37 = vpop.xlane.xlu1 %1822 }
 0x33d   : > { %v1844_v55 = vmul.f32 1.442695, %v1830_v2  ;;  %v1831_v7 = vsub.f32 %v5232_v54, %v1823_v37  ;;  %3801 = vmatpush3.bf16.msra.mxu0 %v4232_v11 }
 0x33e   : > { %3802 = vmatprep.subr.bf16.mxu0 %v4414_v4 }
 0x33f   : > { %4203 = vpow2.f32 %v1844_v55  ;;  %v1846_v13 = vmul.f32 1.442695, %v1831_v7 }
 0x341   : > { %4205 = vpow2.f32 %v1846_v13  ;;  %3803 = vmatpush3.bf16.msra.mxu0 %v4233_v15 }
 0x342   : > { %3804 = vmatprep.subr.bf16.mxu0 %v4414_v4 }
 0x345   : > { %3805 = vmatpush3.bf16.msra.mxu0 %v4725_v38 }
 0x346   : > { %3830 = vmatprep.subr.bf16.mxu0 %v4414_v4 }
 0x348   : > { %3807 = vmatmul.mubr.bf16.vlgmr.msra.gmra.mrb[24].mxu0 %v1889_v3 }
 0x349   : > { %v5289_v60 = vpop.eup %4203  ;;  %3831 = vmatpush3.bf16.msra.mxu0 %v4745_v58  ;;  %3846 = vmatprep.mubr.msk.bf16.mxu0 %vm4415_vm1, %v4414_v4 }
 0x34a   : > { %v1866_v54 = vsel %vm1799_vm5, %v5289_v60, 0.0  ;;  %3832 = vmatprep.subr.bf16.mxu0 %v4414_v4 }
 0x34b   : > { %v5297_v45 = vpop.eup %4205  ;;  %1867 = vadd.xlane.f32.xlu0 %v1866_v54 }
 0x34c   : > { %v1869_v38 = vsel %vm1799_vm5, %v5297_v45, 0.0 }
 0x34d   : > { %1870 = vadd.xlane.f32.xlu1 %v1869_v38  ;;  %3833 = vmatpush3.bf16.msra.mxu0 %v4775_v5  ;;  %v4168_v38 = vld [vmem:[%s5769_s5 + $0x8] sm:$0xff]  }
 0x34e   : > { %3834 = vmatprep.subr.bf16.mxu0 %v4414_v4 }
 0x351   : > { %3835 = vmatpush3.bf16.msra.mxu0 %v4793_v12 }
 0x352   : > { %3836 = vmatprep.subr.bf16.mxu0 %v4414_v4 }
 0x355   : > { %3837 = vmatpush3.bf16.msra.mxu0 %v4809_v18 }
 0x356   : > { %3838 = vmatprep.subr.bf16.mxu0 %v4414_v4 }
 0x358   : > { %v1856_v58 = vpop.xlane.xlu0 %1855 }
 0x359   : > { %4207 = vrcp.f32 %v1856_v58  ;;  %3839 = vmatpush3.bf16.msra.mxu0 %v4825_v24 }
 0x35a   : > { %3840 = vmatprep.subr.bf16.mxu0 %v4414_v4 }
 0x35c   : > { %v1859_v3 = vpop.xlane.xlu1 %1858 }
 0x35d   : > { %4209 = vrcp.f32 %v1859_v3  ;;  %3841 = vmatpush3.bf16.msra.mxu0 %v4841_v29 }
 0x35e   : > { %3842 = vmatprep.subr.bf16.mxu0 %v4414_v4 }
 0x361   : > { %3843 = vmatpush3.bf16.msra.mxu0 %v4857_v33 }
 0x362   : > { %3844 = vmatprep.subr.bf16.mxu0 %v4414_v4 }
 0x363   : > { %v4208_v5 = vpop.eup %4207 }
 0x364   : > { %v1882_v12 = vmul.f32 %v4208_v5, %v5236_v9 }
 0x365   : > { %3845 = vmatpush3.bf16.msra.mxu0 %v4873_v39 }
 0x366   : > { %v1890_v18 = vpack.c.bf16 %v1882_v12, %v1882_v12  ;;  %3870 = vmatprep.subr.bf16.mxu0 %v4414_v4 }
 0x367   : > { %v4210_v24 = vpop.eup %4209 }
 0x368   : > { %3827 = vmatmul.mubr.bf16.vlgmr.msra.gmra.mrb[16].mxu1 %v1890_v18  ;;  %v2873_v19 = vunpack.c.l.b16 %v1890_v18  ;;  %v1883_v36 = vmul.f32 %v4210_v24, %v5240_v0 }
 0x369   : > { %3851 = vmatpush3.bf16.msra.mxu1 %v4885_v44  ;;  %3866 = vmatprep.mubr.msk.bf16.mxu1 %vm4415_vm1, %v4414_v4 }
 0x36a   : > { %v2881_v29 = vrot.slane %v2873_v19, 6  ;;  %v1891_v33 = vpack.c.bf16 %v1883_v36, %v1883_v36  ;;  %3852 = vmatprep.subr.bf16.mxu1 %v4414_v4  ;;  %v4169_v19 = vld [vmem:[%s5770_s6] sm:$0xff]  }
 0x36b   : > { %v4170_v36 = vld [vmem:[%s5715_s10] sm:$0xff]  }
 0x36c   : > { %3847 = vmatmul.mubr.bf16.vlgmr.msra.gmra.mrb[28].mxu0 %v1891_v33  ;;  %v2874_v39 = vunpack.c.l.b16 %v1891_v33  ;;  %v2882_v9 = vsel %vm2316_vm7, %v2881_v29, %v5263_v27  ;;  %v5771_v33 = vld [vmem:[#allocation22_spill] sm:$0xff] }
 0x36d   : > { %3853 = vmatpush3.bf16.msra.mxu1 %v4907_v51  ;;  %3871 = vmatpush3.bf16.msra.mxu0 %v4893_v46 }
 0x36e   : > { %v2883_v0 = vrot.slane %v2874_v39, 5  ;;  %3854 = vmatprep.subr.bf16.mxu1 %v4414_v4  ;;  %3872 = vmatprep.subr.bf16.mxu0 %v4414_v4 }
 0x36f   : > { %3886 = vmatprep.mubr.msk.bf16.mxu0 %vm4415_vm1, %v4414_v4 }
 0x370   : > { %v2884_v44 = vsel %vm2319_vm8, %v2883_v0, %v2882_v9 }
 0x371   : > { %3855 = vmatpush3.bf16.msra.mxu1 %v4929_v56  ;;  %3873 = vmatpush3.bf16.msra.mxu0 %v4918_v53 }
 0x372   : > { %3856 = vmatprep.subr.bf16.mxu1 %v4414_v4  ;;  %3874 = vmatprep.subr.bf16.mxu0 %v4414_v4 }
 0x375   : > { %3857 = vmatpush3.bf16.msra.mxu1 %v4945_v62  ;;  %3875 = vmatpush3.bf16.msra.mxu0 %v4935_v57 }
 0x376   : > { %3858 = vmatprep.subr.bf16.mxu1 %v4414_v4  ;;  %3876 = vmatprep.subr.bf16.mxu0 %v4414_v4 }
 0x379   : > { %3859 = vmatpush3.bf16.msra.mxu1 %v4961_v6  ;;  %3877 = vmatpush3.bf16.msra.mxu0 %v4951_v63 }
 0x37a   : > { %3860 = vmatprep.subr.bf16.mxu1 %v4414_v4  ;;  %3878 = vmatprep.subr.bf16.mxu0 %v4414_v4 }
 0x37d   : > { %3861 = vmatpush3.bf16.msra.mxu1 %v4977_v20  ;;  %3879 = vmatpush3.bf16.msra.mxu0 %v4967_v8 }
 0x37e   : > { %3862 = vmatprep.subr.bf16.mxu1 %v4414_v4  ;;  %3880 = vmatprep.subr.bf16.mxu0 %v4414_v4 }
 0x381   : > { %3863 = vmatpush3.bf16.msra.mxu1 %v4993_v30  ;;  %3881 = vmatpush3.bf16.msra.mxu0 %v4983_v21 }
 0x382   : > { %3864 = vmatprep.subr.bf16.mxu1 %v4414_v4  ;;  %3882 = vmatprep.subr.bf16.mxu0 %v4414_v4 }
 0x385   : > { %3865 = vmatpush3.bf16.msra.mxu1 %v5009_v41  ;;  %3883 = vmatpush3.bf16.msra.mxu0 %v4999_v31  ;;  %v5765_v41 = vld [vmem:[#allocation23_spill] sm:$0xff] }
 0x386   : > { %3884 = vmatprep.subr.bf16.mxu0 %v4414_v4  ;;  %3890 = vmatprep.subr.bf16.mxu1 %v4414_v4 }
 0x389   : > { %3885 = vmatpush3.bf16.msra.mxu0 %v5015_v42  ;;  %v5766_v42 = vld [vmem:[#allocation24_spill] sm:$0xff] }
 0x38a   : > { %3910 = vmatprep.subr.bf16.mxu0 %v4414_v4 }
 0x398   : > { %v1862_v46 = vpop.xlane.xlu0 %1861 }
 0x399   : > { %4211 = vrcp.f32 %v1862_v46 }
 0x3a3   : > { %v4212_v51 = vpop.eup %4211 }
 0x3a4   : > { %v1884_v53 = vmul.f32 %v4212_v51, %v5244_v17 }
 0x3a6   : > { %v1892_v56 = vpack.c.bf16 %v1884_v53, %v1884_v53 }
 0x3a8   : > { %3867 = vmatmul.mubr.bf16.vlgmr.msra.gmra.mrb[20].mxu1 %v1892_v56  ;;  %v2875_v57 = vunpack.c.l.b16 %v1892_v56  ;;  %v4171_v56 = vld [vmem:[%s5770_s6 + $0x8] sm:$0xff]  }
 0x3a9   : > { %3891 = vmatpush3.bf16.msra.mxu1 %v5025_v47  ;;  %3906 = vmatprep.mubr.msk.bf16.mxu1 %vm4415_vm1, %v4414_v4 }
 0x3aa   : > { %v2885_v62 = vrot.slane %v2875_v57, 4  ;;  %3892 = vmatprep.subr.bf16.mxu1 %v4414_v4  ;;  %v4172_v57 = vld [vmem:[%s5715_s10 + $0x8] sm:$0xff]  }
 0x3ac   : > { %v2886_v63 = vsel %vm2322_vm9, %v2885_v62, %v2884_v44 }
 0x3ad   : > { %3893 = vmatpush3.bf16.msra.mxu1 %v5049_v59  ;;  %v5767_v59 = vld [vmem:[#allocation25_spill] sm:$0xff] }
 0x3ae   : > { %3894 = vmatprep.subr.bf16.mxu1 %v4414_v4 }
 0x3b1   : > { %3895 = vmatpush3.bf16.msra.mxu1 %v5067_v14 }
 0x3b2   : > { %3896 = vmatprep.subr.bf16.mxu1 %v4414_v4 }
 0x3b5   : > { %3897 = vmatpush3.bf16.msra.mxu1 %v5083_v34 }
 0x3b6   : > { %3898 = vmatprep.subr.bf16.mxu1 %v4414_v4 }
 0x3b9   : > { %3899 = vmatpush3.bf16.msra.mxu1 %v5099_v49 }
 0x3ba   : > { %v1865_v6 = vpop.xlane.xlu1 %1864  ;;  %3900 = vmatprep.subr.bf16.mxu1 %v4414_v4 }
 0x3bb   : > { %4213 = vrcp.f32 %v1865_v6  ;;  %v664_v6 = vld [vmem:[#allocation3] sm:$0xff] }
 0x3bc   : > { %2517 = vrot.lane.b32.xlu1 %v664_v6, %s5739_s22 }
 0x3bd   : > { %3901 = vmatpush3.bf16.msra.mxu1 %v5115_v1 }
 0x3be   : > { %3902 = vmatprep.subr.bf16.mxu1 %v4414_v4 }
 0x3c1   : > { %3903 = vmatpush3.bf16.msra.mxu1 %v5131_v43 }
 0x3c2   : > { %3904 = vmatprep.subr.bf16.mxu1 %v4414_v4 }
 0x3c5   : > { %v4214_v8 = vpop.eup %4213  ;;  %3905 = vmatpush3.bf16.msra.mxu1 %v5147_v25 }
 0x3c6   : > { %v1885_v20 = vmul.f32 %v4214_v8, %v5254_v40  ;;  %3930 = vmatprep.subr.bf16.mxu1 %v4414_v4 }
 0x3c8   : > { %v1893_v21 = vpack.c.bf16 %v1885_v20, %v1885_v20 }
 0x3ca   : > { %3887 = vmatmul.mubr.bf16.vlgmr.msra.gmra.mrb[32].mxu0 %v1893_v21 }
 0x3cb   : > { %3911 = vmatpush3.bf16.msra.mxu0 %v5031_v48  ;;  %3926 = vmatprep.mubr.msk.bf16.mxu0 %vm4415_vm1, %v4414_v4  ;;  %v2876_v48 = vunpack.c.l.b16 %v1893_v21 }
 0x3cc   : > { %3912 = vmatprep.subr.bf16.mxu0 %v4414_v4 }
 0x3cf   : > { %3913 = vmatpush3.bf16.msra.mxu0 %v5057_v61 }
 0x3d0   : > { %3914 = vmatprep.subr.bf16.mxu0 %v4414_v4 }
 0x3d3   : > { %3915 = vmatpush3.bf16.msra.mxu0 %v5073_v16 }
 0x3d4   : > { %3916 = vmatprep.subr.bf16.mxu0 %v4414_v4 }
 0x3d7   : > { %3917 = vmatpush3.bf16.msra.mxu0 %v5089_v35  ;;  %v2887_v35 = vrot.slane %v2876_v48, 3 }
 0x3d8   : > { %v1868_v30 = vpop.xlane.xlu0 %1867  ;;  %3918 = vmatprep.subr.bf16.mxu0 %v4414_v4 }
 0x3d9   : > { %4215 = vrcp.f32 %v1868_v30  ;;  %v2888_v17 = vsel %vm2325_vm10, %v2887_v35, %v2886_v63 }
 0x3da   : > { %v1871_v31 = vpop.xlane.xlu1 %1870 }
 0x3db   : > { %4217 = vrcp.f32 %v1871_v31  ;;  %3919 = vmatpush3.bf16.msra.mxu0 %v5765_v41 }
 0x3dc   : > { %3920 = vmatprep.subr.bf16.mxu0 %v4414_v4 }
 0x3df   : > { %3921 = vmatpush3.bf16.msra.mxu0 %v5766_v42 }
 0x3e0   : > { %3922 = vmatprep.subr.bf16.mxu0 %v4414_v4 }
 0x3e3   : > { %v4216_v47 = vpop.eup %4215  ;;  %3923 = vmatpush3.bf16.msra.mxu0 %v5767_v59 }
 0x3e4   : > { %3924 = vmatprep.subr.bf16.mxu0 %v4414_v4  ;;  %v1886_v61 = vmul.f32 %v4216_v47, %v5289_v60 }
 0x3e5   : > { %v4218_v14 = vpop.eup %4217 }
 0x3e6   : > { %v1894_v16 = vpack.c.bf16 %v1886_v61, %v1886_v61  ;;  %v1887_v34 = vmul.f32 %v4218_v14, %v5297_v45  ;;  %v4167_v45 = vld [vmem:[%s5769_s5] sm:$0xff]  }
 0x3e7   : > { %3925 = vmatpush3.bf16.msra.mxu0 %v5153_v26 }
 0x3e8   : > { %3907 = vmatmul.mubr.bf16.vlgmr.msra.gmra.mrb[24].mxu1 %v1894_v16  ;;  %v2877_v49 = vunpack.c.l.b16 %v1894_v16  ;;  %v1895_v1 = vpack.c.bf16 %v1887_v34, %v1887_v34  ;;  %3938 = vmatprep.subr.bf16.mxu0 %v4414_v4 }
 0x3e9   : > { %3934 = vmatprep.mubr.msk.bf16.mxu1 %vm4415_vm1, %v4414_v4  ;;  %3931 = vmatpush3.bf16.msra.mxu1 %v4169_v19 }
 0x3ea   : > { %v2889_v43 = vrot.slane %v2877_v49, 2  ;;  %3927 = vmatmul.mubr.bf16.vlgmr.msra.gmra.mrb[36].mxu0 %v1895_v1  ;;  %v2878_v25 = vunpack.c.l.b16 %v1895_v1  ;;  %3932 = vmatprep.subr.bf16.mxu1 %v4414_v4 }
 0x3eb   : > { %3942 = vmatprep.mubr.msk.bf16.mxu0 %vm4415_vm1, %v4414_v4  ;;  %3939 = vmatpush3.bf16.msra.mxu0 %v4167_v45 }
 0x3ec   : > { %v2891_v26 = vrot.slane %v2878_v25, 1  ;;  %v2890_v40 = vsel %vm2328_vm11, %v2889_v43, %v2888_v17  ;;  %3940 = vmatprep.subr.bf16.mxu0 %v4414_v4 }
 0x3ed   : > { %3933 = vmatpush3.bf16.msra.mxu1 %v4171_v56 }
 0x3ee   : > { %v2892_v22 = vsel %vm2331_vm12, %v2891_v26, %v2890_v40  ;;  %3946 = vmatprep.subr.bf16.mxu1 %v4414_v4 }
 0x3ef   : > { %v2893_v10 = vpack.c.b16 %v2892_v22, %v2892_v22  ;;  %3941 = vmatpush3.bf16.msra.mxu0 %v4168_v38 }
 0x3f0   : > { %3954 = vmatprep.subr.bf16.mxu0 %v4414_v4 }
 0x3f1   : > { %2895 = vst [vmem:[%s5768_s29] sm:$0xf] %v2893_v10 }
 0x3f2   : > { %3943 = vmatmul.mubr.msk.bf16.vlgmr.msra.gmra.mrb[40].mxu0 %vm823_vm2, %v5771_v33 }
 0x3f3   : > { %3955 = vmatpush3.bf16.msra.mxu0 %v4170_v36  ;;  %3958 = vmatprep.mubr.msk.bf16.mxu0 %vm4415_vm1, %v4414_v4 }
 0x3f4   : > { %3956 = vmatprep.subr.bf16.mxu0 %v4414_v4 }
 0x3f7   : > { %3957 = vmatpush3.bf16.msra.mxu0 %v4172_v57 }
 0x3f8   : > { %3970 = vmatprep.subr.bf16.mxu0 %v4414_v4 }
 0x3fb   : > { %v1938_v27 = vpop.f32.mrb[20].mxu0 }
 0x3fc   : > { %v3788_v23 = vpop.f32.mrb[21].mxu0  ;;  %v2280_v2 = vpack.c.bf16 %v1938_v27, %v1938_v27 }
 0x3fd   : > { %v1941_v28 = vpop.f32.mrb[22].mxu0 }
 0x3fe   : > { %v3789_v32 = vpop.f32.mrb[23].mxu0  ;;  %v2304_v15 = vunpack.c.l.b16 %v2280_v2 }
 0x41b   : > { %v1986_v50 = vpop.f32.mrb[24].mxu0 }
 0x41c   : > { %v2281_v37 = vpack.c.bf16 %v1986_v50, %v1986_v50  ;;  %v3808_v55 = vpop.f32.mrb[25].mxu0 }
 0x41d   : > { %v1989_v7 = vpop.f32.mrb[26].mxu0 }
 0x41e   : > { %v2305_v11 = vunpack.c.l.b16 %v2281_v37  ;;  %v3809_v13 = vpop.f32.mrb[27].mxu0  ;;  %v4173_v7 = vld [vmem:[%s5712_s7] sm:$0xff]  }
 0x41f   : > { %v4174_v13 = vld [vmem:[%s5712_s7 + $0x8] sm:$0xff]  }
 0x420   : > { %v2312_v60 = vrot.slane %v2305_v11, 7 }
 0x422   : > { %v2314_v54 = vsel %vm2313_vm6, %v2312_v60, %v2304_v15  ;;  %v665_v15 = vld [vmem:[#allocation4] sm:$0xff] }
 0x423   : > { %v799_v60 = vpack.c.bf16 %v665_v15, %v665_v15  ;;  %v4186_v15 = vld [vmem:[%s5773_s24 + $0x38] sm:$0xff]  }
 0x43b   : > { %v2034_v58 = vpop.f32.mrb[16].mxu1 }
 0x43c   : > { %v2282_v3 = vpack.c.bf16 %v2034_v58, %v2034_v58  ;;  %v3828_v5 = vpop.f32.mrb[17].mxu1 }
 0x43d   : > { %v2037_v12 = vpop.f32.mrb[18].mxu1 }
 0x43e   : > { %v2306_v18 = vunpack.c.l.b16 %v2282_v3  ;;  %v3829_v24 = vpop.f32.mrb[19].mxu1 }
 0x43f   : > { %v2082_v29 = vpop.f32.mrb[28].mxu0 }
 0x440   : > { %v2315_v39 = vrot.slane %v2306_v18, 6  ;;  %v2283_v9 = vpack.c.bf16 %v2082_v29, %v2082_v29  ;;  %v3848_v0 = vpop.f32.mrb[29].mxu0 }
 0x441   : > { %v2085_v44 = vpop.f32.mrb[30].mxu0 }
 0x442   : > { %v2317_v46 = vsel %vm2316_vm7, %v2315_v39, %v2314_v54  ;;  %v2307_v51 = vunpack.c.l.b16 %v2283_v9  ;;  %v3849_v53 = vpop.f32.mrb[31].mxu0  ;;  %v3359_v9 = vld [vmem:[%s5713_s8] ss:$0 sm:$0xff] }
 0x444   : > { %v2318_v62 = vrot.slane %v2307_v51, 5 }
 0x446   : > { %v2320_v63 = vsel %vm2319_vm8, %v2318_v62, %v2317_v46 }
 0x47b   : > { %v2130_v8 = vpop.f32.mrb[20].mxu1 }
 0x47c   : > { %v2284_v20 = vpack.c.bf16 %v2130_v8, %v2130_v8  ;;  %v3868_v21 = vpop.f32.mrb[21].mxu1 }
 0x47d   : > { %v2133_v30 = vpop.f32.mrb[22].mxu1  ;;  %v2518_v21 = vpop.permute.xlu1 %2517 }
 0x47e   : > { %v2308_v31 = vunpack.c.l.b16 %v2284_v20  ;;  %v3869_v41 = vpop.f32.mrb[23].mxu1 }
 0x480   : > { %v2321_v42 = vrot.slane %v2308_v31, 4 }
 0x482   : > { %v2323_v47 = vsel %vm2322_vm9, %v2321_v42, %v2320_v63  ;;  %v4175_v42 = vld [vmem:[%s5714_s9] sm:$0xff]  }
 0x49d   : > { %v2178_v48 = vpop.f32.mrb[32].mxu0 }
 0x49e   : > { %v2285_v59 = vpack.c.bf16 %v2178_v48, %v2178_v48  ;;  %v3888_v61 = vpop.f32.mrb[33].mxu0  ;;  %v4177_v48 = vld [vmem:[%s5714_s9 + $0x8] sm:$0xff]  }
 0x49f   : > { %v2181_v14 = vpop.f32.mrb[34].mxu0 }
 0x4a0   : > { %v2309_v16 = vunpack.c.l.b16 %v2285_v59  ;;  %v3889_v34 = vpop.f32.mrb[35].mxu0  ;;  %v4178_v59 = vld [vmem:[%s5716_s11 + $0x8] sm:$0xff]  }
 0x4a2   : > { %v2324_v35 = vrot.slane %v2309_v16, 3 }
 0x4a4   : > { %v2326_v49 = vsel %vm2325_vm10, %v2324_v35, %v2323_v47  ;;  %v4176_v47 = vld [vmem:[%s5716_s11] sm:$0xff]  }
 0x4bb   : > { %v2226_v1 = vpop.f32.mrb[24].mxu1 }
 0x4bc   : > { %v2286_v43 = vpack.c.bf16 %v2226_v1, %v2226_v1  ;;  %v3908_v25 = vpop.f32.mrb[25].mxu1 }
 0x4bd   : > { %v2229_v17 = vpop.f32.mrb[26].mxu1  ;;  %v2274_v26 = vpop.f32.mrb[36].mxu0  ;;  %v4179_v25 = vld [vmem:[%s5773_s24] sm:$0xff]  }
 0x4be   : > { %v2310_v40 = vunpack.c.l.b16 %v2286_v43  ;;  %v2287_v22 = vpack.c.bf16 %v2274_v26, %v2274_v26  ;;  %v3909_v10 = vpop.f32.mrb[27].mxu1  ;;  %v3928_v27 = vpop.f32.mrb[37].mxu0  ;;  %v2782_v26 = vsel %vm823_vm2, %v4179_v25, 0 }
 0x4bf   : > { %v2277_v23 = vpop.f32.mrb[38].mxu0 }
 0x4c0   : > { %v2327_v28 = vrot.slane %v2310_v40, 2  ;;  %v2311_v32 = vunpack.c.l.b16 %v2287_v22  ;;  %v3929_v50 = vpop.f32.mrb[39].mxu0  ;;  %v4180_v22 = vld [vmem:[%s5773_s24 + $0x8] sm:$0xff]   ;;  %v4181_v23 = vld [vmem:[%s5773_s24 + $0x10] sm:$0xff]  }
 0x4c1   : > { %v2785_v27 = vsel %vm823_vm2, %v4180_v22, 0 }
 0x4c2   : > { %v2329_v2 = vsel %vm2328_vm11, %v2327_v28, %v2326_v49  ;;  %v2330_v37 = vrot.slane %v2311_v32, 1  ;;  %v2788_v28 = vsel %vm823_vm2, %v4181_v23, 0  ;;  %v4182_v32 = vld [vmem:[%s5773_s24 + $0x18] sm:$0xff]  }
 0x4c3   : > { %v2791_v50 = vsel %vm823_vm2, %v4182_v32, 0 }
 0x4c4   : > { %v2332_v55 = vsel %vm2331_vm12, %v2330_v37, %v2329_v2  ;;  %v4183_v2 = vld [vmem:[%s5773_s24 + $0x20] sm:$0xff]  }
 0x4c5   : > { %v2333_v11 = vpack.c.b16 %v2332_v55, %v2332_v55  ;;  %v2435_v54 = vpop.f32.mrb[40].mxu0  ;;  %v2794_v37 = vsel %vm823_vm2, %v4183_v2, 0  ;;  %v4184_v55 = vld [vmem:[%s5773_s24 + $0x28] sm:$0xff]  }
 0x4c6   : > { %v3944_v45 = vpop.f32.mrb[41].mxu0 }
 0x4c7   : > { %3935 = vmatmul.mubr.msk.bf16.vlgmr.msra.gmra.mrb[28].mxu1 %vm823_vm2, %v2333_v11  ;;  %3959 = vmatmul.mubr.msk.bf16.vlgmr.msra.gmra.mrb[44].mxu0 %vm823_vm2, %v2333_v11  ;;  %v2438_v38 = vpop.f32.mrb[42].mxu0  ;;  %v4185_v11 = vld [vmem:[%s5773_s24 + $0x30] sm:$0xff]   ;;  %s5774_s24 = scalar_lea.vmem [#allocation5], %s4590_s27 }
 0x4c8   : > { %3947 = vmatpush3.bf16.msra.mxu1 %v4173_v7  ;;  %3950 = vmatprep.mubr.msk.bf16.mxu1 %vm4415_vm1, %v4414_v4  ;;  %v3945_v58 = vpop.f32.mrb[43].mxu0  ;;  %v2797_v7 = vsel %vm823_vm2, %v4184_v55, 0 }
 0x4c9   : > { %3948 = vmatprep.subr.bf16.mxu1 %v4414_v4  ;;  %3974 = vmatprep.mubr.msk.bf16.mxu0 %vm4415_vm1, %v4414_v4  ;;  %v3370_v58 = vld [vmem:[%s5717_s12] ss:$0 sm:$0xff] }
 0x4ca   : > { %3971 = vmatpush3.bf16.msra.mxu0 %v4176_v47 }
 0x4cb   : > { %3972 = vmatprep.subr.bf16.mxu0 %v4414_v4 }
 0x4cc   : > { %3949 = vmatpush3.bf16.msra.mxu1 %v4174_v13  ;;  %v2800_v13 = vsel %vm823_vm2, %v4185_v11, 0 }
 0x4cd   : > { %3962 = vmatprep.subr.bf16.mxu1 %v4414_v4 }
 0x4ce   : > { %3973 = vmatpush3.bf16.msra.mxu0 %v4178_v59 }
 0x4cf   : > { %3951 = vmatmul.mubr.msk.bf16.vlgmr.msra.gmra.mrb[32].mxu1 %vm823_vm2, %v799_v60 }
 0x4d0   : > { %3966 = vmatprep.mubr.msk.bf16.mxu1 %vm4415_vm1, %v4414_v4  ;;  %3963 = vmatpush3.bf16.msra.mxu1 %v4175_v42 }
 0x4d1   : > { %3964 = vmatprep.subr.bf16.mxu1 %v4414_v4  ;;  %3975 = vmatmul.mubr.msk.bf16.vlgmr.msra.gmra.mrb[48].mxu0 %vm823_vm2, %v799_v60  ;;  %v2803_v60 = vsel %vm823_vm2, %v4186_v15, 0 }
 0x4d4   : > { %3965 = vmatpush3.bf16.msra.mxu1 %v4177_v48 }
 0x4d5   : > { %3978 = vmatprep.subr.bf16.mxu1 %v4414_v4 }
 0x59a   : > { %v2383_v3 = vpop.f32.mrb[28].mxu1  ;;  %v5459_v5 = vpop.f32.mrb[44].mxu0 }
 0x59b   : > { %v2436_v12 = vadd.f32 %v2435_v54, %v2383_v3  ;;  %v3936_v18 = vpop.f32.mrb[29].mxu1  ;;  %v3960_v24 = vpop.f32.mrb[45].mxu0 }
 0x59c   : > { %v2386_v19 = vpop.f32.mrb[30].mxu1  ;;  %v2595_v36 = vpop.f32.mrb[46].mxu0 }
 0x59d   : > { %v3937_v29 = vpop.f32.mrb[31].mxu1  ;;  %v3961_v33 = vpop.f32.mrb[47].mxu0 }
 0x5a2   : > { %v2494_v39 = vpop.f32.mrb[32].mxu1 }
 0x5a3   : > { %v2500_v0 = vadd.f32 %v2494_v39, %v2436_v12  ;;  %v3952_v44 = vpop.f32.mrb[33].mxu1 }
 0x5a4   : > { %v2497_v46 = vpop.f32.mrb[34].mxu1  ;;  %v2706_v35 = vpop.f32.mrb[48].mxu0 }
 0x5a5   : > { %v2508_v51 = vadd.f32 %v3359_v9, %v2500_v0  ;;  %v3953_v53 = vpop.f32.mrb[35].mxu1  ;;  %v3976_v49 = vpop.f32.mrb[49].mxu0 }
 0x5a6   : > { %v2709_v1 = vpop.f32.mrb[50].mxu0  ;;  %v4420_v53 = vmov (!%p3388_p12), 0.0  }
 0x5a7   : > { %4219 = vtanh.f32 %v2508_v51  ;;  %v3360_v57 = vmul.f32 -1.442695, %v2508_v51  ;;  %v3977_v43 = vpop.f32.mrb[51].mxu0  ;;  %v4234_v51 = vld [vmem:[%s5775_s21] sm:$0xff] (!%p3388_p12)   ;;  %3998 = vmatprep.subr.bf16.mxu0 (!%p3388_p12), %v4420_v53  ;;  %4014 = vmatprep.mubr.msk.bf16.mxu0 (!%p3388_p12), %vm4421_vm15, %v4420_v53 }
 0x5a8   : > { %3999 = vmatpush3.bf16.msra.mxu0 (!%p3388_p12), %v4234_v51 }
 0x5a9   : > { %4221 = vpow2.f32 %v3360_v57  ;;  %4000 = vmatprep.subr.bf16.mxu0 (!%p3388_p12), %v4420_v53  ;;  %v4236_v57 = vld [vmem:[%s5775_s21 + $0x10] sm:$0xff] (!%p3388_p12)  }
 0x5b1   : > { %v4220_v56 = vpop.eup %4219 }
 0x5b2   : > { %2522 = vrot.lane.b32.xlu0 %v4220_v56, %s4418_s26  ;;  %v4235_v56 = vld [vmem:[%s5775_s21 + $0x8] sm:$0xff] (!%p3388_p12)  }
 0x5b3   : > { %v4222_v62 = vpop.eup %4221  ;;  %4001 = vmatpush3.bf16.msra.mxu0 (!%p3388_p12), %v4235_v56 }
 0x5b4   : > { %v2512_v63 = vadd.f32 1.0, %v4222_v62  ;;  %4002 = vmatprep.subr.bf16.mxu0 (!%p3388_p12), %v4420_v53  ;;  %v4237_v62 = vld [vmem:[%s5775_s21 + $0x18] sm:$0xff] (!%p3388_p12)  }
 0x5b6   : > { %4223 = vrcp.f32 %v2512_v63  ;;  %v4238_v63 = vld [vmem:[%s5775_s21 + $0x20] sm:$0xff] (!%p3388_p12)  }
 0x5b7   : > { %4003 = vmatpush3.bf16.msra.mxu0 (!%p3388_p12), %v4236_v57 }
 0x5b8   : > { %4004 = vmatprep.subr.bf16.mxu0 (!%p3388_p12), %v4420_v53 }
 0x5bb   : > { %4005 = vmatpush3.bf16.msra.mxu0 (!%p3388_p12), %v4237_v62 }
 0x5bc   : > { %4006 = vmatprep.subr.bf16.mxu0 (!%p3388_p12), %v4420_v53 }
 0x5bf   : > { %4007 = vmatpush3.bf16.msra.mxu0 (!%p3388_p12), %v4238_v63 }
 0x5c0   : > { %v4224_v6 = vpop.eup %4223  ;;  %4008 = vmatprep.subr.bf16.mxu0 (!%p3388_p12), %v4420_v53 }
 0x5c1   : > { %v2520_v30 = vmul.f32 %v4224_v6, %v2518_v21 }
 0x624   : > { %v2523_v8 = vpop.permute.xlu0 %2522 }
 0x625   : > { %v2525_v20 = vmul.f32 %v4224_v6, %v2523_v8  ;;  %v4240_v8 = vld [vmem:[%s5775_s21 + $0x30] sm:$0xff] (!%p3388_p12)  }
 0x627   : > { %2527 = vrot.lane.b32.xlu1 %v2525_v20, %s5739_s22 }
 0x699   : > { %v2528_v31 = vpop.permute.xlu1 %2527 }
 0x69a   : > { %v2530_v41 = vadd.f32 %v2528_v31, %v2520_v30 }
 0x69c   : > { %4225 = vtanh.f32 %v2530_v41 }
 0x6a6   : > { %v4226_v61 = vpop.eup %4225 }
 0x6a7   : > { %2533 = vrot.lane.b32.xlu1 %v4226_v61, %s4418_s26 }
 0x719   : > { %v2534_v14 = vpop.permute.xlu1 %2533 }
 0x71a   : > { %v2536_v16 = vmul.f32 %v4224_v6, %v2534_v14  ;;  %v4239_v6 = vld [vmem:[%s5775_s21 + $0x28] sm:$0xff] (!%p3388_p12)   ;;  %v4422_v14 = vmov (!%p3388_p12), 1.0|1.0  }
 0x71b   : > { %4009 = vmatpush3.bf16.msra.mxu0 (!%p3388_p12), %v4239_v6 }
 0x71c   : > { %v2537_v34 = vpack.c.bf16 %v2536_v16, %v2536_v16  ;;  %2897 = vrot.lane.b32.xlu1 %v2536_v16, %s5772_s0  ;;  %4010 = vmatprep.subr.bf16.mxu0 (!%p3388_p12), %v4420_v53 }
 0x71e   : > { %2599 = vrot.lane.b32.xlu0 %v2537_v34, %s5772_s0 }
 0x71f   : > { %4011 = vmatpush3.bf16.msra.mxu0 (!%p3388_p12), %v4240_v8 }
 0x720   : > { %4012 = vmatprep.subr.bf16.mxu0 (!%p3388_p12), %v4420_v53 }
 0x722   : > { %2902 = vrot.lane.b32.xlu0 %v2530_v41, %s4419_s3  ;;  %v4241_v41 = vld [vmem:[%s5775_s21 + $0x38] sm:$0xff] (!%p3388_p12)  }
 0x723   : > { %4013 = vmatpush3.bf16.msra.mxu0 (!%p3388_p12), %v4241_v41 }
 0x78e   : > { %v5486_v17 = vpop.permute.xlu1 %2897 }
 0x78f   : > { %2900 = vst.msk [vmem:[#allocation2] sm:$0xff] %vm823_vm2, %v5486_v17 }
 0x790   : > { %v2600_v40 = vpop.permute.xlu0 %2599 }
 0x791   : > { %3967 = vmatmul.mubr.msk.bf16.vlgmr.msra.gmra.mrb[36].mxu1 %vm823_vm2, %v2600_v40 }
 0x792   : > { %3979 = vmatpush3.bf16.xpose.msra.mxu1 %v2782_v26  ;;  %3994 = vmatprep.mubr.msk.bf16.mxu1 %vm4415_vm1, %v4414_v4 }
 0x793   : > { %3980 = vmatprep.subr.bf16.mxu1 %v4414_v4 }
 0x794   : > { %v5498_v10 = vpop.permute.xlu0 %2902 }
 0x795   : > { %2905 = vst.msk [vmem:[#allocation3] sm:$0xff] %vm823_vm2, %v5498_v10 }
 0x79a   : > { %3981 = vmatpush3.bf16.xpose.msra.mxu1 %v2785_v27 }
 0x79b   : > { %3982 = vmatprep.subr.bf16.mxu1 %v4414_v4 }
 0x7a2   : > { %3983 = vmatpush3.bf16.xpose.msra.mxu1 %v2788_v28 }
 0x7a3   : > { %3984 = vmatprep.subr.bf16.mxu1 %v4414_v4 }
 0x7aa   : > { %3985 = vmatpush3.bf16.xpose.msra.mxu1 %v2791_v50 }
 0x7ab   : > { %3986 = vmatprep.subr.bf16.mxu1 %v4414_v4 }
 0x7b2   : > { %3987 = vmatpush3.bf16.xpose.msra.mxu1 %v2794_v37 }
 0x7b3   : > { %3988 = vmatprep.subr.bf16.mxu1 %v4414_v4 }
 0x7ba   : > { %3989 = vmatpush3.bf16.xpose.msra.mxu1 %v2797_v7 }
 0x7bb   : > { %3990 = vmatprep.subr.bf16.mxu1 %v4414_v4 }
 0x7c2   : > { %3991 = vmatpush3.bf16.xpose.msra.mxu1 %v2800_v13 }
 0x7c3   : > { %3992 = vmatprep.subr.bf16.mxu1 %v4414_v4 }
 0x7ca   : > { %3993 = vmatpush3.bf16.xpose.msra.mxu1 %v2803_v60 }
 0x864   : > { %v2650_v54 = vpop.f32.mrb[36].mxu1 }
 0x865   : > { %v2651_v45 = vadd.f32 %v2650_v54, %v5459_v5  ;;  %v3968_v38 = vpop.f32.mrb[37].mxu1 }
 0x866   : > { %v2653_v3 = vpop.f32.mrb[38].mxu1 }
 0x867   : > { %v2712_v12 = vadd.f32 %v2706_v35, %v2651_v45  ;;  %v3969_v18 = vpop.f32.mrb[39].mxu1 }
 0x869   : > { %v2720_v4 = vadd.f32 %v3370_v58, %v2712_v12 }
 0x86b   : > { %v2721_v24 = vpack.c.bf16 %v2720_v4, %v2720_v4 }
 0x86d   : > { %3995 = vmatmul.mubr.msk.bf16.vlgmr.msra.gmra.mrb[40].mxu1 %vm823_vm2, %v2721_v24 }
 0x93d   : > { %2909 = sbr.rel (%p3388_p12) target bundleno = 3025 (0xbd1), region = 88 }
 0x940   : > { %v2839_v19 = vpop.f32.mrb[40].mxu1 }
 0x941   : > { %v2845_v36 = vpack.c.bf16 %v2839_v19, %v2839_v19  ;;  %v3996_v29 = vpop.f32.mrb[41].mxu1  ;;  %v2910_v5 = vsel (!%p3388_p12), %vm797_vm3, %v2839_v19, -1e+30 }
 0x942   : > { %v2842_v33 = vpop.f32.mrb[42].mxu1  ;;  %2911 = vmax.xlane.f32.xlu0 (!%p3388_p12), %v2910_v5 }
 0x943   : > { %2846 = vst [vmem:[%s5774_s24] sm:$0xf] %v2845_v36  ;;  %v3997_v39 = vpop.f32.mrb[43].mxu1 }
 0x9cf   : > { %v2912_v9 = vpop.xlane.xlu0 %2911 }
 0x9d0   : > { %vm2913_vm13 = vcmp.eq.f32.partialorder %v2910_v5, %v2912_v9 }
 0x9d1   : > { %v2914_v0 = vsel %vm2913_vm13, %v4910_v52, 128 }
 0x9d2   : > { %v2916_v44 = vshra.s32 %v2914_v0, 16  ;;  %v2915_v20 = vand.u32 65535, %v2914_v0 }
 0x9d4   : > { %v2918_v46 = vcvt.s32.f32 %v2916_v44  ;;  %v2917_v30 = vcvt.s32.f32 %v2915_v20 }
 0x9d6   : > { %2919 = vmin.xlane.f32.xlu0 %v2918_v46 }
 0xa63   : > { %v2920_v21 = vpop.xlane.xlu0 %2919 }
 0xa64   : > { %vm2921_vm14 = vcmp.eq.f32.partialorder %v2918_v46, %v2920_v21  ;;  %v2926_v42 = vcvt.f32.s32 %v2920_v21 }
 0xa65   : > { %v2922_v31 = vsel %vm2921_vm14, %v2917_v30, inf }
 0xa66   : > { %2923 = vmin.xlane.f32.xlu1 %v2922_v31  ;;  %v2927_v48 = vshll.u32 %v2926_v42, 16 }
 0xaf3   : > { %v2924_v47 = vpop.xlane.xlu1 %2923 }
 0xaf4   : > { %v2925_v59 = vcvt.f32.s32 %v2924_v47 }
 0xaf6   : > { %v2928_v61 = vadd.s32 %v2927_v48, %v2925_v59 }
 0xaf8   : > { %vm2929_vm0 = vcmp.eq.s32.totalorder %v4910_v52, %v2928_v61 }
 0xaf9   : > { %vm3398_vm1 = vmpackc.low %vm2929_vm0, %vm2929_vm0 }
 0xafa   : > { %4015 = vmatmul.mubr.msk.bf16.vlgmr.msra.gmra.mrb[0].mxu0 %vm3398_vm1, %v4422_v14 }
 0xbcd   : > { %v3031_v16 = vpop.f32.mrb[0].mxu0 }
 0xbce   : > { %3037 = vst.msk [vmem:[#allocation4] sm:$0xff] %vm823_vm2, %v3031_v16  ;;  %v4016_v34 = vpop.f32.mrb[1].mxu0 }
 0xbcf   : > { %v3034_v35 = vpop.f32.mrb[2].mxu0 }
 0xbd0   : > { %v4017_v49 = vpop.f32.mrb[3].mxu0 }
 0xbd1 PF: > { %p3400_p13 = scmp.ne.s32.totalorder %s4404_s30, 5 }
 0xbd2   : > { %3042 = vst.msk [vmem:[#allocation9] sm:$0xff] (!%p3400_p13), %vm823_vm2, %v5486_v17  ;;  %3043 = vst.msk [vmem:[#allocation10] sm:$0xff] (!%p3400_p13), %vm823_vm2, %v5498_v10 }
 0xbd3   : > { %3041 = sbr.rel (%p3400_p13) target bundleno = 3034 (0xbda), region = 92 }
 0xbda PF: > { %s5776_s21 = sadd.s32 4294967295, %s4412_s19   ;;  %s3403_s1 = sshll.u32 %s4404_s30, 6 }
 0xbdb   : > { %s5577_s29 = sand.u32 1, %s5776_s21   ;;  %s5583_s3 = scalar_lea.hbm %s5721_s16, %s3403_s1 }
 0xbdc   : > { %s5777_s22 = scalar_lea.vmem [#allocation7], %s4590_s27  ;;  %s5592_s5 = scalar_lea.hbm %s5720_s15, %s3403_s1 }
 0xbdd   : > { %s3078_s26 = sshll.u32 %s5777_s22, 4  ;;  %s3050_s21 = scalar_lea.sflag [#allocation8], %s5577_s29  ;;  %s5587_s26 = int_to_ptr.vmem [resolvable:$true] %s3078_s26 }
 0xbde   : > { %s4242_s6 = scalar_lea.vmem %s5587_s26, 64  ;;  %s4423_s30 = smov [#allocation7]  }
 0xbdf   : > { %p4243_p0 = scmp.ne.s32.totalorder %s5587_s26, %s4242_s6  ;;  %s4246_s25 = sshll.u32 %s4423_s30, 4  ;;  %s4247_s25 = int_to_ptr.vmem [resolvable:$false] %s4246_s25 }
 0xbe0   : > { %s4248_s0 = scalar_lea.vmem %s4247_s25, 128  ;;  %p4249_p5 = scmp.lt.s32.totalorder %s5587_s26, %s4247_s25 }
 0xbe1   : > { %p4244_p1 = pnand %p4243_p0, %p4570_p4  ;;  %p4250_p6 = scmp.lt.s32.totalorder %s4248_s0, %s4242_s6 }
 0xbe3   : > { %p4245_p3 = pneg %p4244_p1  ;;  %p4251_p7 = por %p4250_p6, %p4249_p5 }
 0xbe5   : > { %p4252_p9 = pnand %p4251_p7, %p4245_p3 }
 0xbe7   : > { %4255 = shalt.err (!%p4252_p9)
}
 0xbe8   : > { %s4256_s4 = scalar_lea.hbm %s5583_s3, 64  ;;  %s4260_s22 = scalar_lea.hbm %s5721_s16, 384 }
 0xbe9   : > { %p4257_p10 = scmp.ne.s32.totalorder %s5583_s3, %s4256_s4  ;;  %p4261_p13 = scmp.lt.u32.totalorder %s5583_s3, %s5721_s16 }
 0xbea   : > { %p4262_p0 = scmp.lt.u32.totalorder %s4260_s22, %s4256_s4  ;;  %p4264_p3 = scmp.lt.u32.totalorder %s4256_s4, %s5583_s3 }
 0xbeb   : > { %p4258_p11 = pnand %p4257_p10, %p4570_p4 }
 0xbec   : > { %p4263_p1 = por %p4262_p0, %p4261_p13 }
 0xbed   : > { %p4259_p12 = pneg %p4258_p11 }
 0xbee   : > { %p4265_p5 = por %p4264_p3, %p4263_p1 }
 0xbf0   : > { %p4266_p6 = pnand %p4265_p5, %p4259_p12 }
 0xbf2   : > { %4269 = shalt.err (!%p4266_p6)
}
 0xbf3   : > { %4019 = dma.vmem_to_hbm [thread:$0]  (%p4570_p4), %s5587_s26, 64, %s5583_s3, %s3050_s21  }
 0xbf4   : > { %s5778_s6 = scalar_lea.vmem [#allocation5], %s4590_s27  ;;  %s5779_s0 = sand.u32 1, %s4396_s28  }
 0xbf5   : > { %s3064_s25 = sshll.u32 %s5778_s6, 4  ;;  %s3045_s29 = scalar_lea.sflag [#allocation6], %s5779_s0  ;;  %s3065_s25 = int_to_ptr.vmem [resolvable:$true] %s3064_s25 }
 0xbf6   : > { %s4270_s1 = scalar_lea.vmem %s3065_s25, 64  ;;  %s4424_s4 = smov [#allocation5]  }
 0xbf7   : > { %p4271_p7 = scmp.ne.s32.totalorder %s3065_s25, %s4270_s1  ;;  %s4274_s22 = sshll.u32 %s4424_s4, 4  ;;  %s4275_s22 = int_to_ptr.vmem [resolvable:$false] %s4274_s22 }
 0xbf8   : > { %s4276_s24 = scalar_lea.vmem %s4275_s22, 128  ;;  %p4277_p11 = scmp.lt.s32.totalorder %s3065_s25, %s4275_s22 }
 0xbf9   : > { %p4272_p9 = pnand %p4271_p7, %p4570_p4  ;;  %p4278_p12 = scmp.lt.s32.totalorder %s4276_s24, %s4270_s1 }
 0xbfb   : > { %p4273_p10 = pneg %p4272_p9  ;;  %p4279_p13 = por %p4278_p12, %p4277_p11 }
 0xbfd   : > { %p4280_p0 = pnand %p4279_p13, %p4273_p10 }
 0xbff   : > { %4283 = shalt.err (!%p4280_p0)
}
 0xc00   : > { %s4284_s27 = scalar_lea.hbm %s5592_s5, 64  ;;  %s4288_s21 = scalar_lea.hbm %s5720_s15, 384 }
 0xc01   : > { %p4285_p1 = scmp.ne.s32.totalorder %s5592_s5, %s4284_s27  ;;  %p4289_p6 = scmp.lt.u32.totalorder %s5592_s5, %s5720_s15 }
 0xc02   : > { %p4290_p7 = scmp.lt.u32.totalorder %s4288_s21, %s4284_s27  ;;  %p4292_p10 = scmp.lt.u32.totalorder %s4284_s27, %s5592_s5 }
 0xc03   : > { %p4286_p3 = pnand %p4285_p1, %p4570_p4 }
 0xc04   : > { %p4291_p9 = por %p4290_p7, %p4289_p6 }
 0xc05   : > { %p4287_p5 = pneg %p4286_p3 }
 0xc06   : > { %p4293_p11 = por %p4292_p10, %p4291_p9 }
 0xc08   : > { %p4294_p12 = pnand %p4293_p11, %p4287_p5 }
 0xc0a   : > { %4297 = shalt.err (!%p4294_p12)
}
 0xc0b   : > { %4018 = dma.vmem_to_hbm [thread:$0]  (%p4570_p4), %s3065_s25, 64, %s5592_s5, %s3045_s29  }
 0xc0c   : > { %s4425_s0 = smov [#allocation9]   ;;  %s4426_s4 = smov [#allocation10]  }
 0xc0d   : > { %s3091_s1 = sshll.u32 %s4425_s0, 4  ;;  %s3104_s22 = sshll.u32 %s4426_s4, 4  ;;  %s3092_s1 = int_to_ptr.vmem [resolvable:$true] %s3091_s1  ;;  %s3105_s22 = int_to_ptr.vmem [resolvable:$true] %s3104_s22 }
 0xc0e   : > { %s4298_s24 = scalar_lea.vmem %s3092_s1, 128  ;;  %p4305_p3 = scmp.lt.s32.totalorder %s3092_s1, %s3092_s1 }
 0xc0f   : > { %p4299_p13 = scmp.ne.s32.totalorder %s3092_s1, %s4298_s24  ;;  %p4306_p6 = scmp.lt.s32.totalorder %s4298_s24, %s4298_s24 }
 0xc11   : > { %p4300_p0 = pnand %p4299_p13, %p4560_p2  ;;  %p4307_p7 = por %p4306_p6, %p4305_p3 }
 0xc13   : > { %p4301_p1 = pneg %p4300_p0 }
 0xc15   : > { %p4308_p5 = pnand %p4307_p7, %p4301_p1 }
 0xc17   : > { %4311 = shalt.err (!%p4308_p5)
}
 0xc18   : > { %s4312_s5 = scalar_lea.hbm %s5722_s17, 128 }
 0xc19   : > { %p4313_p4 = scmp.ne.s32.totalorder %s5722_s17, %s4312_s5  ;;  %p4318_p11 = scmp.lt.u32.totalorder %s4312_s5, %s5722_s17 }
 0xc1b   : > { %p4314_p9 = pnand %p4313_p4, %p4560_p2 }
 0xc1d   : > { %p4315_p10 = pneg %p4314_p9 }
 0xc1f   : > { %p4320_p12 = pnand %p4318_p11, %p4315_p10 }
 0xc21   : > { %4323 = shalt.err (!%p4320_p12)
}
 0xc22   : > { %4021 = dma.vmem_to_hbm [thread:$0]  (%p4560_p2), %s3092_s1, 128, %s5722_s17, [#allocation8]  }
 0xc23   : > { %s4324_s6 = scalar_lea.vmem %s3105_s22, 128  ;;  %p4331_p3 = scmp.lt.s32.totalorder %s3105_s22, %s3105_s22 }
 0xc24   : > { %p4325_p13 = scmp.ne.s32.totalorder %s3105_s22, %s4324_s6  ;;  %p4332_p6 = scmp.lt.s32.totalorder %s4324_s6, %s4324_s6 }
 0xc26   : > { %p4326_p0 = pnand %p4325_p13, %p4560_p2  ;;  %p4333_p7 = por %p4332_p6, %p4331_p3 }
 0xc28   : > { %p4327_p1 = pneg %p4326_p0 }
 0xc2a   : > { %p4334_p5 = pnand %p4333_p7, %p4327_p1 }
 0xc2c   : > { %4337 = shalt.err (!%p4334_p5)
}
 0xc2d   : > { %s4338_s24 = scalar_lea.hbm %s5723_s18, 128 }
 0xc2e   : > { %p4339_p4 = scmp.ne.s32.totalorder %s5723_s18, %s4338_s24  ;;  %p4344_p11 = scmp.lt.u32.totalorder %s4338_s24, %s5723_s18 }
 0xc30   : > { %p4340_p9 = pnand %p4339_p4, %p4560_p2 }
 0xc32   : > { %p4341_p10 = pneg %p4340_p9 }
 0xc34   : > { %p4346_p12 = pnand %p4344_p11, %p4341_p10 }
 0xc36   : > { %4349 = shalt.err (!%p4346_p12)
}
 0xc37   : > { %4023 = dma.vmem_to_hbm [thread:$0]  (%p4560_p2), %s3105_s22, 128, %s5723_s18, [#allocation11]  }
 0xc38   : > { %4375 = dma.done.wait (%p4560_p2), [#allocation8], 128  }
 0xc39   : > { %4377 = vsyncadd (%p4560_p2), [#allocation8], 4294967168 }
 0xc3a   : > { %4379 = dma.done.wait (%p4560_p2), [#allocation11], 128  }
 0xc3b   : > { %4381 = vsyncadd (%p4560_p2), [#allocation11], 4294967168 }
 0xc3c PF: > { %s5780_s3 = sld [smem:[#allocation16_spill]]  ;;  %p4041_p13 = scmp.ge.s32.totalorder %s4412_s19, 2 }
 0xc3e   : > { %p4031_p0 = pnand %p4041_p13, %p4579_p8 }
 0xc42   : > { %s3124_s21 = sand.u32 1, %s5780_s3  }
 0xc43   : > { %s3125_s22 = scalar_lea.sflag [#allocation6], %s3124_s21 }
 0xc44   : > { %4383 = dma.done.wait (!%p4031_p0), %s3125_s22, 64  }
 0xc45   : > { %4385 = vsyncadd (!%p4031_p0), %s3125_s22, 4294967232  ;;  %s5782_s30 = sadd.s32 4294967294, %s4412_s19  }
 0xc46   : > { %s3133_s6 = sand.u32 1, %s5782_s30  }
 0xc47   : > { %s3134_s0 = scalar_lea.sflag [#allocation8], %s3133_s6 }
 0xc48   : > { %4387 = dma.done.wait (!%p4031_p0), %s3134_s0, 64  }
 0xc49   : > { %4389 = vsyncadd (!%p4031_p0), %s3134_s0, 4294967232  ;;  %s36_s19 = sadd.s32 1, %s4412_s19   ;;  %s5783_s2 = sld [smem:[#allocation17_spill]] }
 0xc4a   : > { %p33_p2 = scmp.ge.s32.totalorder %s36_s19, 8   ;;  %s5784_s29 = sld [smem:[#allocation21_spill]] }
 0xc4b   : > { %s5785_s30 = sld [smem:[#allocation18_spill]]  ;;  %s5786_s0 = sld [smem:[#allocation19_spill]] }
 0xc4c   : > { %s5787_s27 = smov %s4396_s28  ;;  %35 = sbr.rel (!%p33_p2) target bundleno = 15 (0xf), region = 168 }
 0xc4f   : > { %s5788_s28 = smov %s5783_s2 }
 0xc53   :  { %3139 = vsyncpa [#allocation6], 1 }
 0xc54   :  { %3141 = vsyncpa [#allocation6 + $0x1], 1 }
 0xc55   :  { %3142 = vsyncpa [#allocation8], 1 }
 0xc56   :  { %3144 = vsyncpa [#allocation8 + $0x1], 1 }
 0xc57   :  { %3145 = vsyncpa [#allocation11], 1 }

</bundles_post_ra>
